<compile_context>
chip_gen: v7x
topology: tpu7x:2x2x1
jax: 0.10.0
libtpu: 0.0.40
codegen_flags: <defaults>
</compile_context>

<pallas_src>
import jax
import jax.numpy as jnp
from jax.experimental import pallas as pl
from jax.experimental.pallas import tpu as pltpu


def _pick_row_tile(h, target):
    t = min(h, max(1, target))
    while h % t:
        t -= 1
    return t


def _phase_weights(weight_oihw, compute_dtype):
    """Fold the nearest-2x upsample into the 3x3 conv weights.

    Returns (16, C, C) phase kernels indexed [py*8 + px*4 + r*2 + c, ci, co]:
    out[2yi+py, 2xi+px] = sum_{r,c} xp[yi+py+r, xi+px+c] @ K[py,px,r,c]
    with xp the zero-padded coarse input.
    """
    w_hwio = jnp.transpose(weight_oihw, (2, 3, 1, 0)).astype(jnp.float32)
    # Tap grouping per output parity (nearest upsample):
    #   parity 0: coarse row y-1 <- w[0];        coarse row y   <- w[1]+w[2]
    #   parity 1: coarse row y   <- w[0]+w[1];   coarse row y+1 <- w[2]
    g = jnp.array([[[1., 0., 0.], [0., 1., 1.]],
                   [[1., 1., 0.], [0., 0., 1.]]], dtype=jnp.float32)
    w_phase = jnp.einsum('ary,bcx,yxio->abrcio', g, g, w_hwio)
    c = weight_oihw.shape[0]
    return w_phase.reshape(16, c, c).astype(compute_dtype)


def _upconv_kernel(xp_ref, w_ref, b_ref, o_ref, acc_ref):
    # xp_ref : (1, H+2, W+2, C)  zero-padded coarse input (VMEM-resident per n)
    # w_ref  : (16, C, C)        folded 2x2 phase kernels [py,px,r,c -> ci,co]
    # b_ref  : (1, C)            bias (f32)
    # o_ref  : (1, TI, 2, W, 2C) output strip, phase-interleaved layout
    #                            (rows [2*t*TI, 2*(t+1)*TI) of the NHWC output)
    # acc_ref: (4, TI*W, C) f32  per-phase accumulators (scratch)
    TI = o_ref.shape[1]
    W = o_ref.shape[3]
    C = acc_ref.shape[2]
    M = TI * W

    t = pl.program_id(1)
    r0 = pl.multiple_of(t * TI, TI)

    # Bias folded into accumulator init (saves a separate epilogue pass).
    acc_ref[...] = jnp.broadcast_to(
        b_ref[...].astype(jnp.float32).reshape(1, 1, C), (4, M, C))

    # 9 distinct tap operands (ref-level slices) feed 16 MXU matmuls that
    # accumulate straight into VMEM scratch.  (A K-fused variant would need an
    # (M, 2C/4C) LHS copy per phase whose build cost matches the saved add
    # passes at these tap counts, so per-tap accumulation is kept.)
    for dy in range(3):
        for dx in range(3):
            lhs = xp_ref[0, pl.ds(r0 + dy, TI), pl.ds(dx, W), :]
            lhs = lhs.reshape(M, C)
            for py in range(max(0, dy - 1), min(1, dy) + 1):
                r = dy - py
                for px in range(max(0, dx - 1), min(1, dx) + 1):
                    c = dx - px
                    acc_ref[py * 2 + px] += jnp.dot(
                        lhs, w_ref[py * 8 + px * 4 + r * 2 + c],
                        preferred_element_type=jnp.float32)

    # Pixel-shuffle epilogue: each phase lands in its interleaved slot of the
    # output block; (N, H, 2, W, 2C) is a free reshape of NHWC (N, 2H, 2W, C).
    for py in range(2):
        for px in range(2):
            val = acc_ref[py * 2 + px].reshape(TI, 1, W, C)
            o_ref[0, :, pl.ds(py, 1), :, pl.ds(px * C, C)] = (
                val.astype(o_ref.dtype))


def up_block_forward(x_nchw, weight_oihw, bias, with_conv=True, row_tile=8,
                     compute_dtype=None):
    """UpBlock forward: (N, C, H, W) -> (N, C, 2H, 2W), matching PyTorch."""
    if not with_conv:
        # TODO(synk): only mode='nearest' (module default) is implemented.
        return jnp.repeat(jnp.repeat(x_nchw, 2, axis=2), 2, axis=3)

    N, C, H, W = x_nchw.shape
    Ho, Wo = 2 * H, 2 * W
    TI = _pick_row_tile(H, row_tile)   # v6e: 16-32 is better if VMEM allows
    Hp, Wp = H + 2, W + 2
    out_dtype = x_nchw.dtype
    cdt = jnp.dtype(compute_dtype) if compute_dtype is not None else jnp.dtype(x_nchw.dtype)

    # NCHW -> NHWC on the SMALL coarse tensor + the conv's padding=1 expressed
    # on the coarse grid.  No upsampled temporary is materialized (the 2x
    # upsample is folded into the weights).
    x_nhwc = jnp.transpose(x_nchw, (0, 2, 3, 1)).astype(cdt)
    x_pad = jnp.pad(x_nhwc, ((0, 0), (1, 1), (1, 1), (0, 0)))

    w_flat = _phase_weights(weight_oihw, cdt)            # (16, C, C)
    b2d = bias.reshape(1, C).astype(jnp.float32)

    # Size-derived VMEM budget (resident input + double-buffered out/weights).
    in_b = 2 * Hp * Wp * C * cdt.itemsize
    w_b = 2 * 16 * C * C * cdt.itemsize
    out_b = 2 * TI * 2 * W * 2 * C * jnp.dtype(out_dtype).itemsize
    acc_b = 4 * TI * W * C * 4
    vmem_limit = int(min(max(2 * (in_b + w_b + out_b + acc_b) + (16 << 20),
                             32 << 20), 100 << 20))

    out5 = pl.pallas_call(
        _upconv_kernel,
        out_shape=jax.ShapeDtypeStruct((N, H, 2, W, 2 * C), out_dtype),
        grid_spec=pltpu.PrefetchScalarGridSpec(
            num_scalar_prefetch=0,
            grid=(N, H // TI),
            in_specs=[
                # Whole padded coarse image per batch element; constant block
                # index along t -> DMA'd once per n, stays VMEM-resident.
                pl.BlockSpec((1, Hp, Wp, C), lambda n, t: (n, 0, 0, 0)),
                pl.BlockSpec((16, C, C), lambda n, t: (0, 0, 0)),
                pl.BlockSpec((1, C), lambda n, t: (0, 0)),
            ],
            out_specs=pl.BlockSpec((1, TI, 2, W, 2 * C),
                                   lambda n, t: (n, t, 0, 0, 0)),
            scratch_shapes=[pltpu.VMEM((4, TI * W, C), jnp.float32)],
        ),
        compiler_params=pltpu.CompilerParams(
            # Batch axis parallel so megacore (v7x) splits over n and never
            # duplicates the resident input block; row-tile axis arbitrary.
            dimension_semantics=("parallel", "arbitrary"),
            vmem_limit_bytes=vmem_limit,
        ),
    )(x_pad, w_flat, b2d)

    out_nhwc = out5.reshape(N, Ho, Wo, C)   # free reshape (same memory layout)
    # TODO(synk): this final NHWC->NCHW transpose is a full HBM round trip kept
    # only to honor the PyTorch NCHW contract; drop it for NHWC callers.
    return jnp.transpose(out_nhwc, (0, 3, 1, 2))


def _reference_forward(x_nchw, weight_oihw, bias, with_conv=True):
    x_up = jnp.repeat(jnp.repeat(x_nchw, 2, axis=2), 2, axis=3)
    if not with_conv:
        return x_up
    out = jax.lax.conv_general_dilated(
        x_up, weight_oihw,
        window_strides=(1, 1),
        padding=((1, 1), (1, 1)),
        dimension_numbers=("NCHW", "OIHW", "NCHW"),
        precision=jax.lax.Precision.HIGHEST,
    )
    return out + bias.reshape(1, -1, 1, 1)


if __name__ == "__main__":
    key = jax.random.PRNGKey(0)
    k_x, k_w, k_b = jax.random.split(key, 3)

    N, C, H, W = 2, 4, 16, 16   # out_chs = 4

    x = jax.random.normal(k_x, (N, C, H, W), dtype=jnp.float32)

    # Deterministic synthetic init for Conv2d(out_chs, out_chs, 3, padding=1).
    fan_in = C * 3 * 3
    bound = 1.0 / (fan_in ** 0.5)
    weight = jax.random.uniform(
        k_w, (C, C, 3, 3), minval=-bound, maxval=bound, dtype=jnp.float32)
    bias = jax.random.uniform(
        k_b, (C,), minval=-bound, maxval=bound, dtype=jnp.float32)

    out = up_block_forward(x, weight, bias, with_conv=True)
    out = jax.block_until_ready(out)

    ref = _reference_forward(x, weight, bias, with_conv=True)
    assert out.shape == (N, C, 2 * H, 2 * W)
    assert jnp.allclose(out, ref, atol=1e-3, rtol=1e-3), "mismatch vs reference conv"

    print("KERNEL_OK")
</pallas_src>

<mosaic_0001>
module attributes {stable_mosaic.version = 11 : i64} {
  func.func @_upconv_kernel(%arg0: i32, %arg1: i32, %arg2: memref<1x18x18x4xf32, #tpu.memory_space<vmem>>, %arg3: memref<16x4x4xf32, #tpu.memory_space<vmem>>, %arg4: memref<1x4xf32, #tpu.memory_space<vmem>>, %arg5: memref<1x8x2x16x8xf32, #tpu.memory_space<vmem>>, %arg6: memref<4x128x4xf32, #tpu.memory_space<vmem>>) attributes {dimension_semantics = [#tpu.dimension_semantics<parallel>, #tpu.dimension_semantics<arbitrary>], iteration_bounds = array<i64: 2, 2>, scalar_prefetch = 0 : i64, scratch_operands = 1 : i64, tpu.core_type = #tpu.core_type<tc>, window_params = [{transform_indices = @transform_0, window_bounds = array<i64: 1, 18, 18, 4>}, {pipeline_mode = #tpu.pipeline_mode<synchronous>, transform_indices = @transform_1, window_bounds = array<i64: 16, 4, 4>}, {pipeline_mode = #tpu.pipeline_mode<synchronous>, transform_indices = @transform_2, window_bounds = array<i64: 1, 4>}, {transform_indices = @transform_3, window_bounds = array<i64: 1, 8, 2, 16, 8>}]} {
    %c8_i32 = arith.constant 8 : i32
    %0 = arith.muli %arg1, %c8_i32 : i32
    %1 = tpu.assume_multiple %0, 8 : i32
    %c0 = arith.constant 0 : index
    %c0_0 = arith.constant 0 : index
    %2 = vector.load %arg4[%c0, %c0_0] : memref<1x4xf32, #tpu.memory_space<vmem>>, vector<1x4xf32>
    %3 = vector.shape_cast %2 : vector<1x4xf32> to vector<1x1x4xf32>
    %4 = vector.shape_cast %3 : vector<1x1x4xf32> to vector<1x1x4xf32>
    %5 = vector.broadcast %4 : vector<1x1x4xf32> to vector<4x128x4xf32>
    %c0_1 = arith.constant 0 : index
    %c0_2 = arith.constant 0 : index
    %c0_3 = arith.constant 0 : index
    %6 = vector.load %arg6[%c0_1, %c0_2, %c0_3] : memref<4x128x4xf32, #tpu.memory_space<vmem>>, vector<4x128x4xf32>
    tpu.vector_store %arg6[%c0_1, %c0_2, %c0_3], %5 {strides = array<i32>} : memref<4x128x4xf32, #tpu.memory_space<vmem>>, vector<4x128x4xf32>,
    %c0_i32 = arith.constant 0 : i32
    %7 = arith.addi %1, %c0_i32 : i32
    %c0_4 = arith.constant 0 : index
    %8 = arith.index_cast %7 : i32 to index
    %c0_5 = arith.constant 0 : index
    %c0_6 = arith.constant 0 : index
    %9 = vector.load %arg2[%c0_4, %8, %c0_5, %c0_6] : memref<1x18x18x4xf32, #tpu.memory_space<vmem>>, vector<1x8x16x4xf32>
    %10 = vector.shape_cast %9 : vector<1x8x16x4xf32> to vector<8x16x4xf32>
    %11 = vector.shape_cast %10 : vector<8x16x4xf32> to vector<128x4xf32>
    %c0_7 = arith.constant 0 : index
    %c0_8 = arith.constant 0 : index
    %c0_9 = arith.constant 0 : index
    %12 = vector.load %arg6[%c0_7, %c0_8, %c0_9] : memref<4x128x4xf32, #tpu.memory_space<vmem>>, vector<1x128x4xf32>
    %13 = vector.shape_cast %12 : vector<1x128x4xf32> to vector<128x4xf32>
    %c0_10 = arith.constant 0 : index
    %c0_11 = arith.constant 0 : index
    %c0_12 = arith.constant 0 : index
    %14 = vector.load %arg3[%c0_10, %c0_11, %c0_12] : memref<16x4x4xf32, #tpu.memory_space<vmem>>, vector<1x4x4xf32>
    %15 = vector.shape_cast %14 : vector<1x4x4xf32> to vector<4x4xf32>
    %cst = arith.constant dense<0.000000e+00> : vector<128x4xf32>
    %16 = tpu.matmul %11, %15, %cst {dimension_numbers = #tpu.dot_dimension_numbers<[1], [0], [0], [1], [0, 0, 1, 1], [], []>} : vector<128x4xf32>, vector<4x4xf32>, vector<128x4xf32> -> vector<128x4xf32>
    %17 = arith.addf %13, %16 : vector<128x4xf32>
    %c0_13 = arith.constant 0 : index
    %c0_14 = arith.constant 0 : index
    %c0_15 = arith.constant 0 : index
    %18 = vector.load %arg6[%c0_13, %c0_14, %c0_15] : memref<4x128x4xf32, #tpu.memory_space<vmem>>, vector<1x128x4xf32>
    %19 = vector.shape_cast %18 : vector<1x128x4xf32> to vector<128x4xf32>
    %20 = vector.shape_cast %17 : vector<128x4xf32> to vector<1x128x4xf32>
    tpu.vector_store %arg6[%c0_13, %c0_14, %c0_15], %20 {strides = array<i32>} : memref<4x128x4xf32, #tpu.memory_space<vmem>>, vector<1x128x4xf32>,
    %c0_i32_16 = arith.constant 0 : i32
    %21 = arith.addi %1, %c0_i32_16 : i32
    %c0_17 = arith.constant 0 : index
    %22 = arith.index_cast %21 : i32 to index
    %c1 = arith.constant 1 : index
    %c0_18 = arith.constant 0 : index
    %23 = vector.load %arg2[%c0_17, %22, %c1, %c0_18] : memref<1x18x18x4xf32, #tpu.memory_space<vmem>>, vector<1x8x16x4xf32>
    %24 = vector.shape_cast %23 : vector<1x8x16x4xf32> to vector<8x16x4xf32>
    %25 = vector.shape_cast %24 : vector<8x16x4xf32> to vector<128x4xf32>
    %c0_19 = arith.constant 0 : index
    %c0_20 = arith.constant 0 : index
    %c0_21 = arith.constant 0 : index
    %26 = vector.load %arg6[%c0_19, %c0_20, %c0_21] : memref<4x128x4xf32, #tpu.memory_space<vmem>>, vector<1x128x4xf32>
    %27 = vector.shape_cast %26 : vector<1x128x4xf32> to vector<128x4xf32>
    %c1_22 = arith.constant 1 : index
    %c0_23 = arith.constant 0 : index
    %c0_24 = arith.constant 0 : index
    %28 = vector.load %arg3[%c1_22, %c0_23, %c0_24] : memref<16x4x4xf32, #tpu.memory_space<vmem>>, vector<1x4x4xf32>
    %29 = vector.shape_cast %28 : vector<1x4x4xf32> to vector<4x4xf32>
    %cst_25 = arith.constant dense<0.000000e+00> : vector<128x4xf32>
    %30 = tpu.matmul %25, %29, %cst_25 {dimension_numbers = #tpu.dot_dimension_numbers<[1], [0], [0], [1], [0, 0, 1, 1], [], []>} : vector<128x4xf32>, vector<4x4xf32>, vector<128x4xf32> -> vector<128x4xf32>
    %31 = arith.addf %27, %30 : vector<128x4xf32>
    %c0_26 = arith.constant 0 : index
    %c0_27 = arith.constant 0 : index
    %c0_28 = arith.constant 0 : index
    %32 = vector.load %arg6[%c0_26, %c0_27, %c0_28] : memref<4x128x4xf32, #tpu.memory_space<vmem>>, vector<1x128x4xf32>
    %33 = vector.shape_cast %32 : vector<1x128x4xf32> to vector<128x4xf32>
    %34 = vector.shape_cast %31 : vector<128x4xf32> to vector<1x128x4xf32>
    tpu.vector_store %arg6[%c0_26, %c0_27, %c0_28], %34 {strides = array<i32>} : memref<4x128x4xf32, #tpu.memory_space<vmem>>, vector<1x128x4xf32>,
    %c1_29 = arith.constant 1 : index
    %c0_30 = arith.constant 0 : index
    %c0_31 = arith.constant 0 : index
    %35 = vector.load %arg6[%c1_29, %c0_30, %c0_31] : memref<4x128x4xf32, #tpu.memory_space<vmem>>, vector<1x128x4xf32>
    %36 = vector.shape_cast %35 : vector<1x128x4xf32> to vector<128x4xf32>
    %c4 = arith.constant 4 : index
    %c0_32 = arith.constant 0 : index
    %c0_33 = arith.constant 0 : index
    %37 = vector.load %arg3[%c4, %c0_32, %c0_33] : memref<16x4x4xf32, #tpu.memory_space<vmem>>, vector<1x4x4xf32>
    %38 = vector.shape_cast %37 : vector<1x4x4xf32> to vector<4x4xf32>
    %cst_34 = arith.constant dense<0.000000e+00> : vector<128x4xf32>
    %39 = tpu.matmul %25, %38, %cst_34 {dimension_numbers = #tpu.dot_dimension_numbers<[1], [0], [0], [1], [0, 0, 1, 1], [], []>} : vector<128x4xf32>, vector<4x4xf32>, vector<128x4xf32> -> vector<128x4xf32>
    %40 = arith.addf %36, %39 : vector<128x4xf32>
    %c1_35 = arith.constant 1 : index
    %c0_36 = arith.constant 0 : index
    %c0_37 = arith.constant 0 : index
    %41 = vector.load %arg6[%c1_35, %c0_36, %c0_37] : memref<4x128x4xf32, #tpu.memory_space<vmem>>, vector<1x128x4xf32>
    %42 = vector.shape_cast %41 : vector<1x128x4xf32> to vector<128x4xf32>
    %43 = vector.shape_cast %40 : vector<128x4xf32> to vector<1x128x4xf32>
    tpu.vector_store %arg6[%c1_35, %c0_36, %c0_37], %43 {strides = array<i32>} : memref<4x128x4xf32, #tpu.memory_space<vmem>>, vector<1x128x4xf32>,
    %c0_i32_38 = arith.constant 0 : i32
    %44 = arith.addi %1, %c0_i32_38 : i32
    %c0_39 = arith.constant 0 : index
    %45 = arith.index_cast %44 : i32 to index
    %c2 = arith.constant 2 : index
    %c0_40 = arith.constant 0 : index
    %46 = vector.load %arg2[%c0_39, %45, %c2, %c0_40] : memref<1x18x18x4xf32, #tpu.memory_space<vmem>>, vector<1x8x16x4xf32>
    %47 = vector.shape_cast %46 : vector<1x8x16x4xf32> to vector<8x16x4xf32>
    %48 = vector.shape_cast %47 : vector<8x16x4xf32> to vector<128x4xf32>
    %c1_41 = arith.constant 1 : index
    %c0_42 = arith.constant 0 : index
    %c0_43 = arith.constant 0 : index
    %49 = vector.load %arg6[%c1_41, %c0_42, %c0_43] : memref<4x128x4xf32, #tpu.memory_space<vmem>>, vector<1x128x4xf32>
    %50 = vector.shape_cast %49 : vector<1x128x4xf32> to vector<128x4xf32>
    %c5 = arith.constant 5 : index
    %c0_44 = arith.constant 0 : index
    %c0_45 = arith.constant 0 : index
    %51 = vector.load %arg3[%c5, %c0_44, %c0_45] : memref<16x4x4xf32, #tpu.memory_space<vmem>>, vector<1x4x4xf32>
    %52 = vector.shape_cast %51 : vector<1x4x4xf32> to vector<4x4xf32>
    %cst_46 = arith.constant dense<0.000000e+00> : vector<128x4xf32>
    %53 = tpu.matmul %48, %52, %cst_46 {dimension_numbers = #tpu.dot_dimension_numbers<[1], [0], [0], [1], [0, 0, 1, 1], [], []>} : vector<128x4xf32>, vector<4x4xf32>, vector<128x4xf32> -> vector<128x4xf32>
    %54 = arith.addf %50, %53 : vector<128x4xf32>
    %c1_47 = arith.constant 1 : index
    %c0_48 = arith.constant 0 : index
    %c0_49 = arith.constant 0 : index
    %55 = vector.load %arg6[%c1_47, %c0_48, %c0_49] : memref<4x128x4xf32, #tpu.memory_space<vmem>>, vector<1x128x4xf32>
    %56 = vector.shape_cast %55 : vector<1x128x4xf32> to vector<128x4xf32>
    %57 = vector.shape_cast %54 : vector<128x4xf32> to vector<1x128x4xf32>
    tpu.vector_store %arg6[%c1_47, %c0_48, %c0_49], %57 {strides = array<i32>} : memref<4x128x4xf32, #tpu.memory_space<vmem>>, vector<1x128x4xf32>,
    %c1_i32 = arith.constant 1 : i32
    %58 = arith.addi %1, %c1_i32 : i32
    %c0_50 = arith.constant 0 : index
    %59 = arith.index_cast %58 : i32 to index
    %c0_51 = arith.constant 0 : index
    %c0_52 = arith.constant 0 : index
    %60 = vector.load %arg2[%c0_50, %59, %c0_51, %c0_52] : memref<1x18x18x4xf32, #tpu.memory_space<vmem>>, vector<1x8x16x4xf32>
    %61 = vector.shape_cast %60 : vector<1x8x16x4xf32> to vector<8x16x4xf32>
    %62 = vector.shape_cast %61 : vector<8x16x4xf32> to vector<128x4xf32>
    %c0_53 = arith.constant 0 : index
    %c0_54 = arith.constant 0 : index
    %c0_55 = arith.constant 0 : index
    %63 = vector.load %arg6[%c0_53, %c0_54, %c0_55] : memref<4x128x4xf32, #tpu.memory_space<vmem>>, vector<1x128x4xf32>
    %64 = vector.shape_cast %63 : vector<1x128x4xf32> to vector<128x4xf32>
    %c2_56 = arith.constant 2 : index
    %c0_57 = arith.constant 0 : index
    %c0_58 = arith.constant 0 : index
    %65 = vector.load %arg3[%c2_56, %c0_57, %c0_58] : memref<16x4x4xf32, #tpu.memory_space<vmem>>, vector<1x4x4xf32>
    %66 = vector.shape_cast %65 : vector<1x4x4xf32> to vector<4x4xf32>
    %cst_59 = arith.constant dense<0.000000e+00> : vector<128x4xf32>
    %67 = tpu.matmul %62, %66, %cst_59 {dimension_numbers = #tpu.dot_dimension_numbers<[1], [0], [0], [1], [0, 0, 1, 1], [], []>} : vector<128x4xf32>, vector<4x4xf32>, vector<128x4xf32> -> vector<128x4xf32>
    %68 = arith.addf %64, %67 : vector<128x4xf32>
    %c0_60 = arith.constant 0 : index
    %c0_61 = arith.constant 0 : index
    %c0_62 = arith.constant 0 : index
    %69 = vector.load %arg6[%c0_60, %c0_61, %c0_62] : memref<4x128x4xf32, #tpu.memory_space<vmem>>, vector<1x128x4xf32>
    %70 = vector.shape_cast %69 : vector<1x128x4xf32> to vector<128x4xf32>
    %71 = vector.shape_cast %68 : vector<128x4xf32> to vector<1x128x4xf32>
    tpu.vector_store %arg6[%c0_60, %c0_61, %c0_62], %71 {strides = array<i32>} : memref<4x128x4xf32, #tpu.memory_space<vmem>>, vector<1x128x4xf32>,
    %c2_63 = arith.constant 2 : index
    %c0_64 = arith.constant 0 : index
    %c0_65 = arith.constant 0 : index
    %72 = vector.load %arg6[%c2_63, %c0_64, %c0_65] : memref<4x128x4xf32, #tpu.memory_space<vmem>>, vector<1x128x4xf32>
    %73 = vector.shape_cast %72 : vector<1x128x4xf32> to vector<128x4xf32>
    %c8 = arith.constant 8 : index
    %c0_66 = arith.constant 0 : index
    %c0_67 = arith.constant 0 : index
    %74 = vector.load %arg3[%c8, %c0_66, %c0_67] : memref<16x4x4xf32, #tpu.memory_space<vmem>>, vector<1x4x4xf32>
    %75 = vector.shape_cast %74 : vector<1x4x4xf32> to vector<4x4xf32>
    %cst_68 = arith.constant dense<0.000000e+00> : vector<128x4xf32>
    %76 = tpu.matmul %62, %75, %cst_68 {dimension_numbers = #tpu.dot_dimension_numbers<[1], [0], [0], [1], [0, 0, 1, 1], [], []>} : vector<128x4xf32>, vector<4x4xf32>, vector<128x4xf32> -> vector<128x4xf32>
    %77 = arith.addf %73, %76 : vector<128x4xf32>
    %c2_69 = arith.constant 2 : index
    %c0_70 = arith.constant 0 : index
    %c0_71 = arith.constant 0 : index
    %78 = vector.load %arg6[%c2_69, %c0_70, %c0_71] : memref<4x128x4xf32, #tpu.memory_space<vmem>>, vector<1x128x4xf32>
    %79 = vector.shape_cast %78 : vector<1x128x4xf32> to vector<128x4xf32>
    %80 = vector.shape_cast %77 : vector<128x4xf32> to vector<1x128x4xf32>
    tpu.vector_store %arg6[%c2_69, %c0_70, %c0_71], %80 {strides = array<i32>} : memref<4x128x4xf32, #tpu.memory_space<vmem>>, vector<1x128x4xf32>,
    %c1_i32_72 = arith.constant 1 : i32
    %81 = arith.addi %1, %c1_i32_72 : i32
    %c0_73 = arith.constant 0 : index
    %82 = arith.index_cast %81 : i32 to index
    %c1_74 = arith.constant 1 : index
    %c0_75 = arith.constant 0 : index
    %83 = vector.load %arg2[%c0_73, %82, %c1_74, %c0_75] : memref<1x18x18x4xf32, #tpu.memory_space<vmem>>, vector<1x8x16x4xf32>
    %84 = vector.shape_cast %83 : vector<1x8x16x4xf32> to vector<8x16x4xf32>
    %85 = vector.shape_cast %84 : vector<8x16x4xf32> to vector<128x4xf32>
    %c0_76 = arith.constant 0 : index
    %c0_77 = arith.constant 0 : index
    %c0_78 = arith.constant 0 : index
    %86 = vector.load %arg6[%c0_76, %c0_77, %c0_78] : memref<4x128x4xf32, #tpu.memory_space<vmem>>, vector<1x128x4xf32>
    %87 = vector.shape_cast %86 : vector<1x128x4xf32> to vector<128x4xf32>
    %c3 = arith.constant 3 : index
    %c0_79 = arith.constant 0 : index
    %c0_80 = arith.constant 0 : index
    %88 = vector.load %arg3[%c3, %c0_79, %c0_80] : memref<16x4x4xf32, #tpu.memory_space<vmem>>, vector<1x4x4xf32>
    %89 = vector.shape_cast %88 : vector<1x4x4xf32> to vector<4x4xf32>
    %cst_81 = arith.constant dense<0.000000e+00> : vector<128x4xf32>
    %90 = tpu.matmul %85, %89, %cst_81 {dimension_numbers = #tpu.dot_dimension_numbers<[1], [0], [0], [1], [0, 0, 1, 1], [], []>} : vector<128x4xf32>, vector<4x4xf32>, vector<128x4xf32> -> vector<128x4xf32>
    %91 = arith.addf %87, %90 : vector<128x4xf32>
    %c0_82 = arith.constant 0 : index
    %c0_83 = arith.constant 0 : index
    %c0_84 = arith.constant 0 : index
    %92 = vector.load %arg6[%c0_82, %c0_83, %c0_84] : memref<4x128x4xf32, #tpu.memory_space<vmem>>, vector<1x128x4xf32>
    %93 = vector.shape_cast %92 : vector<1x128x4xf32> to vector<128x4xf32>
    %94 = vector.shape_cast %91 : vector<128x4xf32> to vector<1x128x4xf32>
    tpu.vector_store %arg6[%c0_82, %c0_83, %c0_84], %94 {strides = array<i32>} : memref<4x128x4xf32, #tpu.memory_space<vmem>>, vector<1x128x4xf32>,
    %c1_85 = arith.constant 1 : index
    %c0_86 = arith.constant 0 : index
    %c0_87 = arith.constant 0 : index
    %95 = vector.load %arg6[%c1_85, %c0_86, %c0_87] : memref<4x128x4xf32, #tpu.memory_space<vmem>>, vector<1x128x4xf32>
    %96 = vector.shape_cast %95 : vector<1x128x4xf32> to vector<128x4xf32>
    %c6 = arith.constant 6 : index
    %c0_88 = arith.constant 0 : index
    %c0_89 = arith.constant 0 : index
    %97 = vector.load %arg3[%c6, %c0_88, %c0_89] : memref<16x4x4xf32, #tpu.memory_space<vmem>>, vector<1x4x4xf32>
    %98 = vector.shape_cast %97 : vector<1x4x4xf32> to vector<4x4xf32>
    %cst_90 = arith.constant dense<0.000000e+00> : vector<128x4xf32>
    %99 = tpu.matmul %85, %98, %cst_90 {dimension_numbers = #tpu.dot_dimension_numbers<[1], [0], [0], [1], [0, 0, 1, 1], [], []>} : vector<128x4xf32>, vector<4x4xf32>, vector<128x4xf32> -> vector<128x4xf32>
    %100 = arith.addf %96, %99 : vector<128x4xf32>
    %c1_91 = arith.constant 1 : index
    %c0_92 = arith.constant 0 : index
    %c0_93 = arith.constant 0 : index
    %101 = vector.load %arg6[%c1_91, %c0_92, %c0_93] : memref<4x128x4xf32, #tpu.memory_space<vmem>>, vector<1x128x4xf32>
    %102 = vector.shape_cast %101 : vector<1x128x4xf32> to vector<128x4xf32>
    %103 = vector.shape_cast %100 : vector<128x4xf32> to vector<1x128x4xf32>
    tpu.vector_store %arg6[%c1_91, %c0_92, %c0_93], %103 {strides = array<i32>} : memref<4x128x4xf32, #tpu.memory_space<vmem>>, vector<1x128x4xf32>,
    %c2_94 = arith.constant 2 : index
    %c0_95 = arith.constant 0 : index
    %c0_96 = arith.constant 0 : index
    %104 = vector.load %arg6[%c2_94, %c0_95, %c0_96] : memref<4x128x4xf32, #tpu.memory_space<vmem>>, vector<1x128x4xf32>
    %105 = vector.shape_cast %104 : vector<1x128x4xf32> to vector<128x4xf32>
    %c9 = arith.constant 9 : index
    %c0_97 = arith.constant 0 : index
    %c0_98 = arith.constant 0 : index
    %106 = vector.load %arg3[%c9, %c0_97, %c0_98] : memref<16x4x4xf32, #tpu.memory_space<vmem>>, vector<1x4x4xf32>
    %107 = vector.shape_cast %106 : vector<1x4x4xf32> to vector<4x4xf32>
    %cst_99 = arith.constant dense<0.000000e+00> : vector<128x4xf32>
    %108 = tpu.matmul %85, %107, %cst_99 {dimension_numbers = #tpu.dot_dimension_numbers<[1], [0], [0], [1], [0, 0, 1, 1], [], []>} : vector<128x4xf32>, vector<4x4xf32>, vector<128x4xf32> -> vector<128x4xf32>
    %109 = arith.addf %105, %108 : vector<128x4xf32>
    %c2_100 = arith.constant 2 : index
    %c0_101 = arith.constant 0 : index
    %c0_102 = arith.constant 0 : index
    %110 = vector.load %arg6[%c2_100, %c0_101, %c0_102] : memref<4x128x4xf32, #tpu.memory_space<vmem>>, vector<1x128x4xf32>
    %111 = vector.shape_cast %110 : vector<1x128x4xf32> to vector<128x4xf32>
    %112 = vector.shape_cast %109 : vector<128x4xf32> to vector<1x128x4xf32>
    tpu.vector_store %arg6[%c2_100, %c0_101, %c0_102], %112 {strides = array<i32>} : memref<4x128x4xf32, #tpu.memory_space<vmem>>, vector<1x128x4xf32>,
    %c3_103 = arith.constant 3 : index
    %c0_104 = arith.constant 0 : index
    %c0_105 = arith.constant 0 : index
    %113 = vector.load %arg6[%c3_103, %c0_104, %c0_105] : memref<4x128x4xf32, #tpu.memory_space<vmem>>, vector<1x128x4xf32>
    %114 = vector.shape_cast %113 : vector<1x128x4xf32> to vector<128x4xf32>
    %c12 = arith.constant 12 : index
    %c0_106 = arith.constant 0 : index
    %c0_107 = arith.constant 0 : index
    %115 = vector.load %arg3[%c12, %c0_106, %c0_107] : memref<16x4x4xf32, #tpu.memory_space<vmem>>, vector<1x4x4xf32>
    %116 = vector.shape_cast %115 : vector<1x4x4xf32> to vector<4x4xf32>
    %cst_108 = arith.constant dense<0.000000e+00> : vector<128x4xf32>
    %117 = tpu.matmul %85, %116, %cst_108 {dimension_numbers = #tpu.dot_dimension_numbers<[1], [0], [0], [1], [0, 0, 1, 1], [], []>} : vector<128x4xf32>, vector<4x4xf32>, vector<128x4xf32> -> vector<128x4xf32>
    %118 = arith.addf %114, %117 : vector<128x4xf32>
    %c3_109 = arith.constant 3 : index
    %c0_110 = arith.constant 0 : index
    %c0_111 = arith.constant 0 : index
    %119 = vector.load %arg6[%c3_109, %c0_110, %c0_111] : memref<4x128x4xf32, #tpu.memory_space<vmem>>, vector<1x128x4xf32>
    %120 = vector.shape_cast %119 : vector<1x128x4xf32> to vector<128x4xf32>
    %121 = vector.shape_cast %118 : vector<128x4xf32> to vector<1x128x4xf32>
    tpu.vector_store %arg6[%c3_109, %c0_110, %c0_111], %121 {strides = array<i32>} : memref<4x128x4xf32, #tpu.memory_space<vmem>>, vector<1x128x4xf32>,
    %c1_i32_112 = arith.constant 1 : i32
    %122 = arith.addi %1, %c1_i32_112 : i32
    %c0_113 = arith.constant 0 : index
    %123 = arith.index_cast %122 : i32 to index
    %c2_114 = arith.constant 2 : index
    %c0_115 = arith.constant 0 : index
    %124 = vector.load %arg2[%c0_113, %123, %c2_114, %c0_115] : memref<1x18x18x4xf32, #tpu.memory_space<vmem>>, vector<1x8x16x4xf32>
    %125 = vector.shape_cast %124 : vector<1x8x16x4xf32> to vector<8x16x4xf32>
    %126 = vector.shape_cast %125 : vector<8x16x4xf32> to vector<128x4xf32>
    %c1_116 = arith.constant 1 : index
    %c0_117 = arith.constant 0 : index
    %c0_118 = arith.constant 0 : index
    %127 = vector.load %arg6[%c1_116, %c0_117, %c0_118] : memref<4x128x4xf32, #tpu.memory_space<vmem>>, vector<1x128x4xf32>
    %128 = vector.shape_cast %127 : vector<1x128x4xf32> to vector<128x4xf32>
    %c7 = arith.constant 7 : index
    %c0_119 = arith.constant 0 : index
    %c0_120 = arith.constant 0 : index
    %129 = vector.load %arg3[%c7, %c0_119, %c0_120] : memref<16x4x4xf32, #tpu.memory_space<vmem>>, vector<1x4x4xf32>
    %130 = vector.shape_cast %129 : vector<1x4x4xf32> to vector<4x4xf32>
    %cst_121 = arith.constant dense<0.000000e+00> : vector<128x4xf32>
    %131 = tpu.matmul %126, %130, %cst_121 {dimension_numbers = #tpu.dot_dimension_numbers<[1], [0], [0], [1], [0, 0, 1, 1], [], []>} : vector<128x4xf32>, vector<4x4xf32>, vector<128x4xf32> -> vector<128x4xf32>
    %132 = arith.addf %128, %131 : vector<128x4xf32>
    %c1_122 = arith.constant 1 : index
    %c0_123 = arith.constant 0 : index
    %c0_124 = arith.constant 0 : index
    %133 = vector.load %arg6[%c1_122, %c0_123, %c0_124] : memref<4x128x4xf32, #tpu.memory_space<vmem>>, vector<1x128x4xf32>
    %134 = vector.shape_cast %133 : vector<1x128x4xf32> to vector<128x4xf32>
    %135 = vector.shape_cast %132 : vector<128x4xf32> to vector<1x128x4xf32>
    tpu.vector_store %arg6[%c1_122, %c0_123, %c0_124], %135 {strides = array<i32>} : memref<4x128x4xf32, #tpu.memory_space<vmem>>, vector<1x128x4xf32>,
    %c3_125 = arith.constant 3 : index
    %c0_126 = arith.constant 0 : index
    %c0_127 = arith.constant 0 : index
    %136 = vector.load %arg6[%c3_125, %c0_126, %c0_127] : memref<4x128x4xf32, #tpu.memory_space<vmem>>, vector<1x128x4xf32>
    %137 = vector.shape_cast %136 : vector<1x128x4xf32> to vector<128x4xf32>
    %c13 = arith.constant 13 : index
    %c0_128 = arith.constant 0 : index
    %c0_129 = arith.constant 0 : index
    %138 = vector.load %arg3[%c13, %c0_128, %c0_129] : memref<16x4x4xf32, #tpu.memory_space<vmem>>, vector<1x4x4xf32>
    %139 = vector.shape_cast %138 : vector<1x4x4xf32> to vector<4x4xf32>
    %cst_130 = arith.constant dense<0.000000e+00> : vector<128x4xf32>
    %140 = tpu.matmul %126, %139, %cst_130 {dimension_numbers = #tpu.dot_dimension_numbers<[1], [0], [0], [1], [0, 0, 1, 1], [], []>} : vector<128x4xf32>, vector<4x4xf32>, vector<128x4xf32> -> vector<128x4xf32>
    %141 = arith.addf %137, %140 : vector<128x4xf32>
    %c3_131 = arith.constant 3 : index
    %c0_132 = arith.constant 0 : index
    %c0_133 = arith.constant 0 : index
    %142 = vector.load %arg6[%c3_131, %c0_132, %c0_133] : memref<4x128x4xf32, #tpu.memory_space<vmem>>, vector<1x128x4xf32>
    %143 = vector.shape_cast %142 : vector<1x128x4xf32> to vector<128x4xf32>
    %144 = vector.shape_cast %141 : vector<128x4xf32> to vector<1x128x4xf32>
    tpu.vector_store %arg6[%c3_131, %c0_132, %c0_133], %144 {strides = array<i32>} : memref<4x128x4xf32, #tpu.memory_space<vmem>>, vector<1x128x4xf32>,
    %c2_i32 = arith.constant 2 : i32
    %145 = arith.addi %1, %c2_i32 : i32
    %c0_134 = arith.constant 0 : index
    %146 = arith.index_cast %145 : i32 to index
    %c0_135 = arith.constant 0 : index
    %c0_136 = arith.constant 0 : index
    %147 = vector.load %arg2[%c0_134, %146, %c0_135, %c0_136] : memref<1x18x18x4xf32, #tpu.memory_space<vmem>>, vector<1x8x16x4xf32>
    %148 = vector.shape_cast %147 : vector<1x8x16x4xf32> to vector<8x16x4xf32>
    %149 = vector.shape_cast %148 : vector<8x16x4xf32> to vector<128x4xf32>
    %c2_137 = arith.constant 2 : index
    %c0_138 = arith.constant 0 : index
    %c0_139 = arith.constant 0 : index
    %150 = vector.load %arg6[%c2_137, %c0_138, %c0_139] : memref<4x128x4xf32, #tpu.memory_space<vmem>>, vector<1x128x4xf32>
    %151 = vector.shape_cast %150 : vector<1x128x4xf32> to vector<128x4xf32>
    %c10 = arith.constant 10 : index
    %c0_140 = arith.constant 0 : index
    %c0_141 = arith.constant 0 : index
    %152 = vector.load %arg3[%c10, %c0_140, %c0_141] : memref<16x4x4xf32, #tpu.memory_space<vmem>>, vector<1x4x4xf32>
    %153 = vector.shape_cast %152 : vector<1x4x4xf32> to vector<4x4xf32>
    %cst_142 = arith.constant dense<0.000000e+00> : vector<128x4xf32>
    %154 = tpu.matmul %149, %153, %cst_142 {dimension_numbers = #tpu.dot_dimension_numbers<[1], [0], [0], [1], [0, 0, 1, 1], [], []>} : vector<128x4xf32>, vector<4x4xf32>, vector<128x4xf32> -> vector<128x4xf32>
    %155 = arith.addf %151, %154 : vector<128x4xf32>
    %c2_143 = arith.constant 2 : index
    %c0_144 = arith.constant 0 : index
    %c0_145 = arith.constant 0 : index
    %156 = vector.load %arg6[%c2_143, %c0_144, %c0_145] : memref<4x128x4xf32, #tpu.memory_space<vmem>>, vector<1x128x4xf32>
    %157 = vector.shape_cast %156 : vector<1x128x4xf32> to vector<128x4xf32>
    %158 = vector.shape_cast %155 : vector<128x4xf32> to vector<1x128x4xf32>
    tpu.vector_store %arg6[%c2_143, %c0_144, %c0_145], %158 {strides = array<i32>} : memref<4x128x4xf32, #tpu.memory_space<vmem>>, vector<1x128x4xf32>,
    %c2_i32_146 = arith.constant 2 : i32
    %159 = arith.addi %1, %c2_i32_146 : i32
    %c0_147 = arith.constant 0 : index
    %160 = arith.index_cast %159 : i32 to index
    %c1_148 = arith.constant 1 : index
    %c0_149 = arith.constant 0 : index
    %161 = vector.load %arg2[%c0_147, %160, %c1_148, %c0_149] : memref<1x18x18x4xf32, #tpu.memory_space<vmem>>, vector<1x8x16x4xf32>
    %162 = vector.shape_cast %161 : vector<1x8x16x4xf32> to vector<8x16x4xf32>
    %163 = vector.shape_cast %162 : vector<8x16x4xf32> to vector<128x4xf32>
    %c2_150 = arith.constant 2 : index
    %c0_151 = arith.constant 0 : index
    %c0_152 = arith.constant 0 : index
    %164 = vector.load %arg6[%c2_150, %c0_151, %c0_152] : memref<4x128x4xf32, #tpu.memory_space<vmem>>, vector<1x128x4xf32>
    %165 = vector.shape_cast %164 : vector<1x128x4xf32> to vector<128x4xf32>
    %c11 = arith.constant 11 : index
    %c0_153 = arith.constant 0 : index
    %c0_154 = arith.constant 0 : index
    %166 = vector.load %arg3[%c11, %c0_153, %c0_154] : memref<16x4x4xf32, #tpu.memory_space<vmem>>, vector<1x4x4xf32>
    %167 = vector.shape_cast %166 : vector<1x4x4xf32> to vector<4x4xf32>
    %cst_155 = arith.constant dense<0.000000e+00> : vector<128x4xf32>
    %168 = tpu.matmul %163, %167, %cst_155 {dimension_numbers = #tpu.dot_dimension_numbers<[1], [0], [0], [1], [0, 0, 1, 1], [], []>} : vector<128x4xf32>, vector<4x4xf32>, vector<128x4xf32> -> vector<128x4xf32>
    %169 = arith.addf %165, %168 : vector<128x4xf32>
    %c2_156 = arith.constant 2 : index
    %c0_157 = arith.constant 0 : index
    %c0_158 = arith.constant 0 : index
    %170 = vector.load %arg6[%c2_156, %c0_157, %c0_158] : memref<4x128x4xf32, #tpu.memory_space<vmem>>, vector<1x128x4xf32>
    %171 = vector.shape_cast %170 : vector<1x128x4xf32> to vector<128x4xf32>
    %172 = vector.shape_cast %169 : vector<128x4xf32> to vector<1x128x4xf32>
    tpu.vector_store %arg6[%c2_156, %c0_157, %c0_158], %172 {strides = array<i32>} : memref<4x128x4xf32, #tpu.memory_space<vmem>>, vector<1x128x4xf32>,
    %c3_159 = arith.constant 3 : index
    %c0_160 = arith.constant 0 : index
    %c0_161 = arith.constant 0 : index
    %173 = vector.load %arg6[%c3_159, %c0_160, %c0_161] : memref<4x128x4xf32, #tpu.memory_space<vmem>>, vector<1x128x4xf32>
    %174 = vector.shape_cast %173 : vector<1x128x4xf32> to vector<128x4xf32>
    %c14 = arith.constant 14 : index
    %c0_162 = arith.constant 0 : index
    %c0_163 = arith.constant 0 : index
    %175 = vector.load %arg3[%c14, %c0_162, %c0_163] : memref<16x4x4xf32, #tpu.memory_space<vmem>>, vector<1x4x4xf32>
    %176 = vector.shape_cast %175 : vector<1x4x4xf32> to vector<4x4xf32>
    %cst_164 = arith.constant dense<0.000000e+00> : vector<128x4xf32>
    %177 = tpu.matmul %163, %176, %cst_164 {dimension_numbers = #tpu.dot_dimension_numbers<[1], [0], [0], [1], [0, 0, 1, 1], [], []>} : vector<128x4xf32>, vector<4x4xf32>, vector<128x4xf32> -> vector<128x4xf32>
    %178 = arith.addf %174, %177 : vector<128x4xf32>
    %c3_165 = arith.constant 3 : index
    %c0_166 = arith.constant 0 : index
    %c0_167 = arith.constant 0 : index
    %179 = vector.load %arg6[%c3_165, %c0_166, %c0_167] : memref<4x128x4xf32, #tpu.memory_space<vmem>>, vector<1x128x4xf32>
    %180 = vector.shape_cast %179 : vector<1x128x4xf32> to vector<128x4xf32>
    %181 = vector.shape_cast %178 : vector<128x4xf32> to vector<1x128x4xf32>
    tpu.vector_store %arg6[%c3_165, %c0_166, %c0_167], %181 {strides = array<i32>} : memref<4x128x4xf32, #tpu.memory_space<vmem>>, vector<1x128x4xf32>,
    %c2_i32_168 = arith.constant 2 : i32
    %182 = arith.addi %1, %c2_i32_168 : i32
    %c0_169 = arith.constant 0 : index
    %183 = arith.index_cast %182 : i32 to index
    %c2_170 = arith.constant 2 : index
    %c0_171 = arith.constant 0 : index
    %184 = vector.load %arg2[%c0_169, %183, %c2_170, %c0_171] : memref<1x18x18x4xf32, #tpu.memory_space<vmem>>, vector<1x8x16x4xf32>
    %185 = vector.shape_cast %184 : vector<1x8x16x4xf32> to vector<8x16x4xf32>
    %186 = vector.shape_cast %185 : vector<8x16x4xf32> to vector<128x4xf32>
    %c3_172 = arith.constant 3 : index
    %c0_173 = arith.constant 0 : index
    %c0_174 = arith.constant 0 : index
    %187 = vector.load %arg6[%c3_172, %c0_173, %c0_174] : memref<4x128x4xf32, #tpu.memory_space<vmem>>, vector<1x128x4xf32>
    %188 = vector.shape_cast %187 : vector<1x128x4xf32> to vector<128x4xf32>
    %c15 = arith.constant 15 : index
    %c0_175 = arith.constant 0 : index
    %c0_176 = arith.constant 0 : index
    %189 = vector.load %arg3[%c15, %c0_175, %c0_176] : memref<16x4x4xf32, #tpu.memory_space<vmem>>, vector<1x4x4xf32>
    %190 = vector.shape_cast %189 : vector<1x4x4xf32> to vector<4x4xf32>
    %cst_177 = arith.constant dense<0.000000e+00> : vector<128x4xf32>
    %191 = tpu.matmul %186, %190, %cst_177 {dimension_numbers = #tpu.dot_dimension_numbers<[1], [0], [0], [1], [0, 0, 1, 1], [], []>} : vector<128x4xf32>, vector<4x4xf32>, vector<128x4xf32> -> vector<128x4xf32>
    %192 = arith.addf %188, %191 : vector<128x4xf32>
    %c3_178 = arith.constant 3 : index
    %c0_179 = arith.constant 0 : index
    %c0_180 = arith.constant 0 : index
    %193 = vector.load %arg6[%c3_178, %c0_179, %c0_180] : memref<4x128x4xf32, #tpu.memory_space<vmem>>, vector<1x128x4xf32>
    %194 = vector.shape_cast %193 : vector<1x128x4xf32> to vector<128x4xf32>
    %195 = vector.shape_cast %192 : vector<128x4xf32> to vector<1x128x4xf32>
    tpu.vector_store %arg6[%c3_178, %c0_179, %c0_180], %195 {strides = array<i32>} : memref<4x128x4xf32, #tpu.memory_space<vmem>>, vector<1x128x4xf32>,
    %c0_181 = arith.constant 0 : index
    %c0_182 = arith.constant 0 : index
    %c0_183 = arith.constant 0 : index
    %196 = vector.load %arg6[%c0_181, %c0_182, %c0_183] : memref<4x128x4xf32, #tpu.memory_space<vmem>>, vector<1x128x4xf32>
    %197 = vector.shape_cast %196 : vector<1x128x4xf32> to vector<128x4xf32>
    %198 = vector.shape_cast %197 : vector<128x4xf32> to vector<8x1x16x4xf32>
    %c0_184 = arith.constant 0 : index
    %c0_185 = arith.constant 0 : index
    %c0_186 = arith.constant 0 : index
    %c0_187 = arith.constant 0 : index
    %c0_188 = arith.constant 0 : index
    %199 = vector.load %arg5[%c0_184, %c0_185, %c0_186, %c0_187, %c0_188] : memref<1x8x2x16x8xf32, #tpu.memory_space<vmem>>, vector<1x8x1x16x4xf32>
    %200 = vector.shape_cast %199 : vector<1x8x1x16x4xf32> to vector<8x1x16x4xf32>
    %201 = vector.shape_cast %198 : vector<8x1x16x4xf32> to vector<1x8x1x16x4xf32>
    tpu.vector_store %arg5[%c0_184, %c0_185, %c0_186, %c0_187, %c0_188], %201 {strides = array<i32>} : memref<1x8x2x16x8xf32, #tpu.memory_space<vmem>>, vector<1x8x1x16x4xf32>,
    %c1_189 = arith.constant 1 : index
    %c0_190 = arith.constant 0 : index
    %c0_191 = arith.constant 0 : index
    %202 = vector.load %arg6[%c1_189, %c0_190, %c0_191] : memref<4x128x4xf32, #tpu.memory_space<vmem>>, vector<1x128x4xf32>
    %203 = vector.shape_cast %202 : vector<1x128x4xf32> to vector<128x4xf32>
    %204 = vector.shape_cast %203 : vector<128x4xf32> to vector<8x1x16x4xf32>
    %c0_192 = arith.constant 0 : index
    %c0_193 = arith.constant 0 : index
    %c0_194 = arith.constant 0 : index
    %c0_195 = arith.constant 0 : index
    %c4_196 = arith.constant 4 : index
    %205 = vector.load %arg5[%c0_192, %c0_193, %c0_194, %c0_195, %c4_196] : memref<1x8x2x16x8xf32, #tpu.memory_space<vmem>>, vector<1x8x1x16x4xf32>
    %206 = vector.shape_cast %205 : vector<1x8x1x16x4xf32> to vector<8x1x16x4xf32>
    %207 = vector.shape_cast %204 : vector<8x1x16x4xf32> to vector<1x8x1x16x4xf32>
    tpu.vector_store %arg5[%c0_192, %c0_193, %c0_194, %c0_195, %c4_196], %207 {strides = array<i32>} : memref<1x8x2x16x8xf32, #tpu.memory_space<vmem>>, vector<1x8x1x16x4xf32>,
    %c2_197 = arith.constant 2 : index
    %c0_198 = arith.constant 0 : index
    %c0_199 = arith.constant 0 : index
    %208 = vector.load %arg6[%c2_197, %c0_198, %c0_199] : memref<4x128x4xf32, #tpu.memory_space<vmem>>, vector<1x128x4xf32>
    %209 = vector.shape_cast %208 : vector<1x128x4xf32> to vector<128x4xf32>
    %210 = vector.shape_cast %209 : vector<128x4xf32> to vector<8x1x16x4xf32>
    %c0_200 = arith.constant 0 : index
    %c0_201 = arith.constant 0 : index
    %c1_202 = arith.constant 1 : index
    %c0_203 = arith.constant 0 : index
    %c0_204 = arith.constant 0 : index
    %211 = vector.load %arg5[%c0_200, %c0_201, %c1_202, %c0_203, %c0_204] : memref<1x8x2x16x8xf32, #tpu.memory_space<vmem>>, vector<1x8x1x16x4xf32>
    %212 = vector.shape_cast %211 : vector<1x8x1x16x4xf32> to vector<8x1x16x4xf32>
    %213 = vector.shape_cast %210 : vector<8x1x16x4xf32> to vector<1x8x1x16x4xf32>
    tpu.vector_store %arg5[%c0_200, %c0_201, %c1_202, %c0_203, %c0_204], %213 {strides = array<i32>} : memref<1x8x2x16x8xf32, #tpu.memory_space<vmem>>, vector<1x8x1x16x4xf32>,
    %c3_205 = arith.constant 3 : index
    %c0_206 = arith.constant 0 : index
    %c0_207 = arith.constant 0 : index
    %214 = vector.load %arg6[%c3_205, %c0_206, %c0_207] : memref<4x128x4xf32, #tpu.memory_space<vmem>>, vector<1x128x4xf32>
    %215 = vector.shape_cast %214 : vector<1x128x4xf32> to vector<128x4xf32>
    %216 = vector.shape_cast %215 : vector<128x4xf32> to vector<8x1x16x4xf32>
    %c0_208 = arith.constant 0 : index
    %c0_209 = arith.constant 0 : index
    %c1_210 = arith.constant 1 : index
    %c0_211 = arith.constant 0 : index
    %c4_212 = arith.constant 4 : index
    %217 = vector.load %arg5[%c0_208, %c0_209, %c1_210, %c0_211, %c4_212] : memref<1x8x2x16x8xf32, #tpu.memory_space<vmem>>, vector<1x8x1x16x4xf32>
    %218 = vector.shape_cast %217 : vector<1x8x1x16x4xf32> to vector<8x1x16x4xf32>
    %219 = vector.shape_cast %216 : vector<8x1x16x4xf32> to vector<1x8x1x16x4xf32>
    tpu.vector_store %arg5[%c0_208, %c0_209, %c1_210, %c0_211, %c4_212], %219 {strides = array<i32>} : memref<1x8x2x16x8xf32, #tpu.memory_space<vmem>>, vector<1x8x1x16x4xf32>,
    return
  }
  func.func @transform_0(%arg0: i32, %arg1: i32) -> (i32, i32, i32, i32) {
    %c0_i32 = arith.constant 0 : i32
    %c0_i32_0 = arith.constant 0 : i32
    %c0_i32_1 = arith.constant 0 : i32
    %c0_i32_2 = arith.constant 0 : i32
    return %arg0, %c0_i32, %c0_i32_0, %c0_i32_1 : i32, i32, i32, i32
  }
  func.func @transform_1(%arg0: i32, %arg1: i32) -> (i32, i32, i32) {
    %c0_i32 = arith.constant 0 : i32
    %c0_i32_0 = arith.constant 0 : i32
    %c0_i32_1 = arith.constant 0 : i32
    %c0_i32_2 = arith.constant 0 : i32
    return %c0_i32, %c0_i32_0, %c0_i32_1 : i32, i32, i32
  }
  func.func @transform_2(%arg0: i32, %arg1: i32) -> (i32, i32) {
    %c0_i32 = arith.constant 0 : i32
    %c0_i32_0 = arith.constant 0 : i32
    %c0_i32_1 = arith.constant 0 : i32
    return %c0_i32, %c0_i32_0 : i32, i32
  }
  func.func @transform_3(%arg0: i32, %arg1: i32) -> (i32, i32, i32, i32, i32) {
    %c0_i32 = arith.constant 0 : i32
    %c0_i32_0 = arith.constant 0 : i32
    %c0_i32_1 = arith.constant 0 : i32
    %c0_i32_2 = arith.constant 0 : i32
    return %arg0, %arg1, %c0_i32, %c0_i32_0, %c0_i32_1 : i32, i32, i32, i32, i32
  }
}

</mosaic_0001>

<bundles_post_ra>
// kernel: tpu_custom_call.1
= control target key start
LH: loop header
LB: loop body
LE: loop exit
PB: predicated region body
PF: predicated region fallthrough
CT: control target
= control target key end

     0   :  { %s5607_s12 = smov 0   ;;  %s5609_s13 = smov 0   ;;  %s6992_s0 = inlined_call_operand.vmem [shape: f32[2,18,18,4], index: 0, kind: input, shape index: {}]   ;;  %s6993_s1 = inlined_call_operand.vmem [shape: f32[16,4,4], index: 1, kind: input, shape index: {}]   ;;  %s6994_s2 = inlined_call_operand.vmem [shape: f32[1,4], index: 2, kind: input, shape index: {}]   ;;  %s6995_s3 = inlined_call_operand.vmem [shape: f32[2,16,2,16,8], index: 3, kind: output, shape index: {}]  }
   0x1   :  { %s5611_s14 = smov 0   ;;  %s5613_s15 = smov 0  }
   0x2   :  { %s5615_s16 = smov 0  }
   0x3 LB: > { %s22_s17 = sadd.s32 1, %s5576_s14  ;;  %s25_s18 = sadd.s32 1, %s5580_s15  ;;  %s5584_s16 = sphi %s5615_s16, %s13_s16   ;;  %s5580_s15 = sphi %s5613_s15, %s7000_s15   ;;  %s5576_s14 = sphi %s5611_s14, %s6999_s14   ;;  %s5572_s13 = sphi %s5609_s13, %s6998_s13   ;;  %s5568_s12 = sphi %s5607_s12, %s6997_s12  }
   0x4   : > { %p23_p0 = scmp.ge.s32.totalorder %s22_s17, 2  ;;  %p4386_p1 = scmp.ge.s32.totalorder %s5584_s16, 1 }
   0x5   : > { %p151_p2 = scmp.lt.s32.totalorder %s5584_s16, 5 }
   0x6   : > { %s7002_s17 = smov (%p23_p0, %s22_s17), 0  ;;  %s7004_s18 = smov (!%p23_p0, %s25_s18), %s5580_s15 }
   0x7   : > { %p152_p3 = pnand %p4386_p1, %p151_p2  ;;  %p27_p4 = scmp.ge.s32.totalorder %s7004_s18, 2 }
   0x8   : > { %v303_v0 = vld [vmem:[%s6993_s1] sm:$0xf] (!%p152_p3)  ;;  %vm352_vm0 = vcmask (!%p152_p3), 1043456   ;;  %v4412_v1 = vld [vmem:[%s6993_s1 + $0x4] sm:$0xf] (!%p152_p3)  ;;  %p180_p5 = scmp.lt.s32.totalorder (!%p152_p3), %s5572_s13, 1 }
   0x9   : > { %s7006_s18 = smov (%p27_p4, %s7004_s18), 0  ;;  %155 = sbr.rel (%p152_p3) target bundleno = 624 (0x270), region = 32 }
   0xa   : > { %5088 = vmatprep.subr.msk.mxu0 (!%p152_p3), %vm352_vm0, %v303_v0  ;;  %5114 = vmatprep.subr.msk.mxu1 (!%p152_p3), %vm352_vm0, %v4412_v1  ;;  %v4430_v2 = vld [vmem:[%s6993_s1 + $0x10] sm:$0xf] (!%p152_p3)  ;;  %v4448_v3 = vld [vmem:[%s6993_s1 + $0x14] sm:$0xf] (!%p152_p3)  ;;  %s4394_s27 = smul.u32 (!%p152_p3), 192, %s5568_s12  ;;  %vm204_vm1 = vcmask (!%p152_p3), 31744  }
   0xb   : > { %5089 = vmatpush3.msk.msra.mxu0 (!%p152_p3), %vm352_vm0, %v303_v0  ;;  %5115 = vmatpush3.msk.msra.mxu1 (!%p152_p3), %vm352_vm0, %v4412_v1  ;;  %v5689_v10 = vld [vmem:[%s6993_s1 + $0x8] sm:$0xf] (!%p152_p3)  ;;  %v5694_v11 = vld [vmem:[%s6993_s1 + $0x20] sm:$0xf] (!%p152_p3)  ;;  %v4536_v41 = vld [vmem:[%s6993_s1 + $0xc] sm:$0xf] (!%p152_p3) }
   0xc   : > { %5140 = vmatprep.subr.msk.mxu0 (!%p152_p3), %vm352_vm0, %v4430_v2  ;;  %5166 = vmatprep.subr.msk.mxu1 (!%p152_p3), %vm352_vm0, %v4448_v3  ;;  %v4554_v42 = vld [vmem:[%s6993_s1 + $0x18] sm:$0xf] (!%p152_p3)  ;;  %v5965_v56 = vld [vmem:[%s6993_s1 + $0x24] sm:$0xf] (!%p152_p3)  ;;  %v5970_v57 = vld [vmem:[%s6993_s1 + $0x30] sm:$0xf] (!%p152_p3) }
   0xd   : > { %v6001_v58 = vld [vmem:[%s6994_s2] ss:$0 sm:$0xff] (!%p152_p3)  ;;  %v4624_v61 = vld [vmem:[%s6993_s1 + $0x1c] sm:$0xf] (!%p152_p3)  ;;  %v4642_v62 = vld [vmem:[%s6993_s1 + $0x34] sm:$0xf] (!%p152_p3) }
   0xe   : > { %206 = vst.msk [vmem:[#allocation2 + $0x8] sm:$0xff] (!%p152_p3), %vm204_vm1, %v6001_v58  ;;  %205 = vst.msk [vmem:[#allocation2] sm:$0xff] (!%p152_p3), %vm204_vm1, %v6001_v58  ;;  %v4678_v1 = vld [vmem:[%s6993_s1 + $0x28] sm:$0xf] (!%p152_p3)  ;;  %s5586_s26 = smov (!%p152_p3), 4   ;;  %vm4136_vm2 = vcmask (!%p152_p3), 64544  }
   0xf   : > { %207 = vst.msk [vmem:[#allocation2 + $0x10] sm:$0xff] (!%p152_p3), %vm204_vm1, %v6001_v58  ;;  %208 = vst.msk [vmem:[#allocation2 + $0x18] sm:$0xff] (!%p152_p3), %vm204_vm1, %v6001_v58 }
  0x10   : > { %s7008_s13 = smov (!%p180_p5, %s5572_s13), 1  ;;  %209 = vst.msk [vmem:[#allocation2 + $0x20] sm:$0xff] %vm204_vm1, %v6001_v58  ;;  %210 = vst.msk [vmem:[#allocation2 + $0x28] sm:$0xff] %vm204_vm1, %v6001_v58 }
  0x11   : > { %s5504_s28 = smul.u32 432, %s7008_s13  ;;  %211 = vst.msk [vmem:[#allocation2 + $0x30] sm:$0xff] %vm204_vm1, %v6001_v58  ;;  %212 = vst.msk [vmem:[#allocation2 + $0x38] sm:$0xff] %vm204_vm1, %v6001_v58  ;;  %s4390_s21 = sshll.u32 %s7008_s13, 6 }
  0x12   : > { %213 = vst.msk [vmem:[#allocation2 + $0x40] sm:$0xff] %vm204_vm1, %v6001_v58  ;;  %214 = vst.msk [vmem:[#allocation2 + $0x48] sm:$0xff] %vm204_vm1, %v6001_v58 }
  0x13   : > { %s184_s4 = scalar_lea.vmem %s6992_s0, %s5504_s28  ;;  %215 = vst.msk [vmem:[#allocation2 + $0x50] sm:$0xff] %vm204_vm1, %v6001_v58  ;;  %216 = vst.msk [vmem:[#allocation2 + $0x58] sm:$0xff] %vm204_vm1, %v6001_v58 }
  0x14   : > { %s5664_s5 = scalar_lea.vmem %s184_s4, %s4394_s27  ;;  %217 = vst.msk [vmem:[#allocation2 + $0x60] sm:$0xff] %vm204_vm1, %v6001_v58  ;;  %218 = vst.msk [vmem:[#allocation2 + $0x68] sm:$0xff] %vm204_vm1, %v6001_v58 }
  0x15   : > { %v271_v4 = vld [vmem:[%s5664_s5] sm:$0xff]  ;;  %v272_v6 = vld [vmem:[%s5664_s5 + $0x8] sm:$0xff]  ;;  %v5678_v8 = vld [vmem:[%s5664_s5 + $0x18] sm:$0xff]  ;;  %219 = vst.msk [vmem:[#allocation2 + $0x70] sm:$0xff] %vm204_vm1, %v6001_v58 }
  0x16   : > { %v5668_v5 = vld [vmem:[%s5664_s5 + $0x1] sm:$0xff]  ;;  %5090 = vmatprep.mubr.msk.f32.mxu0 %vm204_vm1, %v271_v4  ;;  %v5675_v7 = vld [vmem:[%s5664_s5 + $0x9] sm:$0xff]  ;;  %v5681_v9 = vld [vmem:[%s5664_s5 + $0x19] sm:$0xff]  ;;  %220 = vst.msk [vmem:[#allocation2 + $0x78] sm:$0xff] %vm204_vm1, %v6001_v58 }
  0x17   : > { %5116 = vmatprep.mubr.msk.f32.mxu1 %vm204_vm1, %v5668_v5  ;;  %5091 = vmatmul.mubr.msk.f32.vlgmr.msra.gmra.mrb[0].mxu0 %vm204_vm1, %v272_v6  ;;  %v5700_v12 = vld [vmem:[%s5664_s5 + $0x20] sm:$0xff]  ;;  %v5708_v14 = vld [vmem:[%s5664_s5 + $0x30] sm:$0xff]  ;;  %v5727_v16 = vld [vmem:[%s5664_s5 + $0x38] sm:$0xff]  ;;  %221 = vst.msk [vmem:[#allocation2 + $0x80] sm:$0xff] %vm204_vm1, %v6001_v58 }
  0x18   : > { %5117 = vmatmul.mubr.msk.f32.vlgmr.msra.gmra.mrb[0].mxu1 %vm204_vm1, %v5675_v7  ;;  %5141 = vmatpush3.msk.msra.mxu0 %vm352_vm0, %v4430_v2  ;;  %v5703_v13 = vld [vmem:[%s5664_s5 + $0x21] sm:$0xff]  ;;  %v5711_v15 = vld [vmem:[%s5664_s5 + $0x31] sm:$0xff]  ;;  %v5730_v17 = vld [vmem:[%s5664_s5 + $0x39] sm:$0xff]  ;;  %222 = vst.msk [vmem:[#allocation2 + $0x88] sm:$0xff] %vm204_vm1, %v6001_v58 }
  0x19   : > { %5093 = vmatprep.mubr.msk.f32.mxu0 %vm204_vm1, %v5678_v8  ;;  %5119 = vmatprep.mubr.msk.f32.mxu1 %vm204_vm1, %v5681_v9  ;;  %v5733_v18 = vld [vmem:[%s5664_s5 + $0x48] sm:$0xff]  ;;  %v5747_v20 = vld [vmem:[%s5664_s5 + $0x50] sm:$0xff]  ;;  %v5753_v22 = vld [vmem:[%s5664_s5 + $0x60] sm:$0xff]  ;;  %223 = vst.msk [vmem:[#allocation2 + $0x90] sm:$0xff] %vm204_vm1, %v6001_v58 }
  0x1a   : > { %5167 = vmatpush3.msk.msra.mxu1 %vm352_vm0, %v4448_v3  ;;  %5192 = vmatprep.subr.msk.mxu0 %vm352_vm0, %v5689_v10  ;;  %v5736_v19 = vld [vmem:[%s5664_s5 + $0x49] sm:$0xff]  ;;  %v5750_v21 = vld [vmem:[%s5664_s5 + $0x51] sm:$0xff]  ;;  %v5756_v23 = vld [vmem:[%s5664_s5 + $0x61] sm:$0xff]  ;;  %224 = vst.msk [vmem:[#allocation2 + $0x98] sm:$0xff] %vm204_vm1, %v6001_v58 }
  0x1b   : > { %5218 = vmatprep.subr.msk.mxu1 %vm352_vm0, %v5694_v11  ;;  %5094 = vmatmul.mubr.msk.f32.gmra.mrb[2].mxu0 %vm204_vm1, %v5700_v12  ;;  %v5767_v24 = vld [vmem:[%s5664_s5 + $0x68] sm:$0xff]  ;;  %v5773_v26 = vld [vmem:[%s5664_s5 + $0x78] sm:$0xff]  ;;  %v5787_v28 = vld [vmem:[%s5664_s5 + $0x80] sm:$0xff]  ;;  %225 = vst.msk [vmem:[#allocation2 + $0xa0] sm:$0xff] %vm204_vm1, %v6001_v58 }
  0x1c   : > { %5120 = vmatmul.mubr.msk.f32.gmra.mrb[2].mxu1 %vm204_vm1, %v5703_v13  ;;  %5096 = vmatprep.mubr.msk.f32.mxu0 %vm204_vm1, %v5708_v14  ;;  %v5770_v25 = vld [vmem:[%s5664_s5 + $0x69] sm:$0xff]  ;;  %v5776_v27 = vld [vmem:[%s5664_s5 + $0x79] sm:$0xff]  ;;  %v5790_v29 = vld [vmem:[%s5664_s5 + $0x81] sm:$0xff]  ;;  %226 = vst.msk [vmem:[#allocation2 + $0xa8] sm:$0xff] %vm204_vm1, %v6001_v58 }
  0x1d   : > { %5122 = vmatprep.mubr.msk.f32.mxu1 %vm204_vm1, %v5711_v15  ;;  %v5793_v30 = vld [vmem:[%s5664_s5 + $0x90] sm:$0xff]  ;;  %v5807_v32 = vld [vmem:[%s5664_s5 + $0x98] sm:$0xff]  ;;  %v5813_v34 = vld [vmem:[%s5664_s5 + $0xa8] sm:$0xff]  ;;  %227 = vst.msk [vmem:[#allocation2 + $0xb0] sm:$0xff] %vm204_vm1, %v6001_v58 }
  0x1e   : > { %v5796_v31 = vld [vmem:[%s5664_s5 + $0x91] sm:$0xff]  ;;  %v5810_v33 = vld [vmem:[%s5664_s5 + $0x99] sm:$0xff]  ;;  %v5816_v35 = vld [vmem:[%s5664_s5 + $0xa9] sm:$0xff]  ;;  %228 = vst.msk [vmem:[#allocation2 + $0xb8] sm:$0xff] %vm204_vm1, %v6001_v58 }
  0x1f   : > { %5097 = vmatmul.mubr.msk.f32.gmra.mrb[4].mxu0 %vm204_vm1, %v5727_v16  ;;  %v5827_v36 = vld [vmem:[%s5664_s5 + $0xb0] sm:$0xff]  ;;  %v994_v38 = vld [vmem:[%s5664_s5 + $0x2] sm:$0xff]  ;;  %v5842_v40 = vld [vmem:[%s5664_s5 + $0x1a] sm:$0xff]  ;;  %229 = vst.msk [vmem:[#allocation2 + $0xc0] sm:$0xff] %vm204_vm1, %v6001_v58 }
  0x20   : > { %5123 = vmatmul.mubr.msk.f32.gmra.mrb[4].mxu1 %vm204_vm1, %v5730_v17  ;;  %5099 = vmatprep.mubr.msk.f32.mxu0 %vm204_vm1, %v5733_v18  ;;  %v5830_v37 = vld [vmem:[%s5664_s5 + $0xb1] sm:$0xff]  ;;  %v5858_v43 = vld [vmem:[%s5664_s5 + $0x22] sm:$0xff]  ;;  %v5878_v45 = vld [vmem:[%s5664_s5 + $0x3a] sm:$0xff]  ;;  %230 = vst.msk [vmem:[#allocation2 + $0xc8] sm:$0xff] %vm204_vm1, %v6001_v58 }
  0x21   : > { %5125 = vmatprep.mubr.msk.f32.mxu1 %vm204_vm1, %v5736_v19  ;;  %v995_v39 = vld [vmem:[%s5664_s5 + $0xa] sm:$0xff]  ;;  %v5863_v44 = vld [vmem:[%s5664_s5 + $0x32] sm:$0xff]  ;;  %v5895_v48 = vld [vmem:[%s5664_s5 + $0x62] sm:$0xff]  ;;  %231 = vst.msk [vmem:[#allocation2 + $0xd0] sm:$0xff] %vm204_vm1, %v6001_v58 }
  0x22   : > { %v5881_v46 = vld [vmem:[%s5664_s5 + $0x4a] sm:$0xff]  ;;  %v5892_v47 = vld [vmem:[%s5664_s5 + $0x52] sm:$0xff]  ;;  %v5909_v50 = vld [vmem:[%s5664_s5 + $0x7a] sm:$0xff]  ;;  %232 = vst.msk [vmem:[#allocation2 + $0xd8] sm:$0xff] %vm204_vm1, %v6001_v58 }
  0x23   : > { %5100 = vmatmul.mubr.msk.f32.gmra.mrb[6].mxu0 %vm204_vm1, %v5747_v20  ;;  %v5906_v49 = vld [vmem:[%s5664_s5 + $0x6a] sm:$0xff]  ;;  %v5920_v51 = vld [vmem:[%s5664_s5 + $0x82] sm:$0xff]  ;;  %v5923_v52 = vld [vmem:[%s5664_s5 + $0x92] sm:$0xff]  ;;  %233 = vst.msk [vmem:[#allocation2 + $0xe0] sm:$0xff] %vm204_vm1, %v6001_v58 }
  0x24   : > { %5126 = vmatmul.mubr.msk.f32.gmra.mrb[6].mxu1 %vm204_vm1, %v5750_v21  ;;  %5102 = vmatprep.mubr.msk.f32.mxu0 %vm204_vm1, %v5753_v22  ;;  %v5934_v53 = vld [vmem:[%s5664_s5 + $0x9a] sm:$0xff]  ;;  %v5937_v54 = vld [vmem:[%s5664_s5 + $0xaa] sm:$0xff]  ;;  %v5948_v55 = vld [vmem:[%s5664_s5 + $0xb2] sm:$0xff]  ;;  %234 = vst.msk [vmem:[#allocation2 + $0xe8] sm:$0xff] %vm204_vm1, %v6001_v58 }
  0x25   : > { %5128 = vmatprep.mubr.msk.f32.mxu1 %vm204_vm1, %v5756_v23  ;;  %235 = vst.msk [vmem:[#allocation2 + $0xf0] sm:$0xff] %vm204_vm1, %v6001_v58  ;;  %236 = vst.msk [vmem:[#allocation2 + $0xf8] sm:$0xff] %vm204_vm1, %v6001_v58  ;;  %v6156_v59 = vld [vmem:[%s5664_s5 + $0xc0] sm:$0xff]  ;;  %v6167_v60 = vld [vmem:[%s5664_s5 + $0xc8] sm:$0xff] }
  0x26   : > { %237 = vst.msk [vmem:[#allocation2 + $0x100] sm:$0xff] %vm204_vm1, %v6001_v58  ;;  %238 = vst.msk [vmem:[#allocation2 + $0x108] sm:$0xff] %vm204_vm1, %v6001_v58  ;;  %v6238_v63 = vld [vmem:[%s5664_s5 + $0xc1] sm:$0xff]  ;;  %v6249_v0 = vld [vmem:[%s5664_s5 + $0xc9] sm:$0xff] }
  0x27   : > { %5103 = vmatmul.mubr.msk.f32.gmra.mrb[8].mxu0 %vm204_vm1, %v5767_v24  ;;  %239 = vst.msk [vmem:[#allocation2 + $0x110] sm:$0xff] %vm204_vm1, %v6001_v58  ;;  %240 = vst.msk [vmem:[#allocation2 + $0x118] sm:$0xff] %vm204_vm1, %v6001_v58  ;;  %v4712_v2 = vld [vmem:[%s6993_s1 + $0x2c] sm:$0xf]  ;;  %v4730_v3 = vld [vmem:[%s6993_s1 + $0x38] sm:$0xf] }
  0x28   : > { %5129 = vmatmul.mubr.msk.f32.gmra.mrb[8].mxu1 %vm204_vm1, %v5770_v25  ;;  %5105 = vmatprep.mubr.msk.f32.mxu0 %vm204_vm1, %v5773_v26  ;;  %241 = vst.msk [vmem:[#allocation2 + $0x120] sm:$0xff] %vm204_vm1, %v6001_v58  ;;  %242 = vst.msk [vmem:[#allocation2 + $0x128] sm:$0xff] %vm204_vm1, %v6001_v58  ;;  %v4764_v4 = vld [vmem:[%s6993_s1 + $0x3c] sm:$0xf]  ;;  %v6403_v6 = vld [vmem:[%s5664_s5 + $0xca] sm:$0xff] }
  0x29   : > { %5131 = vmatprep.mubr.msk.f32.mxu1 %vm204_vm1, %v5776_v27  ;;  %243 = vst.msk [vmem:[#allocation2 + $0x130] sm:$0xff] %vm204_vm1, %v6001_v58  ;;  %244 = vst.msk [vmem:[#allocation2 + $0x138] sm:$0xff] %vm204_vm1, %v6001_v58 }
  0x2a   : > { %245 = vst.msk [vmem:[#allocation2 + $0x140] sm:$0xff] %vm204_vm1, %v6001_v58  ;;  %246 = vst.msk [vmem:[#allocation2 + $0x148] sm:$0xff] %vm204_vm1, %v6001_v58 }
  0x2b   : > { %5106 = vmatmul.mubr.msk.f32.gmra.mrb[10].mxu0 %vm204_vm1, %v5787_v28  ;;  %247 = vst.msk [vmem:[#allocation2 + $0x150] sm:$0xff] %vm204_vm1, %v6001_v58  ;;  %248 = vst.msk [vmem:[#allocation2 + $0x158] sm:$0xff] %vm204_vm1, %v6001_v58 }
  0x2c   : > { %5132 = vmatmul.mubr.msk.f32.gmra.mrb[10].mxu1 %vm204_vm1, %v5790_v29  ;;  %5108 = vmatprep.mubr.msk.f32.mxu0 %vm204_vm1, %v5793_v30  ;;  %249 = vst.msk [vmem:[#allocation2 + $0x160] sm:$0xff] %vm204_vm1, %v6001_v58  ;;  %250 = vst.msk [vmem:[#allocation2 + $0x168] sm:$0xff] %vm204_vm1, %v6001_v58 }
  0x2d   : > { %5134 = vmatprep.mubr.msk.f32.mxu1 %vm204_vm1, %v5796_v31  ;;  %251 = vst.msk [vmem:[#allocation2 + $0x170] sm:$0xff] %vm204_vm1, %v6001_v58  ;;  %252 = vst.msk [vmem:[#allocation2 + $0x178] sm:$0xff] %vm204_vm1, %v6001_v58 }
  0x2e   : > { %253 = vst.msk [vmem:[#allocation2 + $0x180] sm:$0xff] %vm204_vm1, %v6001_v58  ;;  %254 = vst.msk [vmem:[#allocation2 + $0x188] sm:$0xff] %vm204_vm1, %v6001_v58 }
  0x2f   : > { %5109 = vmatmul.mubr.msk.f32.gmra.mrb[12].mxu0 %vm204_vm1, %v5807_v32  ;;  %255 = vst.msk [vmem:[#allocation2 + $0x190] sm:$0xff] %vm204_vm1, %v6001_v58  ;;  %256 = vst.msk [vmem:[#allocation2 + $0x198] sm:$0xff] %vm204_vm1, %v6001_v58 }
  0x30   : > { %5135 = vmatmul.mubr.msk.f32.gmra.mrb[12].mxu1 %vm204_vm1, %v5810_v33  ;;  %5111 = vmatprep.mubr.msk.f32.mxu0 %vm204_vm1, %v5813_v34  ;;  %257 = vst.msk [vmem:[#allocation2 + $0x1a0] sm:$0xff] %vm204_vm1, %v6001_v58  ;;  %258 = vst.msk [vmem:[#allocation2 + $0x1a8] sm:$0xff] %vm204_vm1, %v6001_v58 }
  0x31   : > { %5137 = vmatprep.mubr.msk.f32.mxu1 %vm204_vm1, %v5816_v35  ;;  %259 = vst.msk [vmem:[#allocation2 + $0x1b0] sm:$0xff] %vm204_vm1, %v6001_v58  ;;  %260 = vst.msk [vmem:[#allocation2 + $0x1b8] sm:$0xff] %vm204_vm1, %v6001_v58 }
  0x32   : > { %261 = vst.msk [vmem:[#allocation2 + $0x1c0] sm:$0xff] %vm204_vm1, %v6001_v58  ;;  %262 = vst.msk [vmem:[#allocation2 + $0x1c8] sm:$0xff] %vm204_vm1, %v6001_v58 }
  0x33   : > { %5112 = vmatmul.mubr.msk.f32.gmra.mrb[14].mxu0 %vm204_vm1, %v5827_v36  ;;  %263 = vst.msk [vmem:[#allocation2 + $0x1d0] sm:$0xff] %vm204_vm1, %v6001_v58  ;;  %264 = vst.msk [vmem:[#allocation2 + $0x1d8] sm:$0xff] %vm204_vm1, %v6001_v58 }
  0x34   : > { %5138 = vmatmul.mubr.msk.f32.gmra.mrb[14].mxu1 %vm204_vm1, %v5830_v37  ;;  %5142 = vmatprep.mubr.msk.f32.mxu0 %vm204_vm1, %v5668_v5  ;;  %265 = vst.msk [vmem:[#allocation2 + $0x1e0] sm:$0xff] %vm204_vm1, %v6001_v58  ;;  %266 = vst.msk [vmem:[#allocation2 + $0x1e8] sm:$0xff] %vm204_vm1, %v6001_v58  ;;  %v6392_v5 = vld [vmem:[%s5664_s5 + $0xc2] sm:$0xff] }
  0x35   : > { %5168 = vmatprep.mubr.msk.f32.mxu1 %vm204_vm1, %v994_v38  ;;  %267 = vst.msk [vmem:[#allocation2 + $0x1f0] sm:$0xff] %vm204_vm1, %v6001_v58  ;;  %268 = vst.msk [vmem:[#allocation2 + $0x1f8] sm:$0xff] %vm204_vm1, %v6001_v58  ;;  %v4677_v38 = vld [vmem:[%s5664_s5 + $0xe0] sm:$0xff] }
  0x37   : > { %5143 = vmatmul.mubr.msk.f32.vlgmr.msra.gmra.mrb[16].mxu0 %vm204_vm1, %v5675_v7  ;;  %v288_v7 = vld [vmem:[#allocation2 + $0x8] sm:$0xff] }
  0x38   : > { %5169 = vmatmul.mubr.msk.f32.vlgmr.msra.gmra.mrb[16].mxu1 %vm204_vm1, %v995_v39  ;;  %5193 = vmatpush3.msk.msra.mxu0 %vm352_vm0, %v5689_v10  ;;  %v6478_v39 = vld [vmem:[%s5664_s5 + $0xe1] sm:$0xff] }
  0x39   : > { %5145 = vmatprep.mubr.msk.f32.mxu0 %vm204_vm1, %v5681_v9  ;;  %5171 = vmatprep.mubr.msk.f32.mxu1 %vm204_vm1, %v5842_v40 }
  0x3a   : > { %5219 = vmatpush3.msk.msra.mxu1 %vm352_vm0, %v5694_v11  ;;  %5244 = vmatprep.subr.msk.mxu0 %vm352_vm0, %v4536_v41 }
  0x3b   : > { %5270 = vmatprep.subr.msk.mxu1 %vm352_vm0, %v4554_v42  ;;  %5146 = vmatmul.mubr.msk.f32.gmra.mrb[18].mxu0 %vm204_vm1, %v5703_v13 }
  0x3c   : > { %5172 = vmatmul.mubr.msk.f32.gmra.mrb[18].mxu1 %vm204_vm1, %v5858_v43  ;;  %5148 = vmatprep.mubr.msk.f32.mxu0 %vm204_vm1, %v5711_v15 }
  0x3d   : > { %5174 = vmatprep.mubr.msk.f32.mxu1 %vm204_vm1, %v5863_v44 }
  0x3f   : > { %5149 = vmatmul.mubr.msk.f32.gmra.mrb[20].mxu0 %vm204_vm1, %v5730_v17 }
  0x40   : > { %5175 = vmatmul.mubr.msk.f32.gmra.mrb[20].mxu1 %vm204_vm1, %v5878_v45  ;;  %5151 = vmatprep.mubr.msk.f32.mxu0 %vm204_vm1, %v5736_v19 }
  0x41   : > { %5177 = vmatprep.mubr.msk.f32.mxu1 %vm204_vm1, %v5881_v46 }
  0x43   : > { %5152 = vmatmul.mubr.msk.f32.gmra.mrb[22].mxu0 %vm204_vm1, %v5750_v21 }
  0x44   : > { %5178 = vmatmul.mubr.msk.f32.gmra.mrb[22].mxu1 %vm204_vm1, %v5892_v47  ;;  %5154 = vmatprep.mubr.msk.f32.mxu0 %vm204_vm1, %v5756_v23 }
  0x45   : > { %5180 = vmatprep.mubr.msk.f32.mxu1 %vm204_vm1, %v5895_v48 }
  0x47   : > { %5155 = vmatmul.mubr.msk.f32.gmra.mrb[24].mxu0 %vm204_vm1, %v5770_v25 }
  0x48   : > { %5181 = vmatmul.mubr.msk.f32.gmra.mrb[24].mxu1 %vm204_vm1, %v5906_v49  ;;  %5157 = vmatprep.mubr.msk.f32.mxu0 %vm204_vm1, %v5776_v27 }
  0x49   : > { %5183 = vmatprep.mubr.msk.f32.mxu1 %vm204_vm1, %v5909_v50 }
  0x4b   : > { %5158 = vmatmul.mubr.msk.f32.gmra.mrb[26].mxu0 %vm204_vm1, %v5790_v29 }
  0x4c   : > { %5184 = vmatmul.mubr.msk.f32.gmra.mrb[26].mxu1 %vm204_vm1, %v5920_v51  ;;  %5160 = vmatprep.mubr.msk.f32.mxu0 %vm204_vm1, %v5796_v31 }
  0x4d   : > { %5186 = vmatprep.mubr.msk.f32.mxu1 %vm204_vm1, %v5923_v52 }
  0x4f   : > { %5161 = vmatmul.mubr.msk.f32.gmra.mrb[28].mxu0 %vm204_vm1, %v5810_v33 }
  0x50   : > { %5187 = vmatmul.mubr.msk.f32.gmra.mrb[28].mxu1 %vm204_vm1, %v5934_v53  ;;  %5163 = vmatprep.mubr.msk.f32.mxu0 %vm204_vm1, %v5816_v35 }
  0x51   : > { %5189 = vmatprep.mubr.msk.f32.mxu1 %vm204_vm1, %v5937_v54 }
  0x53   : > { %5164 = vmatmul.mubr.msk.f32.gmra.mrb[30].mxu0 %vm204_vm1, %v5830_v37 }
  0x54   : > { %5190 = vmatmul.mubr.msk.f32.gmra.mrb[30].mxu1 %vm204_vm1, %v5948_v55  ;;  %5194 = vmatprep.mubr.msk.f32.mxu0 %vm204_vm1, %v5678_v8 }
  0x55   : > { %5220 = vmatprep.mubr.msk.f32.mxu1 %vm204_vm1, %v5678_v8  ;;  %v287_v8 = vld [vmem:[#allocation2] sm:$0xff] }
  0x57   : > { %5195 = vmatmul.mubr.msk.f32.vlgmr.msra.gmra.mrb[32].mxu0 %vm204_vm1, %v5700_v12 }
  0x58   : > { %5221 = vmatmul.mubr.msk.f32.vlgmr.msra.gmra.mrb[32].mxu1 %vm204_vm1, %v5700_v12  ;;  %5245 = vmatpush3.msk.msra.mxu0 %vm352_vm0, %v4536_v41 }
  0x59   : > { %5197 = vmatprep.mubr.msk.f32.mxu0 %vm204_vm1, %v5708_v14  ;;  %5223 = vmatprep.mubr.msk.f32.mxu1 %vm204_vm1, %v5708_v14 }
  0x5a   : > { %5271 = vmatpush3.msk.msra.mxu1 %vm352_vm0, %v4554_v42  ;;  %5296 = vmatprep.subr.msk.mxu0 %vm352_vm0, %v5965_v56 }
  0x5b   : > { %5322 = vmatprep.subr.msk.mxu1 %vm352_vm0, %v5970_v57  ;;  %5198 = vmatmul.mubr.msk.f32.gmra.mrb[34].mxu0 %vm204_vm1, %v5727_v16 }
  0x5c   : > { %5224 = vmatmul.mubr.msk.f32.gmra.mrb[34].mxu1 %vm204_vm1, %v5727_v16  ;;  %5200 = vmatprep.mubr.msk.f32.mxu0 %vm204_vm1, %v5733_v18 }
  0x5d   : > { %5226 = vmatprep.mubr.msk.f32.mxu1 %vm204_vm1, %v5733_v18 }
  0x5f   : > { %5201 = vmatmul.mubr.msk.f32.gmra.mrb[36].mxu0 %vm204_vm1, %v5747_v20 }
  0x60   : > { %5227 = vmatmul.mubr.msk.f32.gmra.mrb[36].mxu1 %vm204_vm1, %v5747_v20  ;;  %5203 = vmatprep.mubr.msk.f32.mxu0 %vm204_vm1, %v5753_v22 }
  0x61   : > { %5229 = vmatprep.mubr.msk.f32.mxu1 %vm204_vm1, %v5753_v22 }
  0x63   : > { %5204 = vmatmul.mubr.msk.f32.gmra.mrb[38].mxu0 %vm204_vm1, %v5767_v24 }
  0x64   : > { %5230 = vmatmul.mubr.msk.f32.gmra.mrb[38].mxu1 %vm204_vm1, %v5767_v24  ;;  %5206 = vmatprep.mubr.msk.f32.mxu0 %vm204_vm1, %v5773_v26 }
  0x65   : > { %5232 = vmatprep.mubr.msk.f32.mxu1 %vm204_vm1, %v5773_v26 }
  0x67   : > { %5207 = vmatmul.mubr.msk.f32.gmra.mrb[40].mxu0 %vm204_vm1, %v5787_v28 }
  0x68   : > { %5233 = vmatmul.mubr.msk.f32.gmra.mrb[40].mxu1 %vm204_vm1, %v5787_v28  ;;  %5209 = vmatprep.mubr.msk.f32.mxu0 %vm204_vm1, %v5793_v30 }
  0x69   : > { %5235 = vmatprep.mubr.msk.f32.mxu1 %vm204_vm1, %v5793_v30 }
  0x6b   : > { %5210 = vmatmul.mubr.msk.f32.gmra.mrb[42].mxu0 %vm204_vm1, %v5807_v32 }
  0x6c   : > { %5236 = vmatmul.mubr.msk.f32.gmra.mrb[42].mxu1 %vm204_vm1, %v5807_v32  ;;  %5212 = vmatprep.mubr.msk.f32.mxu0 %vm204_vm1, %v5813_v34 }
  0x6d   : > { %5238 = vmatprep.mubr.msk.f32.mxu1 %vm204_vm1, %v5813_v34 }
  0x6f   : > { %5213 = vmatmul.mubr.msk.f32.gmra.mrb[44].mxu0 %vm204_vm1, %v5827_v36 }
  0x70   : > { %5239 = vmatmul.mubr.msk.f32.gmra.mrb[44].mxu1 %vm204_vm1, %v5827_v36  ;;  %5215 = vmatprep.mubr.msk.f32.mxu0 %vm204_vm1, %v6156_v59 }
  0x71   : > { %5241 = vmatprep.mubr.msk.f32.mxu1 %vm204_vm1, %v6156_v59 }
  0x73   : > { %5216 = vmatmul.mubr.msk.f32.gmra.mrb[46].mxu0 %vm204_vm1, %v6167_v60 }
  0x74   : > { %5242 = vmatmul.mubr.msk.f32.gmra.mrb[46].mxu1 %vm204_vm1, %v6167_v60  ;;  %5246 = vmatprep.mubr.msk.f32.mxu0 %vm204_vm1, %v5681_v9 }
  0x75   : > { %5272 = vmatprep.mubr.msk.f32.mxu1 %vm204_vm1, %v5681_v9 }
  0x77   : > { %5247 = vmatmul.mubr.msk.f32.vlgmr.msra.gmra.mrb[48].mxu0 %vm204_vm1, %v5703_v13 }
  0x78   : > { %5273 = vmatmul.mubr.msk.f32.vlgmr.msra.gmra.mrb[48].mxu1 %vm204_vm1, %v5703_v13  ;;  %5297 = vmatpush3.msk.msra.mxu0 %vm352_vm0, %v5965_v56  ;;  %v294_v56 = vld [vmem:[#allocation2 + $0x38] sm:$0xff] }
  0x79   : > { %5249 = vmatprep.mubr.msk.f32.mxu0 %vm204_vm1, %v5711_v15  ;;  %5275 = vmatprep.mubr.msk.f32.mxu1 %vm204_vm1, %v5711_v15 }
  0x7a   : > { %5323 = vmatpush3.msk.msra.mxu1 %vm352_vm0, %v5970_v57  ;;  %5348 = vmatprep.subr.msk.mxu0 %vm352_vm0, %v4624_v61 }
  0x7b   : > { %5374 = vmatprep.subr.msk.mxu1 %vm352_vm0, %v4642_v62  ;;  %5250 = vmatmul.mubr.msk.f32.gmra.mrb[50].mxu0 %vm204_vm1, %v5730_v17 }
  0x7c   : > { %5276 = vmatmul.mubr.msk.f32.gmra.mrb[50].mxu1 %vm204_vm1, %v5730_v17  ;;  %5252 = vmatprep.mubr.msk.f32.mxu0 %vm204_vm1, %v5736_v19 }
  0x7d   : > { %5278 = vmatprep.mubr.msk.f32.mxu1 %vm204_vm1, %v5736_v19 }
  0x7f   : > { %5253 = vmatmul.mubr.msk.f32.gmra.mrb[52].mxu0 %vm204_vm1, %v5750_v21 }
  0x80   : > { %5279 = vmatmul.mubr.msk.f32.gmra.mrb[52].mxu1 %vm204_vm1, %v5750_v21  ;;  %5255 = vmatprep.mubr.msk.f32.mxu0 %vm204_vm1, %v5756_v23 }
  0x81   : > { %5281 = vmatprep.mubr.msk.f32.mxu1 %vm204_vm1, %v5756_v23 }
  0x83   : > { %5256 = vmatmul.mubr.msk.f32.gmra.mrb[54].mxu0 %vm204_vm1, %v5770_v25 }
  0x84   : > { %5282 = vmatmul.mubr.msk.f32.gmra.mrb[54].mxu1 %vm204_vm1, %v5770_v25  ;;  %5258 = vmatprep.mubr.msk.f32.mxu0 %vm204_vm1, %v5776_v27 }
  0x85   : > { %5284 = vmatprep.mubr.msk.f32.mxu1 %vm204_vm1, %v5776_v27 }
  0x87   : > { %5259 = vmatmul.mubr.msk.f32.gmra.mrb[56].mxu0 %vm204_vm1, %v5790_v29 }
  0x88   : > { %5285 = vmatmul.mubr.msk.f32.gmra.mrb[56].mxu1 %vm204_vm1, %v5790_v29  ;;  %5261 = vmatprep.mubr.msk.f32.mxu0 %vm204_vm1, %v5796_v31 }
  0x89   : > { %5287 = vmatprep.mubr.msk.f32.mxu1 %vm204_vm1, %v5796_v31 }
  0x8b   : > { %5262 = vmatmul.mubr.msk.f32.gmra.mrb[58].mxu0 %vm204_vm1, %v5810_v33 }
  0x8c   : > { %5288 = vmatmul.mubr.msk.f32.gmra.mrb[58].mxu1 %vm204_vm1, %v5810_v33  ;;  %5264 = vmatprep.mubr.msk.f32.mxu0 %vm204_vm1, %v5816_v35 }
  0x8d   : > { %5290 = vmatprep.mubr.msk.f32.mxu1 %vm204_vm1, %v5816_v35 }
  0x8f   : > { %5265 = vmatmul.mubr.msk.f32.gmra.mrb[60].mxu0 %vm204_vm1, %v5830_v37 }
  0x90   : > { %5291 = vmatmul.mubr.msk.f32.gmra.mrb[60].mxu1 %vm204_vm1, %v5830_v37  ;;  %5267 = vmatprep.mubr.msk.f32.mxu0 %vm204_vm1, %v6238_v63 }
  0x91   : > { %5293 = vmatprep.mubr.msk.f32.mxu1 %vm204_vm1, %v6238_v63 }
  0x93   : > { %5268 = vmatmul.mubr.msk.f32.gmra.mrb[62].mxu0 %vm204_vm1, %v6249_v0 }
  0x94   : > { %5294 = vmatmul.mubr.msk.f32.gmra.mrb[62].mxu1 %vm204_vm1, %v6249_v0  ;;  %5298 = vmatprep.mubr.msk.f32.mxu0 %vm204_vm1, %v5681_v9 }
  0x95   : > { %5324 = vmatprep.mubr.msk.f32.mxu1 %vm204_vm1, %v5681_v9 }
  0x97   : > { %5299 = vmatmul.mubr.msk.f32.vlgmr.msra.gmra.mrb[64].mxu0 %vm204_vm1, %v5703_v13 }
  0x98   : > { %5325 = vmatmul.mubr.msk.f32.vlgmr.msra.gmra.mrb[64].mxu1 %vm204_vm1, %v5703_v13  ;;  %5349 = vmatpush3.msk.msra.mxu0 %vm352_vm0, %v4624_v61 }
  0x99   : > { %5301 = vmatprep.mubr.msk.f32.mxu0 %vm204_vm1, %v5711_v15  ;;  %5327 = vmatprep.mubr.msk.f32.mxu1 %vm204_vm1, %v5711_v15 }
  0x9a   : > { %5375 = vmatpush3.msk.msra.mxu1 %vm352_vm0, %v4642_v62  ;;  %5400 = vmatprep.subr.msk.mxu0 %vm352_vm0, %v4678_v1 }
  0x9b   : > { %5426 = vmatprep.subr.msk.mxu1 %vm352_vm0, %v4712_v2  ;;  %5302 = vmatmul.mubr.msk.f32.gmra.mrb[66].mxu0 %vm204_vm1, %v5730_v17 }
  0x9c   : > { %5328 = vmatmul.mubr.msk.f32.gmra.mrb[66].mxu1 %vm204_vm1, %v5730_v17  ;;  %5304 = vmatprep.mubr.msk.f32.mxu0 %vm204_vm1, %v5736_v19 }
  0x9d   : > { %5330 = vmatprep.mubr.msk.f32.mxu1 %vm204_vm1, %v5736_v19 }
  0x9f   : > { %5305 = vmatmul.mubr.msk.f32.gmra.mrb[68].mxu0 %vm204_vm1, %v5750_v21 }
  0xa0   : > { %5331 = vmatmul.mubr.msk.f32.gmra.mrb[68].mxu1 %vm204_vm1, %v5750_v21  ;;  %5307 = vmatprep.mubr.msk.f32.mxu0 %vm204_vm1, %v5756_v23 }
  0xa1   : > { %5333 = vmatprep.mubr.msk.f32.mxu1 %vm204_vm1, %v5756_v23 }
  0xa3   : > { %5308 = vmatmul.mubr.msk.f32.gmra.mrb[70].mxu0 %vm204_vm1, %v5770_v25 }
  0xa4   : > { %5334 = vmatmul.mubr.msk.f32.gmra.mrb[70].mxu1 %vm204_vm1, %v5770_v25  ;;  %5310 = vmatprep.mubr.msk.f32.mxu0 %vm204_vm1, %v5776_v27 }
  0xa5   : > { %5336 = vmatprep.mubr.msk.f32.mxu1 %vm204_vm1, %v5776_v27 }
  0xa7   : > { %5311 = vmatmul.mubr.msk.f32.gmra.mrb[72].mxu0 %vm204_vm1, %v5790_v29 }
  0xa8   : > { %5337 = vmatmul.mubr.msk.f32.gmra.mrb[72].mxu1 %vm204_vm1, %v5790_v29  ;;  %5313 = vmatprep.mubr.msk.f32.mxu0 %vm204_vm1, %v5796_v31 }
  0xa9   : > { %5339 = vmatprep.mubr.msk.f32.mxu1 %vm204_vm1, %v5796_v31 }
  0xab   : > { %5314 = vmatmul.mubr.msk.f32.gmra.mrb[74].mxu0 %vm204_vm1, %v5810_v33 }
  0xac   : > { %5340 = vmatmul.mubr.msk.f32.gmra.mrb[74].mxu1 %vm204_vm1, %v5810_v33  ;;  %5316 = vmatprep.mubr.msk.f32.mxu0 %vm204_vm1, %v5816_v35 }
  0xad   : > { %5342 = vmatprep.mubr.msk.f32.mxu1 %vm204_vm1, %v5816_v35 }
  0xaf   : > { %5317 = vmatmul.mubr.msk.f32.gmra.mrb[76].mxu0 %vm204_vm1, %v5830_v37 }
  0xb0   : > { %5343 = vmatmul.mubr.msk.f32.gmra.mrb[76].mxu1 %vm204_vm1, %v5830_v37  ;;  %5319 = vmatprep.mubr.msk.f32.mxu0 %vm204_vm1, %v6238_v63 }
  0xb1   : > { %5345 = vmatprep.mubr.msk.f32.mxu1 %vm204_vm1, %v6238_v63 }
  0xb3   : > { %5320 = vmatmul.mubr.msk.f32.gmra.mrb[78].mxu0 %vm204_vm1, %v6249_v0 }
  0xb4   : > { %5346 = vmatmul.mubr.msk.f32.gmra.mrb[78].mxu1 %vm204_vm1, %v6249_v0  ;;  %5350 = vmatprep.mubr.msk.f32.mxu0 %vm204_vm1, %v5842_v40 }
  0xb5   : > { %5376 = vmatprep.mubr.msk.f32.mxu1 %vm204_vm1, %v5842_v40  ;;  %v291_v40 = vld [vmem:[#allocation2 + $0x20] sm:$0xff] }
  0xb7   : > { %5351 = vmatmul.mubr.msk.f32.vlgmr.msra.gmra.mrb[80].mxu0 %vm204_vm1, %v5858_v43 }
  0xb8   : > { %5377 = vmatmul.mubr.msk.f32.vlgmr.msra.gmra.mrb[80].mxu1 %vm204_vm1, %v5858_v43  ;;  %5401 = vmatpush3.msk.msra.mxu0 %vm352_vm0, %v4678_v1 }
  0xb9   : > { %5353 = vmatprep.mubr.msk.f32.mxu0 %vm204_vm1, %v5863_v44  ;;  %5379 = vmatprep.mubr.msk.f32.mxu1 %vm204_vm1, %v5863_v44 }
  0xba   : > { %5427 = vmatpush3.msk.msra.mxu1 %vm352_vm0, %v4712_v2  ;;  %5452 = vmatprep.subr.msk.mxu0 %vm352_vm0, %v4730_v3 }
  0xbb   : > { %5478 = vmatprep.subr.msk.mxu1 %vm352_vm0, %v4764_v4  ;;  %5354 = vmatmul.mubr.msk.f32.gmra.mrb[82].mxu0 %vm204_vm1, %v5878_v45 }
  0xbc   : > { %5380 = vmatmul.mubr.msk.f32.gmra.mrb[82].mxu1 %vm204_vm1, %v5878_v45  ;;  %5356 = vmatprep.mubr.msk.f32.mxu0 %vm204_vm1, %v5881_v46 }
  0xbd   : > { %5382 = vmatprep.mubr.msk.f32.mxu1 %vm204_vm1, %v5881_v46 }
  0xbf   : > { %5357 = vmatmul.mubr.msk.f32.gmra.mrb[84].mxu0 %vm204_vm1, %v5892_v47 }
  0xc0   : > { %5383 = vmatmul.mubr.msk.f32.gmra.mrb[84].mxu1 %vm204_vm1, %v5892_v47  ;;  %5359 = vmatprep.mubr.msk.f32.mxu0 %vm204_vm1, %v5895_v48 }
  0xc1   : > { %5385 = vmatprep.mubr.msk.f32.mxu1 %vm204_vm1, %v5895_v48 }
  0xc3   : > { %5360 = vmatmul.mubr.msk.f32.gmra.mrb[86].mxu0 %vm204_vm1, %v5906_v49 }
  0xc4   : > { %5386 = vmatmul.mubr.msk.f32.gmra.mrb[86].mxu1 %vm204_vm1, %v5906_v49  ;;  %5362 = vmatprep.mubr.msk.f32.mxu0 %vm204_vm1, %v5909_v50 }
  0xc5   : > { %5388 = vmatprep.mubr.msk.f32.mxu1 %vm204_vm1, %v5909_v50 }
  0xc7   : > { %5363 = vmatmul.mubr.msk.f32.gmra.mrb[88].mxu0 %vm204_vm1, %v5920_v51 }
  0xc8   : > { %5389 = vmatmul.mubr.msk.f32.gmra.mrb[88].mxu1 %vm204_vm1, %v5920_v51  ;;  %5365 = vmatprep.mubr.msk.f32.mxu0 %vm204_vm1, %v5923_v52 }
  0xc9   : > { %5391 = vmatprep.mubr.msk.f32.mxu1 %vm204_vm1, %v5923_v52 }
  0xcb   : > { %5366 = vmatmul.mubr.msk.f32.gmra.mrb[90].mxu0 %vm204_vm1, %v5934_v53 }
  0xcc   : > { %5392 = vmatmul.mubr.msk.f32.gmra.mrb[90].mxu1 %vm204_vm1, %v5934_v53  ;;  %5368 = vmatprep.mubr.msk.f32.mxu0 %vm204_vm1, %v5937_v54 }
  0xcd   : > { %5394 = vmatprep.mubr.msk.f32.mxu1 %vm204_vm1, %v5937_v54 }
  0xcf   : > { %5369 = vmatmul.mubr.msk.f32.gmra.mrb[92].mxu0 %vm204_vm1, %v5948_v55 }
  0xd0   : > { %5395 = vmatmul.mubr.msk.f32.gmra.mrb[92].mxu1 %vm204_vm1, %v5948_v55  ;;  %5371 = vmatprep.mubr.msk.f32.mxu0 %vm204_vm1, %v6392_v5 }
  0xd1   : > { %5397 = vmatprep.mubr.msk.f32.mxu1 %vm204_vm1, %v6392_v5 }
  0xd3   : > { %5372 = vmatmul.mubr.msk.f32.gmra.mrb[94].mxu0 %vm204_vm1, %v6403_v6 }
  0xd4   : > { %5398 = vmatmul.mubr.msk.f32.gmra.mrb[94].mxu1 %vm204_vm1, %v6403_v6  ;;  %5402 = vmatprep.mubr.msk.f32.mxu0 %vm204_vm1, %v5708_v14 }
  0xd5   : > { %5428 = vmatprep.mubr.msk.f32.mxu1 %vm204_vm1, %v5711_v15 }
  0xd7   : > { %5403 = vmatmul.mubr.msk.f32.vlgmr.msra.gmra.mrb[96].mxu0 %vm204_vm1, %v5727_v16  ;;  %v290_v16 = vld [vmem:[#allocation2 + $0x18] sm:$0xff] }
  0xd8   : > { %5429 = vmatmul.mubr.msk.f32.vlgmr.msra.gmra.mrb[96].mxu1 %vm204_vm1, %v5730_v17  ;;  %5453 = vmatpush3.msk.msra.mxu0 %vm352_vm0, %v4730_v3 }
  0xd9   : > { %5405 = vmatprep.mubr.msk.f32.mxu0 %vm204_vm1, %v5733_v18  ;;  %5479 = vmatpush3.msk.msra.mxu1 %vm352_vm0, %v4764_v4  ;;  %v289_v18 = vld [vmem:[#allocation2 + $0x10] sm:$0xff]  ;;  %v296_v4 = vld [vmem:[#allocation2 + $0x48] sm:$0xff] }
  0xda   : > { %5431 = vmatprep.mubr.msk.f32.mxu1 %vm204_vm1, %v5736_v19 }
  0xdb   : > { %5406 = vmatmul.mubr.msk.f32.gmra.mrb[98].mxu0 %vm204_vm1, %v5747_v20  ;;  %v4676_v20 = vld [vmem:[%s5664_s5 + $0xd8] sm:$0xff] }
  0xdc   : > { %5432 = vmatmul.mubr.msk.f32.gmra.mrb[98].mxu1 %vm204_vm1, %v5750_v21  ;;  %5408 = vmatprep.mubr.msk.f32.mxu0 %vm204_vm1, %v5753_v22  ;;  %v6466_v22 = vld [vmem:[%s5664_s5 + $0xd9] sm:$0xff] }
  0xdd   : > { %5434 = vmatprep.mubr.msk.f32.mxu1 %vm204_vm1, %v5756_v23 }
  0xdf   : > { %5409 = vmatmul.mubr.msk.f32.gmra.mrb[100].mxu0 %vm204_vm1, %v5767_v24 }
  0xe0   : > { %5435 = vmatmul.mubr.msk.f32.gmra.mrb[100].mxu1 %vm204_vm1, %v5770_v25  ;;  %5411 = vmatprep.mubr.msk.f32.mxu0 %vm204_vm1, %v5773_v26 }
  0xe1   : > { %5437 = vmatprep.mubr.msk.f32.mxu1 %vm204_vm1, %v5776_v27 }
  0xe3   : > { %5412 = vmatmul.mubr.msk.f32.gmra.mrb[102].mxu0 %vm204_vm1, %v5787_v28 }
  0xe4   : > { %5438 = vmatmul.mubr.msk.f32.gmra.mrb[102].mxu1 %vm204_vm1, %v5790_v29  ;;  %5414 = vmatprep.mubr.msk.f32.mxu0 %vm204_vm1, %v5793_v30 }
  0xe5   : > { %5440 = vmatprep.mubr.msk.f32.mxu1 %vm204_vm1, %v5796_v31 }
  0xe7   : > { %5415 = vmatmul.mubr.msk.f32.gmra.mrb[104].mxu0 %vm204_vm1, %v5807_v32 }
  0xe8   : > { %5441 = vmatmul.mubr.msk.f32.gmra.mrb[104].mxu1 %vm204_vm1, %v5810_v33  ;;  %5417 = vmatprep.mubr.msk.f32.mxu0 %vm204_vm1, %v5813_v34 }
  0xe9   : > { %5443 = vmatprep.mubr.msk.f32.mxu1 %vm204_vm1, %v5816_v35 }
  0xea   : > { %v5092_v9 = vpop.f32.mrb[0].mxu0 }
  0xeb   : > { %v5118_v10 = vpop.f32.mrb[0].mxu1  ;;  %v502_v11 = vadd.f32 %v5092_v9, %v288_v7  ;;  %v422_v12 = vpop.f32.mrb[1].mxu0  ;;  %5418 = vmatmul.mubr.msk.f32.gmra.mrb[106].mxu0 %vm204_vm1, %v5827_v36  ;;  %v292_v36 = vld [vmem:[#allocation2 + $0x28] sm:$0xff] }
  0xec   : > { %v684_v13 = vpop.f32.mrb[1].mxu1  ;;  %5444 = vmatmul.mubr.msk.f32.gmra.mrb[106].mxu1 %vm204_vm1, %v5830_v37  ;;  %v501_v14 = vadd.f32 %v422_v12, %v287_v8  ;;  %5420 = vmatprep.mubr.msk.f32.mxu0 %vm204_vm1, %v6156_v59  ;;  %v293_v59 = vld [vmem:[#allocation2 + $0x30] sm:$0xff] }
  0xed   : > { %5446 = vmatprep.mubr.msk.f32.mxu1 %vm204_vm1, %v6238_v63  ;;  %518 = vst.msk [vmem:[#allocation2 + $0x8] sm:$0xff] %vm204_vm1, %v502_v11 }
  0xee   : > { %517 = vst.msk [vmem:[#allocation2] sm:$0xff] %vm204_vm1, %v501_v14  ;;  %v5095_v24 = vpop.f32.mrb[2].mxu0  ;;  %v298_v14 = vld [vmem:[#allocation2 + $0x58] sm:$0xff] }
  0xef   : > { %v5121_v26 = vpop.f32.mrb[2].mxu1  ;;  %v504_v28 = vadd.f32 %v5095_v24, %v290_v16  ;;  %v432_v30 = vpop.f32.mrb[3].mxu0  ;;  %5421 = vmatmul.mubr.msk.f32.gmra.mrb[108].mxu0 %vm204_vm1, %v6167_v60 }
  0xf0   : > { %v694_v32 = vpop.f32.mrb[3].mxu1  ;;  %5447 = vmatmul.mubr.msk.f32.gmra.mrb[108].mxu1 %vm204_vm1, %v6249_v0  ;;  %v503_v34 = vadd.f32 %v432_v30, %v289_v18  ;;  %5423 = vmatprep.mubr.msk.f32.mxu0 %vm204_vm1, %v4676_v20 }
  0xf1   : > { %5449 = vmatprep.mubr.msk.f32.mxu1 %vm204_vm1, %v6466_v22  ;;  %520 = vst.msk [vmem:[#allocation2 + $0x18] sm:$0xff] %vm204_vm1, %v504_v28 }
  0xf2   : > { %519 = vst.msk [vmem:[#allocation2 + $0x10] sm:$0xff] %vm204_vm1, %v503_v34  ;;  %v5098_v41 = vpop.f32.mrb[4].mxu0 }
  0xf3   : > { %v5124_v42 = vpop.f32.mrb[4].mxu1  ;;  %v506_v43 = vadd.f32 %v5098_v41, %v292_v36  ;;  %v442_v52 = vpop.f32.mrb[5].mxu0  ;;  %5424 = vmatmul.mubr.msk.f32.gmra.mrb[110].mxu0 %vm204_vm1, %v4677_v38  ;;  %v4756_v38 = vld [vmem:[%s5664_s5 + $0x92] sm:$0xff] }
  0xf4   : > { %v704_v53 = vpop.f32.mrb[5].mxu1  ;;  %5450 = vmatmul.mubr.msk.f32.gmra.mrb[110].mxu1 %vm204_vm1, %v6478_v39  ;;  %v505_v54 = vadd.f32 %v442_v52, %v291_v40  ;;  %v550_v55 = vld [vmem:[#allocation2 + $0x8] sm:$0xff]  ;;  %5454 = vmatprep.mubr.msk.f32.mxu0 %vm204_vm1, %v5711_v15 }
  0xf5   : > { %5480 = vmatprep.mubr.msk.f32.mxu1 %vm204_vm1, %v5863_v44  ;;  %522 = vst.msk [vmem:[#allocation2 + $0x28] sm:$0xff] %vm204_vm1, %v506_v43  ;;  %v764_v57 = vadd.f32 %v5118_v10, %v550_v55  ;;  %v549_v58 = vld [vmem:[#allocation2] sm:$0xff] }
  0xf6   : > { %521 = vst.msk [vmem:[#allocation2 + $0x20] sm:$0xff] %vm204_vm1, %v505_v54  ;;  %v763_v60 = vadd.f32 %v684_v13, %v549_v58  ;;  %v5101_v61 = vpop.f32.mrb[6].mxu0  ;;  %v4757_v54 = vld [vmem:[%s5664_s5 + $0x9a] sm:$0xff] }
  0xf7   : > { %v5127_v62 = vpop.f32.mrb[6].mxu1  ;;  %780 = vst.msk [vmem:[#allocation2 + $0x8] sm:$0xff] %vm204_vm1, %v764_v57  ;;  %v508_v1 = vadd.f32 %v5101_v61, %v294_v56  ;;  %v452_v2 = vpop.f32.mrb[7].mxu0  ;;  %5455 = vmatmul.mubr.msk.f32.vlgmr.msra.gmra.mrb[112].mxu0 %vm204_vm1, %v5730_v17  ;;  %v295_v17 = vld [vmem:[#allocation2 + $0x40] sm:$0xff]  ;;  %v4758_v57 = vld [vmem:[%s5664_s5 + $0xaa] sm:$0xff] }
  0xf8   : > { %v714_v15 = vpop.f32.mrb[7].mxu1  ;;  %5481 = vmatmul.mubr.msk.f32.vlgmr.msra.gmra.mrb[112].mxu1 %vm204_vm1, %v5878_v45  ;;  %779 = vst.msk [vmem:[#allocation2] sm:$0xff] %vm204_vm1, %v763_v60  ;;  %v507_v44 = vadd.f32 %v452_v2, %v293_v59  ;;  %v552_v3 = vld [vmem:[#allocation2 + $0x18] sm:$0xff]  ;;  %5457 = vmatprep.mubr.msk.f32.mxu0 %vm204_vm1, %v5736_v19  ;;  %v797_v2 = vld [vmem:[#allocation2 + $0x88] sm:$0xff] }
  0xf9   : > { %5483 = vmatprep.mubr.msk.f32.mxu1 %vm204_vm1, %v5881_v46  ;;  %524 = vst.msk [vmem:[#allocation2 + $0x38] sm:$0xff] %vm204_vm1, %v508_v1  ;;  %v766_v7 = vadd.f32 %v5121_v26, %v552_v3  ;;  %v551_v8 = vld [vmem:[#allocation2 + $0x10] sm:$0xff] }
  0xfa   : > { %523 = vst.msk [vmem:[#allocation2 + $0x30] sm:$0xff] %vm204_vm1, %v507_v44  ;;  %v765_v9 = vadd.f32 %v694_v32, %v551_v8  ;;  %v5104_v45 = vpop.f32.mrb[8].mxu0  ;;  %v300_v32 = vld [vmem:[#allocation2 + $0x68] sm:$0xff] }
  0xfb   : > { %v5130_v10 = vpop.f32.mrb[8].mxu1  ;;  %782 = vst.msk [vmem:[#allocation2 + $0x18] sm:$0xff] %vm204_vm1, %v766_v7  ;;  %v510_v11 = vadd.f32 %v5104_v45, %v296_v4  ;;  %v462_v12 = vpop.f32.mrb[9].mxu0  ;;  %5458 = vmatmul.mubr.msk.f32.gmra.mrb[114].mxu0 %vm204_vm1, %v5750_v21  ;;  %v297_v21 = vld [vmem:[#allocation2 + $0x50] sm:$0xff]  ;;  %v796_v4 = vld [vmem:[#allocation2 + $0x80] sm:$0xff] }
  0xfc   : > { %v724_v19 = vpop.f32.mrb[9].mxu1  ;;  %5484 = vmatmul.mubr.msk.f32.gmra.mrb[114].mxu1 %vm204_vm1, %v5892_v47  ;;  %781 = vst.msk [vmem:[#allocation2 + $0x10] sm:$0xff] %vm204_vm1, %v765_v9  ;;  %v509_v46 = vadd.f32 %v462_v12, %v295_v17  ;;  %v554_v13 = vld [vmem:[#allocation2 + $0x28] sm:$0xff]  ;;  %5460 = vmatprep.mubr.msk.f32.mxu0 %vm204_vm1, %v5756_v23 }
  0xfd   : > { %5486 = vmatprep.mubr.msk.f32.mxu1 %vm204_vm1, %v5895_v48  ;;  %526 = vst.msk [vmem:[#allocation2 + $0x48] sm:$0xff] %vm204_vm1, %v510_v11  ;;  %v768_v16 = vadd.f32 %v5124_v42, %v554_v13  ;;  %v553_v18 = vld [vmem:[#allocation2 + $0x20] sm:$0xff]  ;;  %v799_v11 = vld [vmem:[#allocation2 + $0x98] sm:$0xff] }
  0xfe   : > { %525 = vst.msk [vmem:[#allocation2 + $0x40] sm:$0xff] %vm204_vm1, %v509_v46  ;;  %v767_v20 = vadd.f32 %v704_v53, %v553_v18  ;;  %v5107_v47 = vpop.f32.mrb[10].mxu0  ;;  %v302_v53 = vld [vmem:[#allocation2 + $0x78] sm:$0xff]  ;;  %v798_v46 = vld [vmem:[#allocation2 + $0x90] sm:$0xff] }
  0xff   : > { %v5133_v24 = vpop.f32.mrb[10].mxu1  ;;  %784 = vst.msk [vmem:[#allocation2 + $0x28] sm:$0xff] %vm204_vm1, %v768_v16  ;;  %v512_v26 = vadd.f32 %v5107_v47, %v298_v14  ;;  %v472_v28 = vpop.f32.mrb[11].mxu0  ;;  %5461 = vmatmul.mubr.msk.f32.gmra.mrb[116].mxu0 %vm204_vm1, %v5770_v25  ;;  %v299_v25 = vld [vmem:[#allocation2 + $0x60] sm:$0xff]  ;;  %v801_v47 = vld [vmem:[#allocation2 + $0xa8] sm:$0xff] }
 0x100   : > { %v734_v23 = vpop.f32.mrb[11].mxu1  ;;  %5487 = vmatmul.mubr.msk.f32.gmra.mrb[116].mxu1 %vm204_vm1, %v5906_v49  ;;  %783 = vst.msk [vmem:[#allocation2 + $0x20] sm:$0xff] %vm204_vm1, %v767_v20  ;;  %v511_v48 = vadd.f32 %v472_v28, %v297_v21  ;;  %v556_v30 = vld [vmem:[#allocation2 + $0x38] sm:$0xff]  ;;  %5463 = vmatprep.mubr.msk.f32.mxu0 %vm204_vm1, %v5776_v27 }
 0x101   : > { %5489 = vmatprep.mubr.msk.f32.mxu1 %vm204_vm1, %v5909_v50  ;;  %528 = vst.msk [vmem:[#allocation2 + $0x58] sm:$0xff] %vm204_vm1, %v512_v26  ;;  %v770_v34 = vadd.f32 %v5127_v62, %v556_v30  ;;  %v555_v36 = vld [vmem:[#allocation2 + $0x30] sm:$0xff] }
 0x102   : > { %527 = vst.msk [vmem:[#allocation2 + $0x50] sm:$0xff] %vm204_vm1, %v511_v48  ;;  %v769_v49 = vadd.f32 %v714_v15, %v555_v36  ;;  %v5110_v40 = vpop.f32.mrb[12].mxu0  ;;  %v4759_v15 = vld [vmem:[%s5664_s5 + $0xb2] sm:$0xff] }
 0x103   : > { %v5136_v41 = vpop.f32.mrb[12].mxu1  ;;  %786 = vst.msk [vmem:[#allocation2 + $0x38] sm:$0xff] %vm204_vm1, %v770_v34  ;;  %v514_v42 = vadd.f32 %v5110_v40, %v300_v32  ;;  %v482_v27 = vpop.f32.mrb[13].mxu0  ;;  %5464 = vmatmul.mubr.msk.f32.gmra.mrb[118].mxu0 %vm204_vm1, %v5790_v29  ;;  %v301_v29 = vld [vmem:[#allocation2 + $0x70] sm:$0xff] }
 0x104   : > { %v744_v50 = vpop.f32.mrb[13].mxu1  ;;  %5490 = vmatmul.mubr.msk.f32.gmra.mrb[118].mxu1 %vm204_vm1, %v5920_v51  ;;  %785 = vst.msk [vmem:[#allocation2 + $0x30] sm:$0xff] %vm204_vm1, %v769_v49  ;;  %v513_v43 = vadd.f32 %v482_v27, %v299_v25  ;;  %v558_v52 = vld [vmem:[#allocation2 + $0x48] sm:$0xff]  ;;  %5466 = vmatprep.mubr.msk.f32.mxu0 %vm204_vm1, %v5796_v31  ;;  %v803_v25 = vld [vmem:[#allocation2 + $0xb8] sm:$0xff]  ;;  %v802_v40 = vld [vmem:[#allocation2 + $0xb0] sm:$0xff] }
 0x105   : > { %5492 = vmatprep.mubr.msk.f32.mxu1 %vm204_vm1, %v4756_v38  ;;  %530 = vst.msk [vmem:[#allocation2 + $0x68] sm:$0xff] %vm204_vm1, %v514_v42  ;;  %v772_v55 = vadd.f32 %v5130_v10, %v558_v52  ;;  %v557_v56 = vld [vmem:[#allocation2 + $0x40] sm:$0xff] }
 0x106   : > { %529 = vst.msk [vmem:[#allocation2 + $0x60] sm:$0xff] %vm204_vm1, %v513_v43  ;;  %v771_v51 = vadd.f32 %v724_v19, %v557_v56  ;;  %v5113_v58 = vpop.f32.mrb[14].mxu0 }
 0x107   : > { %v5139_v59 = vpop.f32.mrb[14].mxu1  ;;  %788 = vst.msk [vmem:[#allocation2 + $0x48] sm:$0xff] %vm204_vm1, %v772_v55  ;;  %v516_v60 = vadd.f32 %v5113_v58, %v302_v53  ;;  %v492_v61 = vpop.f32.mrb[15].mxu0  ;;  %5467 = vmatmul.mubr.msk.f32.gmra.mrb[120].mxu0 %vm204_vm1, %v5810_v33 }
 0x108   : > { %v754_v31 = vpop.f32.mrb[15].mxu1  ;;  %5493 = vmatmul.mubr.msk.f32.gmra.mrb[120].mxu1 %vm204_vm1, %v4757_v54  ;;  %787 = vst.msk [vmem:[#allocation2 + $0x40] sm:$0xff] %vm204_vm1, %v771_v51  ;;  %v515_v62 = vadd.f32 %v492_v61, %v301_v29  ;;  %v560_v1 = vld [vmem:[#allocation2 + $0x58] sm:$0xff]  ;;  %5469 = vmatprep.mubr.msk.f32.mxu0 %vm204_vm1, %v5816_v35  ;;  %v805_v54 = vld [vmem:[#allocation2 + $0xc8] sm:$0xff]  ;;  %v804_v29 = vld [vmem:[#allocation2 + $0xc0] sm:$0xff] }
 0x109   : > { %5495 = vmatprep.mubr.msk.f32.mxu1 %vm204_vm1, %v4758_v57  ;;  %532 = vst.msk [vmem:[#allocation2 + $0x78] sm:$0xff] %vm204_vm1, %v516_v60  ;;  %v774_v44 = vadd.f32 %v5133_v24, %v560_v1  ;;  %v559_v3 = vld [vmem:[#allocation2 + $0x50] sm:$0xff]  ;;  %v4763_v24 = vld [vmem:[%s5664_s5 + $0xe2] sm:$0xff]  ;;  %v807_v1 = vld [vmem:[#allocation2 + $0xd8] sm:$0xff] }
 0x10a   : > { %531 = vst.msk [vmem:[#allocation2 + $0x70] sm:$0xff] %vm204_vm1, %v515_v62  ;;  %v773_v33 = vadd.f32 %v734_v23, %v559_v3  ;;  %v5144_v7 = vpop.f32.mrb[16].mxu0 }
 0x10b   : > { %v5170_v8 = vpop.f32.mrb[16].mxu1  ;;  %790 = vst.msk [vmem:[#allocation2 + $0x58] sm:$0xff] %vm204_vm1, %v774_v44  ;;  %v963_v17 = vadd.f32 %v5144_v7, %v797_v2  ;;  %v883_v9 = vpop.f32.mrb[17].mxu0  ;;  %5470 = vmatmul.mubr.msk.f32.gmra.mrb[122].mxu0 %vm204_vm1, %v5830_v37  ;;  %v4762_v37 = vld [vmem:[%s5664_s5 + $0xda] sm:$0xff]  ;;  %v806_v44 = vld [vmem:[#allocation2 + $0xd0] sm:$0xff]  ;;  %s4388_s5 = sshll.u32 %s5568_s12, 3 }
 0x10c   : > { %v1145_v35 = vpop.f32.mrb[17].mxu1  ;;  %5496 = vmatmul.mubr.msk.f32.gmra.mrb[122].mxu1 %vm204_vm1, %v4759_v15  ;;  %789 = vst.msk [vmem:[#allocation2 + $0x50] sm:$0xff] %vm204_vm1, %v773_v33  ;;  %v562_v45 = vld [vmem:[#allocation2 + $0x68] sm:$0xff]  ;;  %v962_v10 = vadd.f32 %v883_v9, %v796_v4  ;;  %5472 = vmatprep.mubr.msk.f32.mxu0 %vm204_vm1, %v6238_v63  ;;  %p6632_p6 = scmp.lt.s32.totalorder %s4388_s5, 15 }
 0x10d   : > { %5498 = vmatprep.mubr.msk.f32.mxu1 %vm204_vm1, %v6392_v5  ;;  %979 = vst.msk [vmem:[#allocation2 + $0x88] sm:$0xff] %vm204_vm1, %v963_v17  ;;  %v776_v12 = vadd.f32 %v5136_v41, %v562_v45  ;;  %v561_v19 = vld [vmem:[#allocation2 + $0x60] sm:$0xff]  ;;  %v809_v45 = vld [vmem:[#allocation2 + $0xe8] sm:$0xff] }
 0x10e   : > { %978 = vst.msk [vmem:[#allocation2 + $0x80] sm:$0xff] %vm204_vm1, %v962_v10  ;;  %v775_v13 = vadd.f32 %v744_v50, %v561_v19  ;;  %v5147_v14 = vpop.f32.mrb[18].mxu0  ;;  %s7010_s5 = smov (!%p6632_p6, %s4388_s5), 15 }
 0x10f   : > { %v5173_v16 = vpop.f32.mrb[18].mxu1  ;;  %792 = vst.msk [vmem:[#allocation2 + $0x68] sm:$0xff] %vm204_vm1, %v776_v12  ;;  %v965_v18 = vadd.f32 %v5147_v14, %v799_v11  ;;  %v893_v21 = vpop.f32.mrb[19].mxu0  ;;  %5473 = vmatmul.mubr.msk.f32.gmra.mrb[124].mxu0 %vm204_vm1, %v6249_v0  ;;  %v800_v0 = vld [vmem:[#allocation2 + $0xa0] sm:$0xff]  ;;  %s4389_s12 = sshll.u32 %s7010_s5, 2 }
 0x110   : > { %v1155_v63 = vpop.f32.mrb[19].mxu1  ;;  %5499 = vmatmul.mubr.msk.f32.gmra.mrb[124].mxu1 %vm204_vm1, %v6403_v6  ;;  %791 = vst.msk [vmem:[#allocation2 + $0x60] sm:$0xff] %vm204_vm1, %v775_v13  ;;  %v564_v5 = vld [vmem:[#allocation2 + $0x78] sm:$0xff]  ;;  %v964_v20 = vadd.f32 %v893_v21, %v798_v46  ;;  %5475 = vmatprep.mubr.msk.f32.mxu0 %vm204_vm1, %v6466_v22  ;;  %v808_v12 = vld [vmem:[#allocation2 + $0xe0] sm:$0xff]  ;;  %s192_s22 = sadd.s32 %s4390_s21, %s4389_s12 }
 0x111   : > { %5501 = vmatprep.mubr.msk.f32.mxu1 %vm204_vm1, %v4762_v37  ;;  %981 = vst.msk [vmem:[#allocation2 + $0x98] sm:$0xff] %vm204_vm1, %v965_v18  ;;  %v778_v26 = vadd.f32 %v5139_v59, %v564_v5  ;;  %v563_v28 = vld [vmem:[#allocation2 + $0x70] sm:$0xff]  ;;  %s4391_s13 = sshll.u32 %s192_s22, 3 }
 0x112   : > { %980 = vst.msk [vmem:[#allocation2 + $0x90] sm:$0xff] %vm204_vm1, %v964_v20  ;;  %v777_v23 = vadd.f32 %v754_v31, %v563_v28  ;;  %v5150_v6 = vpop.f32.mrb[20].mxu0  ;;  %s6663_s25 = scalar_lea.vmem %s6995_s3, %s4391_s13 }
 0x113   : > { %v5176_v48 = vpop.f32.mrb[20].mxu1  ;;  %794 = vst.msk [vmem:[#allocation2 + $0x78] sm:$0xff] %vm204_vm1, %v778_v26  ;;  %v967_v30 = vadd.f32 %v5150_v6, %v801_v47  ;;  %v903_v32 = vpop.f32.mrb[21].mxu0  ;;  %5476 = vmatmul.mubr.msk.f32.gmra.mrb[126].mxu0 %vm204_vm1, %v6478_v39  ;;  %v810_v47 = vld [vmem:[#allocation2 + $0xf0] sm:$0xff] }
 0x114   : > { %v1165_v22 = vpop.f32.mrb[21].mxu1  ;;  %5502 = vmatmul.mubr.msk.f32.gmra.mrb[126].mxu1 %vm204_vm1, %v4763_v24  ;;  %793 = vst.msk [vmem:[#allocation2 + $0x70] sm:$0xff] %vm204_vm1, %v777_v23  ;;  %v966_v34 = vadd.f32 %v903_v32, %v800_v0  ;;  %v1011_v36 = vld [vmem:[#allocation2 + $0x88] sm:$0xff] }
 0x115   : > { %983 = vst.msk [vmem:[#allocation2 + $0xa8] sm:$0xff] %vm204_vm1, %v967_v30  ;;  %v1225_v38 = vadd.f32 %v5170_v8, %v1011_v36  ;;  %v1010_v49 = vld [vmem:[#allocation2 + $0x80] sm:$0xff]  ;;  %v1523_v32 = vld [vmem:[#allocation2 + $0x108] sm:$0xff] }
 0x116   : > { %982 = vst.msk [vmem:[#allocation2 + $0xa0] sm:$0xff] %vm204_vm1, %v966_v34  ;;  %v1224_v41 = vadd.f32 %v1145_v35, %v1010_v49  ;;  %v5153_v42 = vpop.f32.mrb[22].mxu0  ;;  %v1522_v36 = vld [vmem:[#allocation2 + $0x100] sm:$0xff] }
 0x117   : > { %v5179_v27 = vpop.f32.mrb[22].mxu1  ;;  %1241 = vst.msk [vmem:[#allocation2 + $0x88] sm:$0xff] %vm204_vm1, %v1225_v38  ;;  %v969_v39 = vadd.f32 %v5153_v42, %v803_v25  ;;  %v913_v50 = vpop.f32.mrb[23].mxu0  ;;  %v1276_v38 = vld [vmem:[#allocation2 + $0x8] sm:$0xff]  ;;  %v1275_v42 = vld [vmem:[#allocation2] sm:$0xff] }
 0x118   : > { %v1175_v43 = vpop.f32.mrb[23].mxu1  ;;  %1240 = vst.msk [vmem:[#allocation2 + $0x80] sm:$0xff] %vm204_vm1, %v1224_v41  ;;  %v968_v52 = vadd.f32 %v913_v50, %v802_v40  ;;  %v1013_v53 = vld [vmem:[#allocation2 + $0x98] sm:$0xff] }
 0x119   : > { %985 = vst.msk [vmem:[#allocation2 + $0xb8] sm:$0xff] %vm204_vm1, %v969_v39  ;;  %v1227_v55 = vadd.f32 %v5173_v16, %v1013_v53  ;;  %v1012_v56 = vld [vmem:[#allocation2 + $0x90] sm:$0xff] }
 0x11a   : > { %984 = vst.msk [vmem:[#allocation2 + $0xb0] sm:$0xff] %vm204_vm1, %v968_v52  ;;  %v1226_v57 = vadd.f32 %v1155_v63, %v1012_v56  ;;  %v5156_v51 = vpop.f32.mrb[24].mxu0  ;;  %v811_v63 = vld [vmem:[#allocation2 + $0xf8] sm:$0xff] }
 0x11b   : > { %v5182_v58 = vpop.f32.mrb[24].mxu1  ;;  %1243 = vst.msk [vmem:[#allocation2 + $0x98] sm:$0xff] %vm204_vm1, %v1227_v55  ;;  %v971_v59 = vadd.f32 %v5156_v51, %v805_v54  ;;  %v923_v60 = vpop.f32.mrb[25].mxu0  ;;  %v1525_v54 = vld [vmem:[#allocation2 + $0x118] sm:$0xff] }
 0x11c   : > { %v1185_v61 = vpop.f32.mrb[25].mxu1  ;;  %1242 = vst.msk [vmem:[#allocation2 + $0x90] sm:$0xff] %vm204_vm1, %v1226_v57  ;;  %v970_v31 = vadd.f32 %v923_v60, %v804_v29  ;;  %v1015_v62 = vld [vmem:[#allocation2 + $0xa8] sm:$0xff]  ;;  %v1524_v29 = vld [vmem:[#allocation2 + $0x110] sm:$0xff]  ;;  %v1278_v51 = vld [vmem:[#allocation2 + $0x18] sm:$0xff] }
 0x11d   : > { %987 = vst.msk [vmem:[#allocation2 + $0xc8] sm:$0xff] %vm204_vm1, %v971_v59  ;;  %v1229_v2 = vadd.f32 %v5176_v48, %v1015_v62  ;;  %v1014_v15 = vld [vmem:[#allocation2 + $0xa0] sm:$0xff] }
 0x11e   : > { %986 = vst.msk [vmem:[#allocation2 + $0xc0] sm:$0xff] %vm204_vm1, %v970_v31  ;;  %v1228_v3 = vadd.f32 %v1165_v22, %v1014_v15  ;;  %v5159_v4 = vpop.f32.mrb[26].mxu0 }
 0x11f   : > { %v5185_v33 = vpop.f32.mrb[26].mxu1  ;;  %1245 = vst.msk [vmem:[#allocation2 + $0xa8] sm:$0xff] %vm204_vm1, %v1229_v2  ;;  %v973_v7 = vadd.f32 %v5159_v4, %v807_v1  ;;  %v933_v8 = vpop.f32.mrb[27].mxu0 }
 0x120   : > { %v1195_v17 = vpop.f32.mrb[27].mxu1  ;;  %1244 = vst.msk [vmem:[#allocation2 + $0xa0] sm:$0xff] %vm204_vm1, %v1228_v3  ;;  %v972_v9 = vadd.f32 %v933_v8, %v806_v44  ;;  %v1017_v35 = vld [vmem:[#allocation2 + $0xb8] sm:$0xff]  ;;  %v1527_v3 = vld [vmem:[#allocation2 + $0x128] sm:$0xff] }
 0x121   : > { %989 = vst.msk [vmem:[#allocation2 + $0xd8] sm:$0xff] %vm204_vm1, %v973_v7  ;;  %v1231_v10 = vadd.f32 %v5179_v27, %v1017_v35  ;;  %v1016_v11 = vld [vmem:[#allocation2 + $0xb0] sm:$0xff]  ;;  %v1526_v7 = vld [vmem:[#allocation2 + $0x120] sm:$0xff] }
 0x122   : > { %988 = vst.msk [vmem:[#allocation2 + $0xd0] sm:$0xff] %vm204_vm1, %v972_v9  ;;  %v1230_v19 = vadd.f32 %v1175_v43, %v1016_v11  ;;  %v5162_v46 = vpop.f32.mrb[28].mxu0 }
 0x123   : > { %v5188_v37 = vpop.f32.mrb[28].mxu1  ;;  %1247 = vst.msk [vmem:[#allocation2 + $0xb8] sm:$0xff] %vm204_vm1, %v1231_v10  ;;  %v975_v13 = vadd.f32 %v5162_v46, %v809_v45  ;;  %v943_v14 = vpop.f32.mrb[29].mxu0  ;;  %v1279_v10 = vld [vmem:[#allocation2 + $0x20] sm:$0xff] }
 0x124   : > { %v1205_v16 = vpop.f32.mrb[29].mxu1  ;;  %1246 = vst.msk [vmem:[#allocation2 + $0xb0] sm:$0xff] %vm204_vm1, %v1230_v19  ;;  %v974_v18 = vadd.f32 %v943_v14, %v808_v12  ;;  %v1019_v21 = vld [vmem:[#allocation2 + $0xc8] sm:$0xff]  ;;  %v1528_v14 = vld [vmem:[#allocation2 + $0x130] sm:$0xff] }
 0x125   : > { %991 = vst.msk [vmem:[#allocation2 + $0xe8] sm:$0xff] %vm204_vm1, %v975_v13  ;;  %v1233_v5 = vadd.f32 %v5182_v58, %v1019_v21  ;;  %v1018_v20 = vld [vmem:[#allocation2 + $0xc0] sm:$0xff]  ;;  %v1529_v13 = vld [vmem:[#allocation2 + $0x138] sm:$0xff] }
 0x126   : > { %990 = vst.msk [vmem:[#allocation2 + $0xe0] sm:$0xff] %vm204_vm1, %v974_v18  ;;  %v1232_v24 = vadd.f32 %v1185_v61, %v1018_v20  ;;  %v5165_v26 = vpop.f32.mrb[30].mxu0  ;;  %v1277_v61 = vld [vmem:[#allocation2 + $0x10] sm:$0xff] }
 0x127   : > { %v5191_v28 = vpop.f32.mrb[30].mxu1  ;;  %1249 = vst.msk [vmem:[#allocation2 + $0xc8] sm:$0xff] %vm204_vm1, %v1233_v5  ;;  %v977_v0 = vadd.f32 %v5165_v26, %v811_v63  ;;  %v953_v23 = vpop.f32.mrb[31].mxu0  ;;  %v1281_v5 = vld [vmem:[#allocation2 + $0x30] sm:$0xff] }
 0x128   : > { %v1215_v6 = vpop.f32.mrb[31].mxu1  ;;  %1248 = vst.msk [vmem:[#allocation2 + $0xc0] sm:$0xff] %vm204_vm1, %v1232_v24  ;;  %v976_v48 = vadd.f32 %v953_v23, %v810_v47  ;;  %v1021_v30 = vld [vmem:[#allocation2 + $0xd8] sm:$0xff]  ;;  %v1530_v23 = vld [vmem:[#allocation2 + $0x140] sm:$0xff] }
 0x129   : > { %993 = vst.msk [vmem:[#allocation2 + $0xf8] sm:$0xff] %vm204_vm1, %v977_v0  ;;  %v1235_v22 = vadd.f32 %v5185_v33, %v1021_v30  ;;  %v1020_v34 = vld [vmem:[#allocation2 + $0xd0] sm:$0xff]  ;;  %v1531_v0 = vld [vmem:[#allocation2 + $0x148] sm:$0xff] }
 0x12a   : > { %992 = vst.msk [vmem:[#allocation2 + $0xf0] sm:$0xff] %vm204_vm1, %v976_v48  ;;  %v1234_v25 = vadd.f32 %v1195_v17, %v1020_v34  ;;  %v5196_v49 = vpop.f32.mrb[32].mxu0  ;;  %v1280_v17 = vld [vmem:[#allocation2 + $0x28] sm:$0xff] }
 0x12b   : > { %v5222_v40 = vpop.f32.mrb[32].mxu1  ;;  %1251 = vst.msk [vmem:[#allocation2 + $0xd8] sm:$0xff] %vm204_vm1, %v1235_v22  ;;  %v1490_v41 = vadd.f32 %v5196_v49, %v1276_v38  ;;  %v1410_v27 = vpop.f32.mrb[33].mxu0  ;;  %v1283_v22 = vld [vmem:[#allocation2 + $0x40] sm:$0xff] }
 0x12c   : > { %v1689_v39 = vadd.f32 %v5222_v40, %v1523_v32  ;;  %v1609_v50 = vpop.f32.mrb[33].mxu1  ;;  %1250 = vst.msk [vmem:[#allocation2 + $0xd0] sm:$0xff] %vm204_vm1, %v1234_v25  ;;  %v1023_v43 = vld [vmem:[#allocation2 + $0xe8] sm:$0xff]  ;;  %v1489_v52 = vadd.f32 %v1410_v27, %v1275_v42  ;;  %v1533_v40 = vld [vmem:[#allocation2 + $0x158] sm:$0xff] }
 0x12d   : > { %v1688_v53 = vadd.f32 %v1609_v50, %v1522_v36  ;;  %1506 = vst.msk [vmem:[#allocation2 + $0x8] sm:$0xff] %vm204_vm1, %v1490_v41  ;;  %v1237_v55 = vadd.f32 %v5188_v37, %v1023_v43  ;;  %v1022_v56 = vld [vmem:[#allocation2 + $0xe0] sm:$0xff]  ;;  %v1532_v41 = vld [vmem:[#allocation2 + $0x150] sm:$0xff]  ;;  %v1286_v42 = vld [vmem:[#allocation2 + $0x58] sm:$0xff] }
 0x12e   : > { %1705 = vst.msk [vmem:[#allocation2 + $0x108] sm:$0xff] %vm204_vm1, %v1689_v39  ;;  %1505 = vst.msk [vmem:[#allocation2] sm:$0xff] %vm204_vm1, %v1489_v52  ;;  %v1236_v57 = vadd.f32 %v1205_v16, %v1022_v56  ;;  %v5199_v58 = vpop.f32.mrb[34].mxu0  ;;  %v1282_v16 = vld [vmem:[#allocation2 + $0x38] sm:$0xff]  ;;  %v1285_v43 = vld [vmem:[#allocation2 + $0x50] sm:$0xff] }
 0x12f   : > { %1704 = vst.msk [vmem:[#allocation2 + $0x100] sm:$0xff] %vm204_vm1, %v1688_v53  ;;  %v5225_v59 = vpop.f32.mrb[34].mxu1  ;;  %1253 = vst.msk [vmem:[#allocation2 + $0xe8] sm:$0xff] %vm204_vm1, %v1237_v55  ;;  %v1492_v60 = vadd.f32 %v5199_v58, %v1278_v51  ;;  %v1420_v31 = vpop.f32.mrb[35].mxu0  ;;  %v1288_v51 = vld [vmem:[#allocation2 + $0x68] sm:$0xff] }
 0x130   : > { %v1691_v62 = vadd.f32 %v5225_v59, %v1525_v54  ;;  %v1619_v1 = vpop.f32.mrb[35].mxu1  ;;  %1252 = vst.msk [vmem:[#allocation2 + $0xe0] sm:$0xff] %vm204_vm1, %v1236_v57  ;;  %v1025_v2 = vld [vmem:[#allocation2 + $0xf8] sm:$0xff]  ;;  %v1491_v15 = vadd.f32 %v1420_v31, %v1277_v61  ;;  %v1534_v57 = vld [vmem:[#allocation2 + $0x160] sm:$0xff] }
 0x131   : > { %v1690_v44 = vadd.f32 %v1619_v1, %v1524_v29  ;;  %1508 = vst.msk [vmem:[#allocation2 + $0x18] sm:$0xff] %vm204_vm1, %v1492_v60  ;;  %v1239_v4 = vadd.f32 %v5191_v28, %v1025_v2  ;;  %v1024_v33 = vld [vmem:[#allocation2 + $0xf0] sm:$0xff]  ;;  %v1535_v29 = vld [vmem:[#allocation2 + $0x168] sm:$0xff]  ;;  %v1287_v61 = vld [vmem:[#allocation2 + $0x60] sm:$0xff] }
 0x132   : > { %1707 = vst.msk [vmem:[#allocation2 + $0x118] sm:$0xff] %vm204_vm1, %v1691_v62  ;;  %1507 = vst.msk [vmem:[#allocation2 + $0x10] sm:$0xff] %vm204_vm1, %v1491_v15  ;;  %v1238_v8 = vadd.f32 %v1215_v6, %v1024_v33  ;;  %v5202_v9 = vpop.f32.mrb[36].mxu0  ;;  %v1284_v6 = vld [vmem:[#allocation2 + $0x48] sm:$0xff] }
 0x133   : > { %1706 = vst.msk [vmem:[#allocation2 + $0x110] sm:$0xff] %vm204_vm1, %v1690_v44  ;;  %v5228_v35 = vpop.f32.mrb[36].mxu1  ;;  %1255 = vst.msk [vmem:[#allocation2 + $0xf8] sm:$0xff] %vm204_vm1, %v1239_v4  ;;  %v1494_v45 = vadd.f32 %v5202_v9, %v1280_v17  ;;  %v1430_v11 = vpop.f32.mrb[37].mxu0  ;;  %v1537_v44 = vld [vmem:[#allocation2 + $0x178] sm:$0xff]  ;;  %v1289_v17 = vld [vmem:[#allocation2 + $0x70] sm:$0xff] }
 0x134   : > { %v1693_v12 = vadd.f32 %v5228_v35, %v1527_v3  ;;  %v1629_v19 = vpop.f32.mrb[37].mxu1  ;;  %1254 = vst.msk [vmem:[#allocation2 + $0xf0] sm:$0xff] %vm204_vm1, %v1238_v8  ;;  %v1493_v46 = vadd.f32 %v1430_v11, %v1279_v10  ;;  %v1536_v3 = vld [vmem:[#allocation2 + $0x170] sm:$0xff]  ;;  %v1290_v4 = vld [vmem:[#allocation2 + $0x78] sm:$0xff] }
 0x135   : > { %v1692_v37 = vadd.f32 %v1629_v19, %v1526_v7  ;;  %1510 = vst.msk [vmem:[#allocation2 + $0x28] sm:$0xff] %vm204_vm1, %v1494_v45 }
 0x136   : > { %1709 = vst.msk [vmem:[#allocation2 + $0x128] sm:$0xff] %vm204_vm1, %v1693_v12  ;;  %1509 = vst.msk [vmem:[#allocation2 + $0x20] sm:$0xff] %vm204_vm1, %v1493_v46  ;;  %v5205_v18 = vpop.f32.mrb[38].mxu0  ;;  %v1737_v12 = vld [vmem:[#allocation2 + $0x8] sm:$0xff] }
 0x137   : > { %1708 = vst.msk [vmem:[#allocation2 + $0x120] sm:$0xff] %vm204_vm1, %v1692_v37  ;;  %v5231_v21 = vpop.f32.mrb[38].mxu1  ;;  %v1496_v63 = vadd.f32 %v5205_v18, %v1282_v16  ;;  %v1440_v20 = vpop.f32.mrb[39].mxu0  ;;  %v1983_v46 = vld [vmem:[#allocation2 + $0x88] sm:$0xff]  ;;  %v1736_v16 = vld [vmem:[#allocation2] sm:$0xff] }
 0x138   : > { %v1695_v47 = vadd.f32 %v5231_v21, %v1529_v13  ;;  %v1639_v24 = vpop.f32.mrb[39].mxu1  ;;  %v1495_v26 = vadd.f32 %v1440_v20, %v1281_v5  ;;  %v1982_v21 = vld [vmem:[#allocation2 + $0x80] sm:$0xff] }
 0x139   : > { %v1694_v28 = vadd.f32 %v1639_v24, %v1528_v14  ;;  %1512 = vst.msk [vmem:[#allocation2 + $0x38] sm:$0xff] %vm204_vm1, %v1496_v63 }
 0x13a   : > { %1711 = vst.msk [vmem:[#allocation2 + $0x138] sm:$0xff] %vm204_vm1, %v1695_v47  ;;  %1511 = vst.msk [vmem:[#allocation2 + $0x30] sm:$0xff] %vm204_vm1, %v1495_v26  ;;  %v5208_v48 = vpop.f32.mrb[40].mxu0  ;;  %v1739_v47 = vld [vmem:[#allocation2 + $0x18] sm:$0xff] }
 0x13b   : > { %1710 = vst.msk [vmem:[#allocation2 + $0x130] sm:$0xff] %vm204_vm1, %v1694_v28  ;;  %v5234_v30 = vpop.f32.mrb[40].mxu1  ;;  %v1498_v32 = vadd.f32 %v5208_v48, %v1284_v6  ;;  %v1450_v34 = vpop.f32.mrb[41].mxu0  ;;  %v1985_v26 = vld [vmem:[#allocation2 + $0x98] sm:$0xff]  ;;  %v1738_v6 = vld [vmem:[#allocation2 + $0x10] sm:$0xff] }
 0x13c   : > { %v1697_v36 = vadd.f32 %v5234_v30, %v1531_v0  ;;  %v1649_v25 = vpop.f32.mrb[41].mxu1  ;;  %v1497_v38 = vadd.f32 %v1450_v34, %v1283_v22  ;;  %v1984_v30 = vld [vmem:[#allocation2 + $0x90] sm:$0xff] }
 0x13d   : > { %v1696_v49 = vadd.f32 %v1649_v25, %v1530_v23  ;;  %1514 = vst.msk [vmem:[#allocation2 + $0x48] sm:$0xff] %vm204_vm1, %v1498_v32 }
 0x13e   : > { %1713 = vst.msk [vmem:[#allocation2 + $0x148] sm:$0xff] %vm204_vm1, %v1697_v36  ;;  %1513 = vst.msk [vmem:[#allocation2 + $0x40] sm:$0xff] %vm204_vm1, %v1497_v38  ;;  %v5211_v27 = vpop.f32.mrb[42].mxu0  ;;  %v1741_v36 = vld [vmem:[#allocation2 + $0x28] sm:$0xff] }
 0x13f   : > { %1712 = vst.msk [vmem:[#allocation2 + $0x140] sm:$0xff] %vm204_vm1, %v1696_v49  ;;  %v5237_v39 = vpop.f32.mrb[42].mxu1  ;;  %v1500_v50 = vadd.f32 %v5211_v27, %v1286_v42  ;;  %v1460_v52 = vpop.f32.mrb[43].mxu0  ;;  %v1987_v38 = vld [vmem:[#allocation2 + $0xa8] sm:$0xff]  ;;  %v1740_v42 = vld [vmem:[#allocation2 + $0x20] sm:$0xff] }
 0x140   : > { %v1699_v53 = vadd.f32 %v5237_v39, %v1533_v40  ;;  %v1659_v54 = vpop.f32.mrb[43].mxu1  ;;  %v1499_v55 = vadd.f32 %v1460_v52, %v1285_v43  ;;  %v1986_v39 = vld [vmem:[#allocation2 + $0xa0] sm:$0xff] }
 0x141   : > { %v1698_v56 = vadd.f32 %v1659_v54, %v1532_v41  ;;  %1516 = vst.msk [vmem:[#allocation2 + $0x58] sm:$0xff] %vm204_vm1, %v1500_v50 }
 0x142   : > { %1715 = vst.msk [vmem:[#allocation2 + $0x158] sm:$0xff] %vm204_vm1, %v1699_v53  ;;  %1515 = vst.msk [vmem:[#allocation2 + $0x50] sm:$0xff] %vm204_vm1, %v1499_v55  ;;  %v5214_v58 = vpop.f32.mrb[44].mxu0  ;;  %v1743_v55 = vld [vmem:[#allocation2 + $0x38] sm:$0xff] }
 0x143   : > { %1714 = vst.msk [vmem:[#allocation2 + $0x150] sm:$0xff] %vm204_vm1, %v1698_v56  ;;  %v5240_v59 = vpop.f32.mrb[44].mxu1  ;;  %v1502_v60 = vadd.f32 %v5214_v58, %v1288_v51  ;;  %v1470_v31 = vpop.f32.mrb[45].mxu0 }
 0x144   : > { %v1701_v62 = vadd.f32 %v5240_v59, %v1535_v29  ;;  %v1669_v1 = vpop.f32.mrb[45].mxu1  ;;  %v1501_v2 = vadd.f32 %v1470_v31, %v1287_v61  ;;  %v1989_v29 = vld [vmem:[#allocation2 + $0xb8] sm:$0xff]  ;;  %v1742_v59 = vld [vmem:[#allocation2 + $0x30] sm:$0xff] }
 0x145   : > { %v1700_v15 = vadd.f32 %v1669_v1, %v1534_v57  ;;  %1518 = vst.msk [vmem:[#allocation2 + $0x68] sm:$0xff] %vm204_vm1, %v1502_v60  ;;  %v1988_v61 = vld [vmem:[#allocation2 + $0xb0] sm:$0xff] }
 0x146   : > { %1717 = vst.msk [vmem:[#allocation2 + $0x168] sm:$0xff] %vm204_vm1, %v1701_v62  ;;  %1517 = vst.msk [vmem:[#allocation2 + $0x60] sm:$0xff] %vm204_vm1, %v1501_v2  ;;  %v5217_v33 = vpop.f32.mrb[46].mxu0 }
 0x147   : > { %1716 = vst.msk [vmem:[#allocation2 + $0x160] sm:$0xff] %vm204_vm1, %v1700_v15  ;;  %v5243_v7 = vpop.f32.mrb[46].mxu1  ;;  %v1504_v8 = vadd.f32 %v5217_v33, %v1290_v4  ;;  %v1480_v9 = vpop.f32.mrb[47].mxu0  ;;  %v1991_v4 = vld [vmem:[#allocation2 + $0xc8] sm:$0xff] }
 0x148   : > { %v1703_v35 = vadd.f32 %v5243_v7, %v1537_v44  ;;  %v1679_v45 = vpop.f32.mrb[47].mxu1  ;;  %v1503_v10 = vadd.f32 %v1480_v9, %v1289_v17  ;;  %v1745_v44 = vld [vmem:[#allocation2 + $0x48] sm:$0xff]  ;;  %v1744_v17 = vld [vmem:[#allocation2 + $0x40] sm:$0xff] }
 0x149   : > { %v1702_v11 = vadd.f32 %v1679_v45, %v1536_v3  ;;  %1520 = vst.msk [vmem:[#allocation2 + $0x78] sm:$0xff] %vm204_vm1, %v1504_v8 }
 0x14a   : > { %1719 = vst.msk [vmem:[#allocation2 + $0x178] sm:$0xff] %vm204_vm1, %v1703_v35  ;;  %1519 = vst.msk [vmem:[#allocation2 + $0x70] sm:$0xff] %vm204_vm1, %v1503_v10  ;;  %v5248_v19 = vpop.f32.mrb[48].mxu0  ;;  %v1990_v35 = vld [vmem:[#allocation2 + $0xc0] sm:$0xff] }
 0x14b   : > { %1718 = vst.msk [vmem:[#allocation2 + $0x170] sm:$0xff] %vm204_vm1, %v1702_v11  ;;  %v5274_v37 = vpop.f32.mrb[48].mxu1  ;;  %v1951_v13 = vadd.f32 %v5248_v19, %v1737_v12  ;;  %v1871_v18 = vpop.f32.mrb[49].mxu0 }
 0x14c   : > { %v2149_v14 = vadd.f32 %v5274_v37, %v1983_v46  ;;  %v2069_v63 = vpop.f32.mrb[49].mxu1  ;;  %v1950_v5 = vadd.f32 %v1871_v18, %v1736_v16  ;;  %v1747_v46 = vld [vmem:[#allocation2 + $0x58] sm:$0xff] }
 0x14d   : > { %v2148_v20 = vadd.f32 %v2069_v63, %v1982_v21  ;;  %1967 = vst.msk [vmem:[#allocation2 + $0x8] sm:$0xff] %vm204_vm1, %v1951_v13  ;;  %v1993_v13 = vld [vmem:[#allocation2 + $0xd8] sm:$0xff]  ;;  %v1746_v21 = vld [vmem:[#allocation2 + $0x50] sm:$0xff] }
 0x14e   : > { %2165 = vst.msk [vmem:[#allocation2 + $0x88] sm:$0xff] %vm204_vm1, %v2149_v14  ;;  %1966 = vst.msk [vmem:[#allocation2] sm:$0xff] %vm204_vm1, %v1950_v5  ;;  %v5251_v24 = vpop.f32.mrb[50].mxu0  ;;  %v1992_v5 = vld [vmem:[#allocation2 + $0xd0] sm:$0xff] }
 0x14f   : > { %2164 = vst.msk [vmem:[#allocation2 + $0x80] sm:$0xff] %vm204_vm1, %v2148_v20  ;;  %v5277_v28 = vpop.f32.mrb[50].mxu1  ;;  %v1953_v0 = vadd.f32 %v5251_v24, %v1739_v47  ;;  %v1881_v48 = vpop.f32.mrb[51].mxu0 }
 0x150   : > { %v2151_v23 = vadd.f32 %v5277_v28, %v1985_v26  ;;  %v2079_v32 = vpop.f32.mrb[51].mxu1  ;;  %v1952_v22 = vadd.f32 %v1881_v48, %v1738_v6  ;;  %v1995_v6 = vld [vmem:[#allocation2 + $0xe8] sm:$0xff] }
 0x151   : > { %v2150_v34 = vadd.f32 %v2079_v32, %v1984_v30  ;;  %1969 = vst.msk [vmem:[#allocation2 + $0x18] sm:$0xff] %vm204_vm1, %v1953_v0  ;;  %v1749_v0 = vld [vmem:[#allocation2 + $0x68] sm:$0xff] }
 0x152   : > { %2167 = vst.msk [vmem:[#allocation2 + $0x98] sm:$0xff] %vm204_vm1, %v2151_v23  ;;  %1968 = vst.msk [vmem:[#allocation2 + $0x10] sm:$0xff] %vm204_vm1, %v1952_v22  ;;  %v5254_v25 = vpop.f32.mrb[52].mxu0  ;;  %v1748_v22 = vld [vmem:[#allocation2 + $0x60] sm:$0xff] }
 0x153   : > { %2166 = vst.msk [vmem:[#allocation2 + $0x90] sm:$0xff] %vm204_vm1, %v2150_v34  ;;  %v5280_v49 = vpop.f32.mrb[52].mxu1  ;;  %v1955_v40 = vadd.f32 %v5254_v25, %v1741_v36  ;;  %v1891_v27 = vpop.f32.mrb[53].mxu0  ;;  %v1994_v36 = vld [vmem:[#allocation2 + $0xe0] sm:$0xff] }
 0x154   : > { %v2153_v41 = vadd.f32 %v5280_v49, %v1987_v38  ;;  %v2089_v50 = vpop.f32.mrb[53].mxu1  ;;  %v1954_v43 = vadd.f32 %v1891_v27, %v1740_v42  ;;  %v4025_v53 = vld [vmem:[#allocation2 + $0x8] sm:$0xff]  ;;  %v1751_v42 = vld [vmem:[#allocation2 + $0x78] sm:$0xff] }
 0x155   : > { %v2152_v52 = vadd.f32 %v2089_v50, %v1986_v39  ;;  %1971 = vst.msk [vmem:[#allocation2 + $0x28] sm:$0xff] %vm204_vm1, %v1955_v40  ;;  %4041 = vst.msk [vmem:[%s6663_s25 + $0x8] sm:$0xff] %vm204_vm1, %v4025_v53  ;;  %v4024_v54 = vld [vmem:[#allocation2] sm:$0xff]  ;;  %v1997_v39 = vld [vmem:[#allocation2 + $0xf8] sm:$0xff] }
 0x156   : > { %2169 = vst.msk [vmem:[#allocation2 + $0xa8] sm:$0xff] %vm204_vm1, %v2153_v41  ;;  %1970 = vst.msk [vmem:[#allocation2 + $0x20] sm:$0xff] %vm204_vm1, %v1954_v43  ;;  %v5257_v56 = vpop.f32.mrb[54].mxu0  ;;  %v1750_v53 = vld [vmem:[#allocation2 + $0x70] sm:$0xff] }
 0x157   : > { %2168 = vst.msk [vmem:[#allocation2 + $0xa0] sm:$0xff] %vm204_vm1, %v2152_v52  ;;  %v5283_v57 = vpop.f32.mrb[54].mxu1  ;;  %4040 = vst.msk [vmem:[%s6663_s25] sm:$0xff] %vm204_vm1, %v4024_v54  ;;  %v1957_v51 = vadd.f32 %v5257_v56, %v1743_v55  ;;  %v1901_v60 = vpop.f32.mrb[55].mxu0  ;;  %v1996_v55 = vld [vmem:[#allocation2 + $0xf0] sm:$0xff] }
 0x158   : > { %v2155_v58 = vadd.f32 %v5283_v57, %v1989_v29  ;;  %v2099_v31 = vpop.f32.mrb[55].mxu1  ;;  %v1956_v62 = vadd.f32 %v1901_v60, %v1742_v59  ;;  %v4027_v2 = vld [vmem:[#allocation2 + $0x18] sm:$0xff]  ;;  %v2379_v59 = vld [vmem:[#allocation2 + $0x180] sm:$0xff] }
 0x159   : > { %v2154_v1 = vadd.f32 %v2099_v31, %v1988_v61  ;;  %1973 = vst.msk [vmem:[#allocation2 + $0x38] sm:$0xff] %vm204_vm1, %v1957_v51  ;;  %4043 = vst.msk [vmem:[%s6663_s25 + $0x28] sm:$0xff] %vm204_vm1, %v4027_v2  ;;  %v4026_v15 = vld [vmem:[#allocation2 + $0x10] sm:$0xff]  ;;  %v2380_v51 = vld [vmem:[#allocation2 + $0x188] sm:$0xff] }
 0x15a   : > { %2171 = vst.msk [vmem:[#allocation2 + $0xb8] sm:$0xff] %vm204_vm1, %v2155_v58  ;;  %1972 = vst.msk [vmem:[#allocation2 + $0x30] sm:$0xff] %vm204_vm1, %v1956_v62  ;;  %v5260_v3 = vpop.f32.mrb[56].mxu0  ;;  %v2181_v61 = vld [vmem:[#allocation2 + $0x108] sm:$0xff]  ;;  %v2180_v2 = vld [vmem:[#allocation2 + $0x100] sm:$0xff] }
 0x15b   : > { %2170 = vst.msk [vmem:[#allocation2 + $0xb0] sm:$0xff] %vm204_vm1, %v2154_v1  ;;  %v5286_v33 = vpop.f32.mrb[56].mxu1  ;;  %4042 = vst.msk [vmem:[%s6663_s25 + $0x20] sm:$0xff] %vm204_vm1, %v4026_v15  ;;  %v1959_v7 = vadd.f32 %v5260_v3, %v1745_v44  ;;  %v1911_v9 = vpop.f32.mrb[57].mxu0 }
 0x15c   : > { %v2157_v8 = vadd.f32 %v5286_v33, %v1991_v4  ;;  %v2109_v45 = vpop.f32.mrb[57].mxu1  ;;  %v1958_v10 = vadd.f32 %v1911_v9, %v1744_v17  ;;  %v4029_v12 = vld [vmem:[#allocation2 + $0x28] sm:$0xff]  ;;  %v2381_v17 = vld [vmem:[#allocation2 + $0x190] sm:$0xff] }
 0x15d   : > { %v2156_v11 = vadd.f32 %v2109_v45, %v1990_v35  ;;  %1975 = vst.msk [vmem:[#allocation2 + $0x48] sm:$0xff] %vm204_vm1, %v1959_v7  ;;  %v4028_v19 = vld [vmem:[#allocation2 + $0x20] sm:$0xff]  ;;  %4045 = vst.msk [vmem:[%s6663_s25 + $0x48] sm:$0xff] %vm204_vm1, %v4029_v12  ;;  %v2382_v7 = vld [vmem:[#allocation2 + $0x198] sm:$0xff] }
 0x15e   : > { %2173 = vst.msk [vmem:[#allocation2 + $0xc8] sm:$0xff] %vm204_vm1, %v2157_v8  ;;  %1974 = vst.msk [vmem:[#allocation2 + $0x40] sm:$0xff] %vm204_vm1, %v1958_v10  ;;  %v5263_v37 = vpop.f32.mrb[58].mxu0  ;;  %v2183_v35 = vld [vmem:[#allocation2 + $0x118] sm:$0xff]  ;;  %v2182_v12 = vld [vmem:[#allocation2 + $0x110] sm:$0xff] }
 0x15f   : > { %2172 = vst.msk [vmem:[#allocation2 + $0xc0] sm:$0xff] %vm204_vm1, %v2156_v11  ;;  %v5289_v14 = vpop.f32.mrb[58].mxu1  ;;  %4044 = vst.msk [vmem:[%s6663_s25 + $0x40] sm:$0xff] %vm204_vm1, %v4028_v19  ;;  %v1961_v16 = vadd.f32 %v5263_v37, %v1747_v46  ;;  %v1921_v63 = vpop.f32.mrb[59].mxu0 }
 0x160   : > { %v2159_v18 = vadd.f32 %v5289_v14, %v1993_v13  ;;  %v2119_v20 = vpop.f32.mrb[59].mxu1  ;;  %v1960_v47 = vadd.f32 %v1921_v63, %v1746_v21  ;;  %v4031_v26 = vld [vmem:[#allocation2 + $0x38] sm:$0xff]  ;;  %v2383_v21 = vld [vmem:[#allocation2 + $0x1a0] sm:$0xff] }
 0x161   : > { %v2158_v24 = vadd.f32 %v2119_v20, %v1992_v5  ;;  %1977 = vst.msk [vmem:[#allocation2 + $0x58] sm:$0xff] %vm204_vm1, %v1961_v16  ;;  %v4030_v28 = vld [vmem:[#allocation2 + $0x30] sm:$0xff]  ;;  %4047 = vst.msk [vmem:[%s6663_s25 + $0x68] sm:$0xff] %vm204_vm1, %v4031_v26  ;;  %v2384_v16 = vld [vmem:[#allocation2 + $0x1a8] sm:$0xff] }
 0x162   : > { %2175 = vst.msk [vmem:[#allocation2 + $0xd8] sm:$0xff] %vm204_vm1, %v2159_v18  ;;  %1976 = vst.msk [vmem:[#allocation2 + $0x50] sm:$0xff] %vm204_vm1, %v1960_v47  ;;  %v5266_v23 = vpop.f32.mrb[60].mxu0  ;;  %v2185_v5 = vld [vmem:[#allocation2 + $0x128] sm:$0xff]  ;;  %v2184_v26 = vld [vmem:[#allocation2 + $0x120] sm:$0xff] }
 0x163   : > { %2174 = vst.msk [vmem:[#allocation2 + $0xd0] sm:$0xff] %vm204_vm1, %v2158_v24  ;;  %v5292_v48 = vpop.f32.mrb[60].mxu1  ;;  %4046 = vst.msk [vmem:[%s6663_s25 + $0x60] sm:$0xff] %vm204_vm1, %v4030_v28  ;;  %v1963_v30 = vadd.f32 %v5266_v23, %v1749_v0  ;;  %v1931_v34 = vpop.f32.mrb[61].mxu0 }
 0x164   : > { %v2161_v32 = vadd.f32 %v5292_v48, %v1995_v6  ;;  %v2129_v25 = vpop.f32.mrb[61].mxu1  ;;  %v1962_v38 = vadd.f32 %v1931_v34, %v1748_v22  ;;  %v4033_v40 = vld [vmem:[#allocation2 + $0x48] sm:$0xff]  ;;  %v2187_v22 = vld [vmem:[#allocation2 + $0x138] sm:$0xff] }
 0x165   : > { %v2160_v49 = vadd.f32 %v2129_v25, %v1994_v36  ;;  %1979 = vst.msk [vmem:[#allocation2 + $0x68] sm:$0xff] %vm204_vm1, %v1963_v30  ;;  %v4032_v41 = vld [vmem:[#allocation2 + $0x40] sm:$0xff]  ;;  %4049 = vst.msk [vmem:[%s6663_s25 + $0x88] sm:$0xff] %vm204_vm1, %v4033_v40  ;;  %v2386_v30 = vld [vmem:[#allocation2 + $0x1b8] sm:$0xff] }
 0x166   : > { %2177 = vst.msk [vmem:[#allocation2 + $0xe8] sm:$0xff] %vm204_vm1, %v2161_v32  ;;  %1978 = vst.msk [vmem:[#allocation2 + $0x60] sm:$0xff] %vm204_vm1, %v1962_v38  ;;  %v5269_v27 = vpop.f32.mrb[62].mxu0  ;;  %v2385_v32 = vld [vmem:[#allocation2 + $0x1b0] sm:$0xff] }
 0x167   : > { %2176 = vst.msk [vmem:[#allocation2 + $0xe0] sm:$0xff] %vm204_vm1, %v2160_v49  ;;  %v5295_v50 = vpop.f32.mrb[62].mxu1  ;;  %4048 = vst.msk [vmem:[%s6663_s25 + $0x80] sm:$0xff] %vm204_vm1, %v4032_v41  ;;  %v1965_v43 = vadd.f32 %v5269_v27, %v1751_v42  ;;  %v1941_v54 = vpop.f32.mrb[63].mxu0  ;;  %v2186_v38 = vld [vmem:[#allocation2 + $0x130] sm:$0xff] }
 0x168   : > { %v2163_v52 = vadd.f32 %v5295_v50, %v1997_v39  ;;  %v2139_v56 = vpop.f32.mrb[63].mxu1  ;;  %v1964_v29 = vadd.f32 %v1941_v54, %v1750_v53  ;;  %v4035_v58 = vld [vmem:[#allocation2 + $0x58] sm:$0xff]  ;;  %v2388_v39 = vld [vmem:[#allocation2 + $0x1c8] sm:$0xff]  ;;  %v2387_v50 = vld [vmem:[#allocation2 + $0x1c0] sm:$0xff] }
 0x169   : > { %v2162_v57 = vadd.f32 %v2139_v56, %v1996_v55  ;;  %1981 = vst.msk [vmem:[#allocation2 + $0x78] sm:$0xff] %vm204_vm1, %v1965_v43  ;;  %v4034_v60 = vld [vmem:[#allocation2 + $0x50] sm:$0xff]  ;;  %4051 = vst.msk [vmem:[%s6663_s25 + $0xa8] sm:$0xff] %vm204_vm1, %v4035_v58  ;;  %v2189_v43 = vld [vmem:[#allocation2 + $0x148] sm:$0xff] }
 0x16a   : > { %2179 = vst.msk [vmem:[#allocation2 + $0xf8] sm:$0xff] %vm204_vm1, %v2163_v52  ;;  %1980 = vst.msk [vmem:[#allocation2 + $0x70] sm:$0xff] %vm204_vm1, %v1964_v29  ;;  %v5300_v31 = vpop.f32.mrb[64].mxu0  ;;  %v2188_v55 = vld [vmem:[#allocation2 + $0x140] sm:$0xff] }
 0x16b   : > { %2178 = vst.msk [vmem:[#allocation2 + $0xf0] sm:$0xff] %vm204_vm1, %v2162_v57  ;;  %v5326_v62 = vpop.f32.mrb[64].mxu1  ;;  %4050 = vst.msk [vmem:[%s6663_s25 + $0xa0] sm:$0xff] %vm204_vm1, %v4034_v60  ;;  %v2347_v1 = vadd.f32 %v5300_v31, %v2181_v61  ;;  %v2267_v15 = vpop.f32.mrb[65].mxu0  ;;  %v2389_v60 = vld [vmem:[#allocation2 + $0x1d0] sm:$0xff]  ;;  %v2191_v61 = vld [vmem:[#allocation2 + $0x158] sm:$0xff] }
 0x16c   : > { %v2546_v44 = vadd.f32 %v5326_v62, %v2380_v51  ;;  %v2466_v3 = vpop.f32.mrb[65].mxu1  ;;  %v2346_v4 = vadd.f32 %v2267_v15, %v2180_v2  ;;  %v4037_v8 = vld [vmem:[#allocation2 + $0x68] sm:$0xff]  ;;  %v2190_v2 = vld [vmem:[#allocation2 + $0x150] sm:$0xff] }
 0x16d   : > { %v2545_v33 = vadd.f32 %v2466_v3, %v2379_v59  ;;  %2363 = vst.msk [vmem:[#allocation2 + $0x108] sm:$0xff] %vm204_vm1, %v2347_v1  ;;  %v4036_v9 = vld [vmem:[#allocation2 + $0x60] sm:$0xff]  ;;  %4053 = vst.msk [vmem:[%s6663_s25 + $0xc8] sm:$0xff] %vm204_vm1, %v4037_v8  ;;  %v2390_v59 = vld [vmem:[#allocation2 + $0x1d8] sm:$0xff] }
 0x16e   : > { %2562 = vst.msk [vmem:[#allocation2 + $0x188] sm:$0xff] %vm204_vm1, %v2546_v44  ;;  %2362 = vst.msk [vmem:[#allocation2 + $0x100] sm:$0xff] %vm204_vm1, %v2346_v4  ;;  %v5303_v45 = vpop.f32.mrb[66].mxu0  ;;  %v2391_v8 = vld [vmem:[#allocation2 + $0x1e0] sm:$0xff] }
 0x16f   : > { %2561 = vst.msk [vmem:[#allocation2 + $0x180] sm:$0xff] %vm204_vm1, %v2545_v33  ;;  %v5329_v10 = vpop.f32.mrb[66].mxu1  ;;  %4052 = vst.msk [vmem:[%s6663_s25 + $0xc0] sm:$0xff] %vm204_vm1, %v4036_v9  ;;  %v2349_v11 = vadd.f32 %v5303_v45, %v2183_v35  ;;  %v2277_v19 = vpop.f32.mrb[67].mxu0 }
 0x170   : > { %v2548_v46 = vadd.f32 %v5329_v10, %v2382_v7  ;;  %v2476_v37 = vpop.f32.mrb[67].mxu1  ;;  %v2348_v13 = vadd.f32 %v2277_v19, %v2182_v12  ;;  %v4039_v18 = vld [vmem:[#allocation2 + $0x78] sm:$0xff]  ;;  %v2392_v7 = vld [vmem:[#allocation2 + $0x1e8] sm:$0xff]  ;;  %v2192_v10 = vld [vmem:[#allocation2 + $0x160] sm:$0xff] }
 0x171   : > { %v2547_v14 = vadd.f32 %v2476_v37, %v2381_v17  ;;  %2365 = vst.msk [vmem:[#allocation2 + $0x118] sm:$0xff] %vm204_vm1, %v2349_v11  ;;  %v4038_v63 = vld [vmem:[#allocation2 + $0x70] sm:$0xff]  ;;  %4055 = vst.msk [vmem:[%s6663_s25 + $0xe8] sm:$0xff] %vm204_vm1, %v4039_v18  ;;  %v2193_v17 = vld [vmem:[#allocation2 + $0x168] sm:$0xff] }
 0x172   : > { %2564 = vst.msk [vmem:[#allocation2 + $0x198] sm:$0xff] %vm204_vm1, %v2548_v46  ;;  %2364 = vst.msk [vmem:[#allocation2 + $0x110] sm:$0xff] %vm204_vm1, %v2348_v13  ;;  %v5306_v20 = vpop.f32.mrb[68].mxu0  ;;  %v2394_v13 = vld [vmem:[#allocation2 + $0x1f8] sm:$0xff] }
 0x173   : > { %2563 = vst.msk [vmem:[#allocation2 + $0x190] sm:$0xff] %vm204_vm1, %v2547_v14  ;;  %v5332_v47 = vpop.f32.mrb[68].mxu1  ;;  %4054 = vst.msk [vmem:[%s6663_s25 + $0xe0] sm:$0xff] %vm204_vm1, %v4038_v63  ;;  %v2351_v24 = vadd.f32 %v5306_v20, %v2185_v5  ;;  %v2287_v28 = vpop.f32.mrb[69].mxu0  ;;  %v2393_v14 = vld [vmem:[#allocation2 + $0x1f0] sm:$0xff] }
 0x174   : > { %v2550_v0 = vadd.f32 %v5332_v47, %v2384_v16  ;;  %v2486_v23 = vpop.f32.mrb[69].mxu1  ;;  %v2350_v6 = vadd.f32 %v2287_v28, %v2184_v26  ;;  %v2195_v16 = vld [vmem:[#allocation2 + $0x178] sm:$0xff]  ;;  %v2194_v5 = vld [vmem:[#allocation2 + $0x170] sm:$0xff] }
 0x175   : > { %v2549_v48 = vadd.f32 %v2486_v23, %v2383_v21  ;;  %2367 = vst.msk [vmem:[#allocation2 + $0x128] sm:$0xff] %vm204_vm1, %v2351_v24 }
 0x176   : > { %2566 = vst.msk [vmem:[#allocation2 + $0x1a8] sm:$0xff] %vm204_vm1, %v2550_v0  ;;  %2366 = vst.msk [vmem:[#allocation2 + $0x120] sm:$0xff] %vm204_vm1, %v2350_v6  ;;  %v5309_v34 = vpop.f32.mrb[70].mxu0  ;;  %v2594_v0 = vld [vmem:[#allocation2 + $0x88] sm:$0xff] }
 0x177   : > { %2565 = vst.msk [vmem:[#allocation2 + $0x1a0] sm:$0xff] %vm204_vm1, %v2549_v48  ;;  %v5335_v36 = vpop.f32.mrb[70].mxu1  ;;  %v2353_v25 = vadd.f32 %v5309_v34, %v2187_v22  ;;  %v2297_v49 = vpop.f32.mrb[71].mxu0  ;;  %v2840_v6 = vld [vmem:[#allocation2 + $0x188] sm:$0xff]  ;;  %v2593_v22 = vld [vmem:[#allocation2 + $0x80] sm:$0xff] }
 0x178   : > { %v2552_v40 = vadd.f32 %v5335_v36, %v2386_v30  ;;  %v2496_v41 = vpop.f32.mrb[71].mxu1  ;;  %v2352_v42 = vadd.f32 %v2297_v49, %v2186_v38  ;;  %v2839_v36 = vld [vmem:[#allocation2 + $0x180] sm:$0xff] }
 0x179   : > { %v2551_v27 = vadd.f32 %v2496_v41, %v2385_v32  ;;  %2369 = vst.msk [vmem:[#allocation2 + $0x138] sm:$0xff] %vm204_vm1, %v2353_v25 }
 0x17a   : > { %2568 = vst.msk [vmem:[#allocation2 + $0x1b8] sm:$0xff] %vm204_vm1, %v2552_v40  ;;  %2368 = vst.msk [vmem:[#allocation2 + $0x130] sm:$0xff] %vm204_vm1, %v2352_v42  ;;  %v5312_v52 = vpop.f32.mrb[72].mxu0  ;;  %v2596_v40 = vld [vmem:[#allocation2 + $0x98] sm:$0xff] }
 0x17b   : > { %2567 = vst.msk [vmem:[#allocation2 + $0x1b0] sm:$0xff] %vm204_vm1, %v2551_v27  ;;  %v5338_v53 = vpop.f32.mrb[72].mxu1  ;;  %v2355_v54 = vadd.f32 %v5312_v52, %v2189_v43  ;;  %v2307_v56 = vpop.f32.mrb[73].mxu0  ;;  %v2842_v42 = vld [vmem:[#allocation2 + $0x198] sm:$0xff]  ;;  %v2595_v43 = vld [vmem:[#allocation2 + $0x90] sm:$0xff] }
 0x17c   : > { %v2554_v29 = vadd.f32 %v5338_v53, %v2388_v39  ;;  %v2506_v57 = vpop.f32.mrb[73].mxu1  ;;  %v2354_v51 = vadd.f32 %v2307_v56, %v2188_v55  ;;  %v2841_v53 = vld [vmem:[#allocation2 + $0x190] sm:$0xff] }
 0x17d   : > { %v2553_v58 = vadd.f32 %v2506_v57, %v2387_v50  ;;  %2371 = vst.msk [vmem:[#allocation2 + $0x148] sm:$0xff] %vm204_vm1, %v2355_v54 }
 0x17e   : > { %2570 = vst.msk [vmem:[#allocation2 + $0x1c8] sm:$0xff] %vm204_vm1, %v2554_v29  ;;  %2370 = vst.msk [vmem:[#allocation2 + $0x140] sm:$0xff] %vm204_vm1, %v2354_v51  ;;  %v5315_v31 = vpop.f32.mrb[74].mxu0  ;;  %v2598_v29 = vld [vmem:[#allocation2 + $0xa8] sm:$0xff] }
 0x17f   : > { %2569 = vst.msk [vmem:[#allocation2 + $0x1c0] sm:$0xff] %vm204_vm1, %v2553_v58  ;;  %v5341_v62 = vpop.f32.mrb[74].mxu1  ;;  %v2357_v1 = vadd.f32 %v5315_v31, %v2191_v61  ;;  %v2317_v15 = vpop.f32.mrb[75].mxu0  ;;  %v2844_v51 = vld [vmem:[#allocation2 + $0x1a8] sm:$0xff]  ;;  %v2597_v61 = vld [vmem:[#allocation2 + $0xa0] sm:$0xff] }
 0x180   : > { %v2556_v44 = vadd.f32 %v5341_v62, %v2390_v59  ;;  %v2516_v3 = vpop.f32.mrb[75].mxu1  ;;  %v2356_v4 = vadd.f32 %v2317_v15, %v2190_v2  ;;  %v2843_v62 = vld [vmem:[#allocation2 + $0x1a0] sm:$0xff] }
 0x181   : > { %v2555_v33 = vadd.f32 %v2516_v3, %v2389_v60  ;;  %2373 = vst.msk [vmem:[#allocation2 + $0x158] sm:$0xff] %vm204_vm1, %v2357_v1  ;;  %v2600_v3 = vld [vmem:[#allocation2 + $0xb8] sm:$0xff] }
 0x182   : > { %2572 = vst.msk [vmem:[#allocation2 + $0x1d8] sm:$0xff] %vm204_vm1, %v2556_v44  ;;  %2372 = vst.msk [vmem:[#allocation2 + $0x150] sm:$0xff] %vm204_vm1, %v2356_v4  ;;  %v5318_v9 = vpop.f32.mrb[76].mxu0 }
 0x183   : > { %2571 = vst.msk [vmem:[#allocation2 + $0x1d0] sm:$0xff] %vm204_vm1, %v2555_v33  ;;  %v5344_v35 = vpop.f32.mrb[76].mxu1  ;;  %v2359_v45 = vadd.f32 %v5318_v9, %v2193_v17  ;;  %v2327_v11 = vpop.f32.mrb[77].mxu0  ;;  %v2846_v33 = vld [vmem:[#allocation2 + $0x1b8] sm:$0xff]  ;;  %v2599_v9 = vld [vmem:[#allocation2 + $0xb0] sm:$0xff] }
 0x184   : > { %v2558_v12 = vadd.f32 %v5344_v35, %v2392_v7  ;;  %v2526_v19 = vpop.f32.mrb[77].mxu1  ;;  %v2358_v46 = vadd.f32 %v2327_v11, %v2192_v10 }
 0x185   : > { %v2557_v37 = vadd.f32 %v2526_v19, %v2391_v8  ;;  %2375 = vst.msk [vmem:[#allocation2 + $0x168] sm:$0xff] %vm204_vm1, %v2359_v45  ;;  %v2845_v45 = vld [vmem:[#allocation2 + $0x1b0] sm:$0xff] }
 0x186   : > { %2574 = vst.msk [vmem:[#allocation2 + $0x1e8] sm:$0xff] %vm204_vm1, %v2558_v12  ;;  %2374 = vst.msk [vmem:[#allocation2 + $0x160] sm:$0xff] %vm204_vm1, %v2358_v46  ;;  %v5321_v18 = vpop.f32.mrb[78].mxu0 }
 0x187   : > { %2573 = vst.msk [vmem:[#allocation2 + $0x1e0] sm:$0xff] %vm204_vm1, %v2557_v37  ;;  %v5347_v21 = vpop.f32.mrb[78].mxu1  ;;  %v2361_v63 = vadd.f32 %v5321_v18, %v2195_v16  ;;  %v2337_v20 = vpop.f32.mrb[79].mxu0  ;;  %v2602_v37 = vld [vmem:[#allocation2 + $0xc8] sm:$0xff] }
 0x188   : > { %v2560_v47 = vadd.f32 %v5347_v21, %v2394_v13  ;;  %v2536_v24 = vpop.f32.mrb[79].mxu1  ;;  %v2360_v26 = vadd.f32 %v2337_v20, %v2194_v5  ;;  %v2847_v20 = vld [vmem:[#allocation2 + $0x1c0] sm:$0xff] }
 0x189   : > { %v2559_v28 = vadd.f32 %v2536_v24, %v2393_v14  ;;  %2377 = vst.msk [vmem:[#allocation2 + $0x178] sm:$0xff] %vm204_vm1, %v2361_v63  ;;  %v2848_v14 = vld [vmem:[#allocation2 + $0x1c8] sm:$0xff]  ;;  %v2601_v63 = vld [vmem:[#allocation2 + $0xc0] sm:$0xff] }
 0x18a   : > { %2576 = vst.msk [vmem:[#allocation2 + $0x1f8] sm:$0xff] %vm204_vm1, %v2560_v47  ;;  %2376 = vst.msk [vmem:[#allocation2 + $0x170] sm:$0xff] %vm204_vm1, %v2360_v26  ;;  %v5352_v23 = vpop.f32.mrb[80].mxu0 }
 0x18b   : > { %2575 = vst.msk [vmem:[#allocation2 + $0x1f0] sm:$0xff] %vm204_vm1, %v2559_v28  ;;  %v5378_v48 = vpop.f32.mrb[80].mxu1  ;;  %v2808_v30 = vadd.f32 %v5352_v23, %v2594_v0  ;;  %v2728_v34 = vpop.f32.mrb[81].mxu0  ;;  %v2850_v23 = vld [vmem:[#allocation2 + $0x1d8] sm:$0xff] }
 0x18c   : > { %v3006_v32 = vadd.f32 %v5378_v48, %v2840_v6  ;;  %v2926_v25 = vpop.f32.mrb[81].mxu1  ;;  %v2807_v38 = vadd.f32 %v2728_v34, %v2593_v22  ;;  %v2604_v48 = vld [vmem:[#allocation2 + $0xd8] sm:$0xff]  ;;  %v2603_v34 = vld [vmem:[#allocation2 + $0xd0] sm:$0xff] }
 0x18d   : > { %v3005_v49 = vadd.f32 %v2926_v25, %v2839_v36  ;;  %2824 = vst.msk [vmem:[#allocation2 + $0x88] sm:$0xff] %vm204_vm1, %v2808_v30  ;;  %v2849_v25 = vld [vmem:[#allocation2 + $0x1d0] sm:$0xff] }
 0x18e   : > { %3022 = vst.msk [vmem:[#allocation2 + $0x188] sm:$0xff] %vm204_vm1, %v3006_v32  ;;  %2823 = vst.msk [vmem:[#allocation2 + $0x80] sm:$0xff] %vm204_vm1, %v2807_v38  ;;  %v5355_v41 = vpop.f32.mrb[82].mxu0 }
 0x18f   : > { %3021 = vst.msk [vmem:[#allocation2 + $0x180] sm:$0xff] %vm204_vm1, %v3005_v49  ;;  %v5381_v27 = vpop.f32.mrb[82].mxu1  ;;  %v2810_v39 = vadd.f32 %v5355_v41, %v2596_v40  ;;  %v2738_v52 = vpop.f32.mrb[83].mxu0 }
 0x190   : > { %v3008_v50 = vadd.f32 %v5381_v27, %v2842_v42  ;;  %v2936_v54 = vpop.f32.mrb[83].mxu1  ;;  %v2809_v55 = vadd.f32 %v2738_v52, %v2595_v43  ;;  %v2852_v27 = vld [vmem:[#allocation2 + $0x1e8] sm:$0xff] }
 0x191   : > { %v3007_v56 = vadd.f32 %v2936_v54, %v2841_v53  ;;  %2826 = vst.msk [vmem:[#allocation2 + $0x98] sm:$0xff] %vm204_vm1, %v2810_v39  ;;  %v2605_v54 = vld [vmem:[#allocation2 + $0xe0] sm:$0xff] }
 0x192   : > { %3024 = vst.msk [vmem:[#allocation2 + $0x198] sm:$0xff] %vm204_vm1, %v3008_v50  ;;  %2825 = vst.msk [vmem:[#allocation2 + $0x90] sm:$0xff] %vm204_vm1, %v2809_v55  ;;  %v5358_v57 = vpop.f32.mrb[84].mxu0  ;;  %v2606_v50 = vld [vmem:[#allocation2 + $0xe8] sm:$0xff] }
 0x193   : > { %3023 = vst.msk [vmem:[#allocation2 + $0x190] sm:$0xff] %vm204_vm1, %v3007_v56  ;;  %v5384_v58 = vpop.f32.mrb[84].mxu1  ;;  %v2812_v59 = vadd.f32 %v5358_v57, %v2598_v29  ;;  %v2748_v31 = vpop.f32.mrb[85].mxu0  ;;  %v2851_v56 = vld [vmem:[#allocation2 + $0x1e0] sm:$0xff] }
 0x194   : > { %v3010_v60 = vadd.f32 %v5384_v58, %v2844_v51  ;;  %v2946_v1 = vpop.f32.mrb[85].mxu1  ;;  %v2811_v2 = vadd.f32 %v2748_v31, %v2597_v61  ;;  %v4057_v44 = vld [vmem:[#allocation2 + $0x88] sm:$0xff]  ;;  %v2608_v31 = vld [vmem:[#allocation2 + $0xf8] sm:$0xff] }
 0x195   : > { %v3009_v15 = vadd.f32 %v2946_v1, %v2843_v62  ;;  %2828 = vst.msk [vmem:[#allocation2 + $0xa8] sm:$0xff] %vm204_vm1, %v2812_v59  ;;  %4090 = vrot.lane.b32.xlu0 %v4057_v44, %s5586_s26  ;;  %v4056_v19 = vld [vmem:[#allocation2 + $0x80] sm:$0xff] }
 0x196   : > { %3026 = vst.msk [vmem:[#allocation2 + $0x1a8] sm:$0xff] %vm204_vm1, %v3010_v60  ;;  %2827 = vst.msk [vmem:[#allocation2 + $0xa0] sm:$0xff] %vm204_vm1, %v2811_v2  ;;  %v5361_v4 = vpop.f32.mrb[86].mxu0  ;;  %v2854_v60 = vld [vmem:[#allocation2 + $0x1f8] sm:$0xff] }
 0x197   : > { %3025 = vst.msk [vmem:[#allocation2 + $0x1a0] sm:$0xff] %vm204_vm1, %v3009_v15  ;;  %v5387_v7 = vpop.f32.mrb[86].mxu1  ;;  %v2814_v8 = vadd.f32 %v5361_v4, %v2600_v3  ;;  %v2758_v35 = vpop.f32.mrb[87].mxu0  ;;  %v2607_v15 = vld [vmem:[#allocation2 + $0xf0] sm:$0xff] }
 0x198   : > { %v3012_v17 = vadd.f32 %v5387_v7, %v2846_v33  ;;  %v2956_v10 = vpop.f32.mrb[87].mxu1  ;;  %v2813_v11 = vadd.f32 %v2758_v35, %v2599_v9  ;;  %v4059_v46 = vld [vmem:[#allocation2 + $0x98] sm:$0xff]  ;;  %v2853_v3 = vld [vmem:[#allocation2 + $0x1f0] sm:$0xff]  ;;  %v3057_v9 = vld [vmem:[#allocation2 + $0x108] sm:$0xff] }
 0x199   : > { %v3011_v12 = vadd.f32 %v2956_v10, %v2845_v45  ;;  %2830 = vst.msk [vmem:[#allocation2 + $0xb8] sm:$0xff] %vm204_vm1, %v2814_v8  ;;  %4088 = vrot.lane.b32.xlu0 %v4056_v19, %s5586_s26  ;;  %4094 = vrot.lane.b32.xlu1 %v4059_v46, %s5586_s26  ;;  %v4058_v28 = vld [vmem:[#allocation2 + $0x90] sm:$0xff] }
 0x19a   : > { %3028 = vst.msk [vmem:[#allocation2 + $0x1b8] sm:$0xff] %vm204_vm1, %v3012_v17  ;;  %2829 = vst.msk [vmem:[#allocation2 + $0xb0] sm:$0xff] %vm204_vm1, %v2813_v11  ;;  %v5364_v13 = vpop.f32.mrb[88].mxu0  ;;  %v3056_v11 = vld [vmem:[#allocation2 + $0x100] sm:$0xff] }
 0x19b   : > { %3027 = vst.msk [vmem:[#allocation2 + $0x1b0] sm:$0xff] %vm204_vm1, %v3011_v12  ;;  %v5390_v16 = vpop.f32.mrb[88].mxu1  ;;  %v2816_v18 = vadd.f32 %v5364_v13, %v2602_v37  ;;  %v2768_v5 = vpop.f32.mrb[89].mxu0 }
 0x19c   : > { %v3014_v21 = vadd.f32 %v5390_v16, %v2848_v14  ;;  %v2966_v47 = vpop.f32.mrb[89].mxu1  ;;  %v2815_v24 = vadd.f32 %v2768_v5, %v2601_v63  ;;  %v4061_v41 = vld [vmem:[#allocation2 + $0xa8] sm:$0xff]  ;;  %v3059_v14 = vld [vmem:[#allocation2 + $0x118] sm:$0xff]  ;;  %v3058_v63 = vld [vmem:[#allocation2 + $0x110] sm:$0xff] }
 0x19d   : > { %v3013_v26 = vadd.f32 %v2966_v47, %v2847_v20  ;;  %2832 = vst.msk [vmem:[#allocation2 + $0xc8] sm:$0xff] %vm204_vm1, %v2816_v18  ;;  %4092 = vrot.lane.b32.xlu1 %v4058_v28, %s5586_s26  ;;  %v4060_v0 = vld [vmem:[#allocation2 + $0xa0] sm:$0xff]  ;;  %v3061_v28 = vld [vmem:[#allocation2 + $0x128] sm:$0xff] }
 0x19e   : > { %3030 = vst.msk [vmem:[#allocation2 + $0x1c8] sm:$0xff] %vm204_vm1, %v3014_v21  ;;  %2831 = vst.msk [vmem:[#allocation2 + $0xc0] sm:$0xff] %vm204_vm1, %v2815_v24  ;;  %4096 = vrot.lane.b32.xlu0 %v4060_v0, %s5586_s26  ;;  %v5367_v30 = vpop.f32.mrb[90].mxu0 }
 0x19f   : > { %3029 = vst.msk [vmem:[#allocation2 + $0x1c0] sm:$0xff] %vm204_vm1, %v3013_v26  ;;  %v5393_v6 = vpop.f32.mrb[90].mxu1  ;;  %v2818_v22 = vadd.f32 %v5367_v30, %v2604_v48  ;;  %v2778_v36 = vpop.f32.mrb[91].mxu0  ;;  %v3060_v48 = vld [vmem:[#allocation2 + $0x120] sm:$0xff] }
 0x1a0   : > { %v3016_v32 = vadd.f32 %v5393_v6, %v2850_v23  ;;  %v2976_v38 = vpop.f32.mrb[91].mxu1  ;;  %v2817_v49 = vadd.f32 %v2778_v36, %v2603_v34  ;;  %v4063_v58 = vld [vmem:[#allocation2 + $0xb8] sm:$0xff] }
 0x1a1   : > { %v3015_v40 = vadd.f32 %v2976_v38, %v2849_v25  ;;  %2834 = vst.msk [vmem:[#allocation2 + $0xd8] sm:$0xff] %vm204_vm1, %v2818_v22  ;;  %4098 = vrot.lane.b32.xlu1 %v4061_v41, %s5586_s26  ;;  %v4062_v42 = vld [vmem:[#allocation2 + $0xb0] sm:$0xff] }
 0x1a2   : > { %3032 = vst.msk [vmem:[#allocation2 + $0x1d8] sm:$0xff] %vm204_vm1, %v3016_v32  ;;  %2833 = vst.msk [vmem:[#allocation2 + $0xd0] sm:$0xff] %vm204_vm1, %v2817_v49  ;;  %4100 = vrot.lane.b32.xlu0 %v4062_v42, %s5586_s26  ;;  %v5370_v43 = vpop.f32.mrb[92].mxu0 }
 0x1a3   : > { %3031 = vst.msk [vmem:[#allocation2 + $0x1d0] sm:$0xff] %vm204_vm1, %v3015_v40  ;;  %v5396_v39 = vpop.f32.mrb[92].mxu1  ;;  %v2820_v53 = vadd.f32 %v5370_v43, %v2606_v50  ;;  %v2788_v55 = vpop.f32.mrb[93].mxu0  ;;  %v3063_v40 = vld [vmem:[#allocation2 + $0x138] sm:$0xff] }
 0x1a4   : > { %v3018_v52 = vadd.f32 %v5396_v39, %v2852_v27  ;;  %v2986_v29 = vpop.f32.mrb[93].mxu1  ;;  %v2819_v57 = vadd.f32 %v2788_v55, %v2605_v54  ;;  %v4065_v8 = vld [vmem:[#allocation2 + $0xc8] sm:$0xff]  ;;  %v3062_v39 = vld [vmem:[#allocation2 + $0x130] sm:$0xff] }
 0x1a5   : > { %v3017_v51 = vadd.f32 %v2986_v29, %v2851_v56  ;;  %2836 = vst.msk [vmem:[#allocation2 + $0xe8] sm:$0xff] %vm204_vm1, %v2820_v53  ;;  %4102 = vrot.lane.b32.xlu1 %v4063_v58, %s5586_s26  ;;  %v4064_v59 = vld [vmem:[#allocation2 + $0xc0] sm:$0xff]  ;;  %v3065_v29 = vld [vmem:[#allocation2 + $0x148] sm:$0xff] }
 0x1a6   : > { %3034 = vst.msk [vmem:[#allocation2 + $0x1e8] sm:$0xff] %vm204_vm1, %v3018_v52  ;;  %2835 = vst.msk [vmem:[#allocation2 + $0xe0] sm:$0xff] %vm204_vm1, %v2819_v57  ;;  %4104 = vrot.lane.b32.xlu0 %v4064_v59, %s5586_s26  ;;  %v5373_v62 = vpop.f32.mrb[94].mxu0  ;;  %v3064_v59 = vld [vmem:[#allocation2 + $0x140] sm:$0xff] }
 0x1a7   : > { %3033 = vst.msk [vmem:[#allocation2 + $0x1e0] sm:$0xff] %vm204_vm1, %v3017_v51  ;;  %v5399_v61 = vpop.f32.mrb[94].mxu1  ;;  %v2822_v2 = vadd.f32 %v5373_v62, %v2608_v31  ;;  %v2798_v44 = vpop.f32.mrb[95].mxu0 }
 0x1a8   : > { %v3020_v1 = vadd.f32 %v5399_v61, %v2854_v60  ;;  %v2996_v4 = vpop.f32.mrb[95].mxu1  ;;  %v2821_v33 = vadd.f32 %v2798_v44, %v2607_v15  ;;  %v4067_v37 = vld [vmem:[#allocation2 + $0xd8] sm:$0xff] }
 0x1a9   : > { %v3019_v7 = vadd.f32 %v2996_v4, %v2853_v3  ;;  %2838 = vst.msk [vmem:[#allocation2 + $0xf8] sm:$0xff] %vm204_vm1, %v2822_v2  ;;  %4106 = vrot.lane.b32.xlu1 %v4065_v8, %s5586_s26  ;;  %v4066_v17 = vld [vmem:[#allocation2 + $0xd0] sm:$0xff]  ;;  %v3067_v44 = vld [vmem:[#allocation2 + $0x158] sm:$0xff] }
 0x1aa   : > { %3036 = vst.msk [vmem:[#allocation2 + $0x1f8] sm:$0xff] %vm204_vm1, %v3020_v1  ;;  %2837 = vst.msk [vmem:[#allocation2 + $0xf0] sm:$0xff] %vm204_vm1, %v2821_v33  ;;  %4108 = vrot.lane.b32.xlu0 %v4066_v17, %s5586_s26  ;;  %v5404_v35 = vpop.f32.mrb[96].mxu0  ;;  %v3066_v8 = vld [vmem:[#allocation2 + $0x150] sm:$0xff] }
 0x1ab   : > { %3035 = vst.msk [vmem:[#allocation2 + $0x1f0] sm:$0xff] %vm204_vm1, %v3019_v7  ;;  %v5430_v45 = vpop.f32.mrb[96].mxu1  ;;  %v3271_v10 = vadd.f32 %v5404_v35, %v3057_v9  ;;  %v3191_v12 = vpop.f32.mrb[97].mxu0 }
 0x1ac   : > { %v3453_v19 = vpop.f32.mrb[97].mxu1  ;;  %v3270_v46 = vadd.f32 %v3191_v12, %v3056_v11  ;;  %v4069_v24 = vld [vmem:[#allocation2 + $0xe8] sm:$0xff] }
 0x1ad   : > { %3287 = vst.msk [vmem:[#allocation2 + $0x108] sm:$0xff] %vm204_vm1, %v3271_v10  ;;  %4110 = vrot.lane.b32.xlu1 %v4067_v37, %s5586_s26  ;;  %v4068_v13 = vld [vmem:[#allocation2 + $0xe0] sm:$0xff] }
 0x1ae   : > { %3286 = vst.msk [vmem:[#allocation2 + $0x100] sm:$0xff] %vm204_vm1, %v3270_v46  ;;  %4112 = vrot.lane.b32.xlu0 %v4068_v13, %s5586_s26  ;;  %v5407_v16 = vpop.f32.mrb[98].mxu0  ;;  %v3069_v46 = vld [vmem:[#allocation2 + $0x168] sm:$0xff] }
 0x1af   : > { %v5433_v18 = vpop.f32.mrb[98].mxu1  ;;  %v3273_v21 = vadd.f32 %v5407_v16, %v3059_v14  ;;  %v3201_v5 = vpop.f32.mrb[99].mxu0 }
 0x1b0   : > { %v3463_v20 = vpop.f32.mrb[99].mxu1  ;;  %v3272_v47 = vadd.f32 %v3201_v5, %v3058_v63  ;;  %v4071_v36 = vld [vmem:[#allocation2 + $0xf8] sm:$0xff] }
 0x1b1   : > { %3289 = vst.msk [vmem:[#allocation2 + $0x118] sm:$0xff] %vm204_vm1, %v3273_v21  ;;  %4114 = vrot.lane.b32.xlu1 %v4069_v24, %s5586_s26  ;;  %v4070_v26 = vld [vmem:[#allocation2 + $0xf0] sm:$0xff] }
 0x1b2   : > { %3288 = vst.msk [vmem:[#allocation2 + $0x110] sm:$0xff] %vm204_vm1, %v3272_v47  ;;  %v5410_v0 = vpop.f32.mrb[100].mxu0  ;;  %4116 = vrot.lane.b32.xlu0 %v4070_v26, %s5586_s26 }
 0x1b3   : > { %v5436_v23 = vpop.f32.mrb[100].mxu1  ;;  %v3275_v6 = vadd.f32 %v5410_v0, %v3061_v28  ;;  %v3211_v30 = vpop.f32.mrb[101].mxu0  ;;  %v3071_v0 = vld [vmem:[#allocation2 + $0x178] sm:$0xff] }
 0x1b4   : > { %v3473_v32 = vpop.f32.mrb[101].mxu1  ;;  %v3274_v22 = vadd.f32 %v3211_v30, %v3060_v48  ;;  %v3319_v34 = vld [vmem:[#allocation2 + $0x108] sm:$0xff] }
 0x1b5   : > { %3291 = vst.msk [vmem:[#allocation2 + $0x128] sm:$0xff] %vm204_vm1, %v3275_v6  ;;  %v3533_v25 = vadd.f32 %v5430_v45, %v3319_v34  ;;  %v3318_v38 = vld [vmem:[#allocation2 + $0x100] sm:$0xff]  ;;  %4118 = vrot.lane.b32.xlu1 %v4071_v36, %s5586_s26 }
 0x1b6   : > { %3290 = vst.msk [vmem:[#allocation2 + $0x120] sm:$0xff] %vm204_vm1, %v3274_v22  ;;  %v3532_v49 = vadd.f32 %v3453_v19, %v3318_v38  ;;  %v5413_v41 = vpop.f32.mrb[102].mxu0 }
 0x1b7   : > { %v5439_v42 = vpop.f32.mrb[102].mxu1  ;;  %3549 = vst.msk [vmem:[#allocation2 + $0x108] sm:$0xff] %vm204_vm1, %v3533_v25  ;;  %v3277_v27 = vadd.f32 %v5413_v41, %v3063_v40  ;;  %v3221_v50 = vpop.f32.mrb[103].mxu0 }
 0x1b8   : > { %v3483_v43 = vpop.f32.mrb[103].mxu1  ;;  %3548 = vst.msk [vmem:[#allocation2 + $0x100] sm:$0xff] %vm204_vm1, %v3532_v49  ;;  %v3276_v52 = vadd.f32 %v3221_v50, %v3062_v39  ;;  %v3321_v53 = vld [vmem:[#allocation2 + $0x118] sm:$0xff] }
 0x1b9   : > { %3293 = vst.msk [vmem:[#allocation2 + $0x138] sm:$0xff] %vm204_vm1, %v3277_v27  ;;  %v3535_v54 = vadd.f32 %v5433_v18, %v3321_v53  ;;  %v3320_v55 = vld [vmem:[#allocation2 + $0x110] sm:$0xff]  ;;  %v3068_v18 = vld [vmem:[#allocation2 + $0x160] sm:$0xff] }
 0x1ba   : > { %3292 = vst.msk [vmem:[#allocation2 + $0x130] sm:$0xff] %vm204_vm1, %v3276_v52  ;;  %v3534_v56 = vadd.f32 %v3463_v20, %v3320_v55  ;;  %v5416_v57 = vpop.f32.mrb[104].mxu0  ;;  %v3564_v52 = vld [vmem:[#allocation2 + $0x180] sm:$0xff] }
 0x1bb   : > { %v5442_v51 = vpop.f32.mrb[104].mxu1  ;;  %3551 = vst.msk [vmem:[#allocation2 + $0x118] sm:$0xff] %vm204_vm1, %v3535_v54  ;;  %v3279_v58 = vadd.f32 %v5416_v57, %v3065_v29  ;;  %v3231_v60 = vpop.f32.mrb[105].mxu0 }
 0x1bc   : > { %v3493_v61 = vpop.f32.mrb[105].mxu1  ;;  %3550 = vst.msk [vmem:[#allocation2 + $0x110] sm:$0xff] %vm204_vm1, %v3534_v56  ;;  %v3278_v31 = vadd.f32 %v3231_v60, %v3064_v59  ;;  %v3323_v62 = vld [vmem:[#allocation2 + $0x128] sm:$0xff]  ;;  %v3567_v59 = vld [vmem:[#allocation2 + $0x198] sm:$0xff] }
 0x1bd   : > { %3295 = vst.msk [vmem:[#allocation2 + $0x148] sm:$0xff] %vm204_vm1, %v3279_v58  ;;  %v3537_v1 = vadd.f32 %v5436_v23, %v3323_v62  ;;  %v3322_v2 = vld [vmem:[#allocation2 + $0x120] sm:$0xff] }
 0x1be   : > { %3294 = vst.msk [vmem:[#allocation2 + $0x140] sm:$0xff] %vm204_vm1, %v3278_v31  ;;  %v3536_v15 = vadd.f32 %v3473_v32, %v3322_v2  ;;  %v5419_v3 = vpop.f32.mrb[106].mxu0  ;;  %v4154_v33 = vld [vmem:[#allocation2 + $0x108] sm:$0xff]  ;;  %v3070_v32 = vld [vmem:[#allocation2 + $0x170] sm:$0xff] }
 0x1bf   : > { %v5445_v4 = vpop.f32.mrb[106].mxu1  ;;  %3553 = vst.msk [vmem:[#allocation2 + $0x128] sm:$0xff] %vm204_vm1, %v3537_v1  ;;  %v3281_v7 = vadd.f32 %v5419_v3, %v3067_v44  ;;  %v3241_v17 = vpop.f32.mrb[107].mxu0  ;;  %4783 = vst.msk [vmem:[%s6663_s25 + $0x18] sm:$0xff] %vm204_vm1, %v4154_v33  ;;  %v4153_v35 = vld [vmem:[#allocation2 + $0x100] sm:$0xff]  ;;  %v3566_v1 = vld [vmem:[#allocation2 + $0x190] sm:$0xff] }
 0x1c0   : > { %v3503_v9 = vpop.f32.mrb[107].mxu1  ;;  %3552 = vst.msk [vmem:[#allocation2 + $0x120] sm:$0xff] %vm204_vm1, %v3536_v15  ;;  %v3280_v45 = vadd.f32 %v3241_v17, %v3066_v8  ;;  %v3325_v10 = vld [vmem:[#allocation2 + $0x138] sm:$0xff]  ;;  %4782 = vst.msk [vmem:[%s6663_s25 + $0x10] sm:$0xff] %vm204_vm1, %v4153_v35  ;;  %v3569_v17 = vld [vmem:[#allocation2 + $0x1a8] sm:$0xff] }
 0x1c1   : > { %3297 = vst.msk [vmem:[#allocation2 + $0x158] sm:$0xff] %vm204_vm1, %v3281_v7  ;;  %v3539_v11 = vadd.f32 %v5439_v42, %v3325_v10  ;;  %v3324_v12 = vld [vmem:[#allocation2 + $0x130] sm:$0xff]  ;;  %v3565_v42 = vld [vmem:[#allocation2 + $0x188] sm:$0xff] }
 0x1c2   : > { %3296 = vst.msk [vmem:[#allocation2 + $0x150] sm:$0xff] %vm204_vm1, %v3280_v45  ;;  %v3538_v19 = vadd.f32 %v3483_v43, %v3324_v12  ;;  %v5422_v37 = vpop.f32.mrb[108].mxu0  ;;  %v4156_v14 = vld [vmem:[#allocation2 + $0x118] sm:$0xff] }
 0x1c3   : > { %v5448_v13 = vpop.f32.mrb[108].mxu1  ;;  %3555 = vst.msk [vmem:[#allocation2 + $0x138] sm:$0xff] %vm204_vm1, %v3539_v11  ;;  %v3283_v16 = vadd.f32 %v5422_v37, %v3069_v46  ;;  %v3251_v21 = vpop.f32.mrb[109].mxu0  ;;  %4785 = vst.msk [vmem:[%s6663_s25 + $0x38] sm:$0xff] %vm204_vm1, %v4156_v14  ;;  %v4155_v5 = vld [vmem:[#allocation2 + $0x110] sm:$0xff]  ;;  %v3568_v11 = vld [vmem:[#allocation2 + $0x1a0] sm:$0xff] }
 0x1c4   : > { %v3513_v63 = vpop.f32.mrb[109].mxu1  ;;  %3554 = vst.msk [vmem:[#allocation2 + $0x130] sm:$0xff] %vm204_vm1, %v3538_v19  ;;  %v3282_v20 = vadd.f32 %v3251_v21, %v3068_v18  ;;  %v3327_v47 = vld [vmem:[#allocation2 + $0x148] sm:$0xff]  ;;  %4784 = vst.msk [vmem:[%s6663_s25 + $0x30] sm:$0xff] %vm204_vm1, %v4155_v5  ;;  %v3571_v21 = vld [vmem:[#allocation2 + $0x1b8] sm:$0xff] }
 0x1c5   : > { %3299 = vst.msk [vmem:[#allocation2 + $0x168] sm:$0xff] %vm204_vm1, %v3283_v16  ;;  %v3541_v24 = vadd.f32 %v5442_v51, %v3327_v47  ;;  %v3326_v26 = vld [vmem:[#allocation2 + $0x140] sm:$0xff] }
 0x1c6   : > { %3298 = vst.msk [vmem:[#allocation2 + $0x160] sm:$0xff] %vm204_vm1, %v3282_v20  ;;  %v3540_v28 = vadd.f32 %v3493_v61, %v3326_v26  ;;  %v5425_v23 = vpop.f32.mrb[110].mxu0  ;;  %v4158_v48 = vld [vmem:[#allocation2 + $0x128] sm:$0xff] }
 0x1c7   : > { %v5451_v6 = vpop.f32.mrb[110].mxu1  ;;  %3557 = vst.msk [vmem:[#allocation2 + $0x148] sm:$0xff] %vm204_vm1, %v3541_v24  ;;  %v3285_v30 = vadd.f32 %v5425_v23, %v3071_v0  ;;  %v3261_v22 = vpop.f32.mrb[111].mxu0  ;;  %4787 = vst.msk [vmem:[%s6663_s25 + $0x58] sm:$0xff] %vm204_vm1, %v4158_v48  ;;  %v4157_v36 = vld [vmem:[#allocation2 + $0x120] sm:$0xff]  ;;  %v3570_v24 = vld [vmem:[#allocation2 + $0x1b0] sm:$0xff] }
 0x1c8   : > { %v3523_v34 = vpop.f32.mrb[111].mxu1  ;;  %3556 = vst.msk [vmem:[#allocation2 + $0x140] sm:$0xff] %vm204_vm1, %v3540_v28  ;;  %v3284_v25 = vadd.f32 %v3261_v22, %v3070_v32  ;;  %v3329_v38 = vld [vmem:[#allocation2 + $0x158] sm:$0xff]  ;;  %4786 = vst.msk [vmem:[%s6663_s25 + $0x50] sm:$0xff] %vm204_vm1, %v4157_v36  ;;  %v3573_v22 = vld [vmem:[#allocation2 + $0x1c8] sm:$0xff] }
 0x1c9   : > { %3301 = vst.msk [vmem:[#allocation2 + $0x178] sm:$0xff] %vm204_vm1, %v3285_v30  ;;  %v3543_v49 = vadd.f32 %v5445_v4, %v3329_v38  ;;  %v3328_v40 = vld [vmem:[#allocation2 + $0x150] sm:$0xff] }
 0x1ca   : > { %3300 = vst.msk [vmem:[#allocation2 + $0x170] sm:$0xff] %vm204_vm1, %v3284_v25  ;;  %v3542_v41 = vadd.f32 %v3503_v9, %v3328_v40  ;;  %v5456_v27 = vpop.f32.mrb[112].mxu0  ;;  %v4160_v50 = vld [vmem:[#allocation2 + $0x138] sm:$0xff] }
 0x1cb   : > { %v5482_v39 = vpop.f32.mrb[112].mxu1  ;;  %3559 = vst.msk [vmem:[#allocation2 + $0x158] sm:$0xff] %vm204_vm1, %v3543_v49  ;;  %v3731_v43 = vadd.f32 %v5456_v27, %v3565_v42  ;;  %v3651_v53 = vpop.f32.mrb[113].mxu0  ;;  %4789 = vst.msk [vmem:[%s6663_s25 + $0x78] sm:$0xff] %vm204_vm1, %v4160_v50  ;;  %v4159_v55 = vld [vmem:[#allocation2 + $0x130] sm:$0xff]  ;;  %v3572_v49 = vld [vmem:[#allocation2 + $0x1c0] sm:$0xff] }
 0x1cc   : > { %v3913_v54 = vpop.f32.mrb[113].mxu1  ;;  %3558 = vst.msk [vmem:[#allocation2 + $0x150] sm:$0xff] %vm204_vm1, %v3542_v41  ;;  %v3331_v56 = vld [vmem:[#allocation2 + $0x168] sm:$0xff]  ;;  %v3730_v29 = vadd.f32 %v3651_v53, %v3564_v52  ;;  %4788 = vst.msk [vmem:[%s6663_s25 + $0x70] sm:$0xff] %vm204_vm1, %v4159_v55  ;;  %v3575_v53 = vld [vmem:[#allocation2 + $0x1d8] sm:$0xff] }
 0x1cd   : > { %3747 = vst.msk [vmem:[#allocation2 + $0x188] sm:$0xff] %vm204_vm1, %v3731_v43  ;;  %v3545_v57 = vadd.f32 %v5448_v13, %v3331_v56  ;;  %v3330_v51 = vld [vmem:[#allocation2 + $0x160] sm:$0xff] }
 0x1ce   : > { %3746 = vst.msk [vmem:[#allocation2 + $0x180] sm:$0xff] %vm204_vm1, %v3730_v29  ;;  %v3544_v58 = vadd.f32 %v3513_v63, %v3330_v51  ;;  %v5459_v60 = vpop.f32.mrb[114].mxu0  ;;  %v4162_v31 = vld [vmem:[#allocation2 + $0x148] sm:$0xff] }
 0x1cf   : > { %v5485_v61 = vpop.f32.mrb[114].mxu1  ;;  %3561 = vst.msk [vmem:[#allocation2 + $0x168] sm:$0xff] %vm204_vm1, %v3545_v57  ;;  %v3733_v62 = vadd.f32 %v5459_v60, %v3567_v59  ;;  %v3661_v2 = vpop.f32.mrb[115].mxu0  ;;  %4791 = vst.msk [vmem:[%s6663_s25 + $0x98] sm:$0xff] %vm204_vm1, %v4162_v31  ;;  %v4161_v44 = vld [vmem:[#allocation2 + $0x140] sm:$0xff]  ;;  %v3574_v57 = vld [vmem:[#allocation2 + $0x1d0] sm:$0xff] }
 0x1d0   : > { %v3923_v15 = vpop.f32.mrb[115].mxu1  ;;  %3560 = vst.msk [vmem:[#allocation2 + $0x160] sm:$0xff] %vm204_vm1, %v3544_v58  ;;  %v3333_v3 = vld [vmem:[#allocation2 + $0x178] sm:$0xff]  ;;  %v3732_v4 = vadd.f32 %v3661_v2, %v3566_v1  ;;  %4790 = vst.msk [vmem:[%s6663_s25 + $0x90] sm:$0xff] %vm204_vm1, %v4161_v44  ;;  %v3577_v2 = vld [vmem:[#allocation2 + $0x1e8] sm:$0xff] }
 0x1d1   : > { %3749 = vst.msk [vmem:[#allocation2 + $0x198] sm:$0xff] %vm204_vm1, %v3733_v62  ;;  %v3547_v33 = vadd.f32 %v5451_v6, %v3333_v3  ;;  %v3332_v7 = vld [vmem:[#allocation2 + $0x170] sm:$0xff] }
 0x1d2   : > { %3748 = vst.msk [vmem:[#allocation2 + $0x190] sm:$0xff] %vm204_vm1, %v3732_v4  ;;  %v3546_v8 = vadd.f32 %v3523_v34, %v3332_v7  ;;  %v5462_v9 = vpop.f32.mrb[116].mxu0  ;;  %v4164_v45 = vld [vmem:[#allocation2 + $0x158] sm:$0xff] }
 0x1d3   : > { %v5488_v35 = vpop.f32.mrb[116].mxu1  ;;  %3563 = vst.msk [vmem:[#allocation2 + $0x178] sm:$0xff] %vm204_vm1, %v3547_v33  ;;  %v3735_v10 = vadd.f32 %v5462_v9, %v3569_v17  ;;  %v3671_v12 = vpop.f32.mrb[117].mxu0  ;;  %4793 = vst.msk [vmem:[%s6663_s25 + $0xb8] sm:$0xff] %vm204_vm1, %v4164_v45  ;;  %v4163_v46 = vld [vmem:[#allocation2 + $0x150] sm:$0xff]  ;;  %v3576_v33 = vld [vmem:[#allocation2 + $0x1e0] sm:$0xff] }
 0x1d4   : > { %v3933_v19 = vpop.f32.mrb[117].mxu1  ;;  %3562 = vst.msk [vmem:[#allocation2 + $0x170] sm:$0xff] %vm204_vm1, %v3546_v8  ;;  %v3734_v37 = vadd.f32 %v3671_v12, %v3568_v11  ;;  %v3779_v13 = vld [vmem:[#allocation2 + $0x188] sm:$0xff]  ;;  %4792 = vst.msk [vmem:[%s6663_s25 + $0xb0] sm:$0xff] %vm204_vm1, %v4163_v46  ;;  %v3579_v12 = vld [vmem:[#allocation2 + $0x1f8] sm:$0xff] }
 0x1d5   : > { %3751 = vst.msk [vmem:[#allocation2 + $0x1a8] sm:$0xff] %vm204_vm1, %v3735_v10  ;;  %v3993_v14 = vadd.f32 %v5482_v39, %v3779_v13  ;;  %v3778_v16 = vld [vmem:[#allocation2 + $0x180] sm:$0xff] }
 0x1d6   : > { %3750 = vst.msk [vmem:[#allocation2 + $0x1a0] sm:$0xff] %vm204_vm1, %v3734_v37  ;;  %v3992_v18 = vadd.f32 %v3913_v54, %v3778_v16  ;;  %v5465_v63 = vpop.f32.mrb[118].mxu0  ;;  %v4166_v20 = vld [vmem:[#allocation2 + $0x168] sm:$0xff] }
 0x1d7   : > { %v5491_v5 = vpop.f32.mrb[118].mxu1  ;;  %4009 = vst.msk [vmem:[#allocation2 + $0x188] sm:$0xff] %vm204_vm1, %v3993_v14  ;;  %v3737_v47 = vadd.f32 %v5465_v63, %v3571_v21  ;;  %v3681_v26 = vpop.f32.mrb[119].mxu0  ;;  %4795 = vst.msk [vmem:[%s6663_s25 + $0xd8] sm:$0xff] %vm204_vm1, %v4166_v20  ;;  %v4165_v0 = vld [vmem:[#allocation2 + $0x160] sm:$0xff]  ;;  %v3578_v14 = vld [vmem:[#allocation2 + $0x1f0] sm:$0xff] }
 0x1d8   : > { %v3943_v28 = vpop.f32.mrb[119].mxu1  ;;  %4008 = vst.msk [vmem:[#allocation2 + $0x180] sm:$0xff] %vm204_vm1, %v3992_v18  ;;  %v3736_v23 = vadd.f32 %v3681_v26, %v3570_v24  ;;  %v3781_v6 = vld [vmem:[#allocation2 + $0x198] sm:$0xff]  ;;  %4794 = vst.msk [vmem:[%s6663_s25 + $0xd0] sm:$0xff] %vm204_vm1, %v4165_v0 }
 0x1d9   : > { %3753 = vst.msk [vmem:[#allocation2 + $0x1b8] sm:$0xff] %vm204_vm1, %v3737_v47  ;;  %v3995_v48 = vadd.f32 %v5485_v61, %v3781_v6  ;;  %v3780_v30 = vld [vmem:[#allocation2 + $0x190] sm:$0xff] }
 0x1da   : > { %3752 = vst.msk [vmem:[#allocation2 + $0x1b0] sm:$0xff] %vm204_vm1, %v3736_v23  ;;  %v3994_v32 = vadd.f32 %v3923_v15, %v3780_v30  ;;  %v5468_v34 = vpop.f32.mrb[120].mxu0  ;;  %v4168_v25 = vld [vmem:[#allocation2 + $0x178] sm:$0xff] }
 0x1db   : > { %v5494_v36 = vpop.f32.mrb[120].mxu1  ;;  %4011 = vst.msk [vmem:[#allocation2 + $0x198] sm:$0xff] %vm204_vm1, %v3995_v48  ;;  %v3739_v38 = vadd.f32 %v5468_v34, %v3573_v22  ;;  %v3691_v40 = vpop.f32.mrb[121].mxu0  ;;  %4797 = vst.msk [vmem:[%s6663_s25 + $0xf8] sm:$0xff] %vm204_vm1, %v4168_v25  ;;  %v4167_v42 = vld [vmem:[#allocation2 + $0x170] sm:$0xff] }
 0x1dc   : > { %v3953_v41 = vpop.f32.mrb[121].mxu1  ;;  %4010 = vst.msk [vmem:[#allocation2 + $0x190] sm:$0xff] %vm204_vm1, %v3994_v32  ;;  %v3738_v27 = vadd.f32 %v3691_v40, %v3572_v49  ;;  %v3783_v39 = vld [vmem:[#allocation2 + $0x1a8] sm:$0xff]  ;;  %4796 = vst.msk [vmem:[%s6663_s25 + $0xf0] sm:$0xff] %vm204_vm1, %v4167_v42 }
 0x1dd   : > { %3755 = vst.msk [vmem:[#allocation2 + $0x1c8] sm:$0xff] %vm204_vm1, %v3739_v38  ;;  %v3997_v50 = vadd.f32 %v5488_v35, %v3783_v39  ;;  %v3782_v43 = vld [vmem:[#allocation2 + $0x1a0] sm:$0xff] }
 0x1de   : > { %3754 = vst.msk [vmem:[#allocation2 + $0x1c0] sm:$0xff] %vm204_vm1, %v3738_v27  ;;  %v3996_v52 = vadd.f32 %v3933_v19, %v3782_v43  ;;  %v5471_v54 = vpop.f32.mrb[122].mxu0  ;;  %v4187_v55 = vld [vmem:[#allocation2 + $0x188] sm:$0xff] }
 0x1df   : > { %v5497_v56 = vpop.f32.mrb[122].mxu1  ;;  %4013 = vst.msk [vmem:[#allocation2 + $0x1a8] sm:$0xff] %vm204_vm1, %v3997_v50  ;;  %v3741_v29 = vadd.f32 %v5471_v54, %v3575_v53  ;;  %4220 = vrot.lane.b32.xlu1 %v4187_v55, %s5586_s26  ;;  %v3701_v51 = vpop.f32.mrb[123].mxu0  ;;  %v4186_v58 = vld [vmem:[#allocation2 + $0x180] sm:$0xff] }
 0x1e0   : > { %v3963_v59 = vpop.f32.mrb[123].mxu1  ;;  %4012 = vst.msk [vmem:[#allocation2 + $0x1a0] sm:$0xff] %vm204_vm1, %v3996_v52  ;;  %v3785_v60 = vld [vmem:[#allocation2 + $0x1b8] sm:$0xff]  ;;  %v3740_v61 = vadd.f32 %v3701_v51, %v3574_v57  ;;  %4218 = vrot.lane.b32.xlu0 %v4186_v58, %s5586_s26 }
 0x1e1   : > { %3757 = vst.msk [vmem:[#allocation2 + $0x1d8] sm:$0xff] %vm204_vm1, %v3741_v29  ;;  %v3999_v31 = vadd.f32 %v5491_v5, %v3785_v60  ;;  %v3784_v62 = vld [vmem:[#allocation2 + $0x1b0] sm:$0xff] }
 0x1e2   : > { %3756 = vst.msk [vmem:[#allocation2 + $0x1d0] sm:$0xff] %vm204_vm1, %v3740_v61  ;;  %v3998_v1 = vadd.f32 %v3943_v28, %v3784_v62  ;;  %v5474_v15 = vpop.f32.mrb[124].mxu0  ;;  %v4189_v44 = vld [vmem:[#allocation2 + $0x198] sm:$0xff] }
 0x1e3   : > { %v5500_v3 = vpop.f32.mrb[124].mxu1  ;;  %4015 = vst.msk [vmem:[#allocation2 + $0x1b8] sm:$0xff] %vm204_vm1, %v3999_v31  ;;  %v3743_v4 = vadd.f32 %v5474_v15, %v3577_v2  ;;  %4224 = vrot.lane.b32.xlu1 %v4189_v44, %s5586_s26  ;;  %v3711_v7 = vpop.f32.mrb[125].mxu0  ;;  %v4188_v8 = vld [vmem:[#allocation2 + $0x190] sm:$0xff] }
 0x1e4   : > { %v3973_v17 = vpop.f32.mrb[125].mxu1  ;;  %4014 = vst.msk [vmem:[#allocation2 + $0x1b0] sm:$0xff] %vm204_vm1, %v3998_v1  ;;  %v3787_v9 = vld [vmem:[#allocation2 + $0x1c8] sm:$0xff]  ;;  %v3742_v35 = vadd.f32 %v3711_v7, %v3576_v33  ;;  %4222 = vrot.lane.b32.xlu0 %v4188_v8, %s5586_s26 }
 0x1e5   : > { %3759 = vst.msk [vmem:[#allocation2 + $0x1e8] sm:$0xff] %vm204_vm1, %v3743_v4  ;;  %v4001_v45 = vadd.f32 %v5494_v36, %v3787_v9  ;;  %v3786_v10 = vld [vmem:[#allocation2 + $0x1c0] sm:$0xff] }
 0x1e6   : > { %3758 = vst.msk [vmem:[#allocation2 + $0x1e0] sm:$0xff] %vm204_vm1, %v3742_v35  ;;  %v4000_v11 = vadd.f32 %v3953_v41, %v3786_v10  ;;  %v5477_v19 = vpop.f32.mrb[126].mxu0  ;;  %v4191_v46 = vld [vmem:[#allocation2 + $0x1a8] sm:$0xff] }
 0x1e7   : > { %v5503_v37 = vpop.f32.mrb[126].mxu1  ;;  %4017 = vst.msk [vmem:[#allocation2 + $0x1c8] sm:$0xff] %vm204_vm1, %v4001_v45  ;;  %v3745_v13 = vadd.f32 %v5477_v19, %v3579_v12  ;;  %4228 = vrot.lane.b32.xlu1 %v4191_v46, %s5586_s26  ;;  %v3721_v16 = vpop.f32.mrb[127].mxu0  ;;  %v4190_v18 = vld [vmem:[#allocation2 + $0x1a0] sm:$0xff] }
 0x1e8   : > { %v3983_v21 = vpop.f32.mrb[127].mxu1  ;;  %4016 = vst.msk [vmem:[#allocation2 + $0x1c0] sm:$0xff] %vm204_vm1, %v4000_v11  ;;  %v3789_v63 = vld [vmem:[#allocation2 + $0x1d8] sm:$0xff]  ;;  %v3744_v5 = vadd.f32 %v3721_v16, %v3578_v14  ;;  %4226 = vrot.lane.b32.xlu0 %v4190_v18, %s5586_s26 }
 0x1e9   : > { %3761 = vst.msk [vmem:[#allocation2 + $0x1f8] sm:$0xff] %vm204_vm1, %v3745_v13  ;;  %v4003_v20 = vadd.f32 %v5497_v56, %v3789_v63  ;;  %v3788_v47 = vld [vmem:[#allocation2 + $0x1d0] sm:$0xff] }
 0x1ea   : > { %3760 = vst.msk [vmem:[#allocation2 + $0x1f0] sm:$0xff] %vm204_vm1, %v3744_v5  ;;  %v4002_v24 = vadd.f32 %v3963_v59, %v3788_v47  ;;  %v4193_v26 = vld [vmem:[#allocation2 + $0x1b8] sm:$0xff] }
 0x1eb   : > { %4019 = vst.msk [vmem:[#allocation2 + $0x1d8] sm:$0xff] %vm204_vm1, %v4003_v20  ;;  %4232 = vrot.lane.b32.xlu1 %v4193_v26, %s5586_s26  ;;  %v4192_v28 = vld [vmem:[#allocation2 + $0x1b0] sm:$0xff] }
 0x1ec   : > { %4018 = vst.msk [vmem:[#allocation2 + $0x1d0] sm:$0xff] %vm204_vm1, %v4002_v24  ;;  %v3791_v0 = vld [vmem:[#allocation2 + $0x1e8] sm:$0xff]  ;;  %4230 = vrot.lane.b32.xlu0 %v4192_v28, %s5586_s26 }
 0x1ed   : > { %v4005_v23 = vadd.f32 %v5500_v3, %v3791_v0  ;;  %v3790_v6 = vld [vmem:[#allocation2 + $0x1e0] sm:$0xff] }
 0x1ee   : > { %v4004_v48 = vadd.f32 %v3973_v17, %v3790_v6  ;;  %v4195_v30 = vld [vmem:[#allocation2 + $0x1c8] sm:$0xff] }
 0x1ef   : > { %4021 = vst.msk [vmem:[#allocation2 + $0x1e8] sm:$0xff] %vm204_vm1, %v4005_v23  ;;  %4236 = vrot.lane.b32.xlu1 %v4195_v30, %s5586_s26  ;;  %v4194_v32 = vld [vmem:[#allocation2 + $0x1c0] sm:$0xff] }
 0x1f0   : > { %4020 = vst.msk [vmem:[#allocation2 + $0x1e0] sm:$0xff] %vm204_vm1, %v4004_v48  ;;  %v3793_v22 = vld [vmem:[#allocation2 + $0x1f8] sm:$0xff]  ;;  %4234 = vrot.lane.b32.xlu0 %v4194_v32, %s5586_s26 }
 0x1f1   : > { %v4007_v34 = vadd.f32 %v5503_v37, %v3793_v22  ;;  %v3792_v36 = vld [vmem:[#allocation2 + $0x1f0] sm:$0xff] }
 0x1f2   : > { %v4006_v25 = vadd.f32 %v3983_v21, %v3792_v36  ;;  %v4197_v38 = vld [vmem:[#allocation2 + $0x1d8] sm:$0xff] }
 0x1f3   : > { %4023 = vst.msk [vmem:[#allocation2 + $0x1f8] sm:$0xff] %vm204_vm1, %v4007_v34  ;;  %4240 = vrot.lane.b32.xlu1 %v4197_v38, %s5586_s26  ;;  %v4196_v49 = vld [vmem:[#allocation2 + $0x1d0] sm:$0xff] }
 0x1f4   : > { %4022 = vst.msk [vmem:[#allocation2 + $0x1f0] sm:$0xff] %vm204_vm1, %v4006_v25  ;;  %4238 = vrot.lane.b32.xlu0 %v4196_v49, %s5586_s26 }
 0x1f6   : > { %v4199_v40 = vld [vmem:[#allocation2 + $0x1e8] sm:$0xff] }
 0x1f7   : > { %4244 = vrot.lane.b32.xlu1 %v4199_v40, %s5586_s26  ;;  %v4198_v41 = vld [vmem:[#allocation2 + $0x1e0] sm:$0xff] }
 0x1f8   : > { %4242 = vrot.lane.b32.xlu0 %v4198_v41, %s5586_s26 }
 0x1fa   : > { %v4201_v42 = vld [vmem:[#allocation2 + $0x1f8] sm:$0xff] }
 0x1fb   : > { %4248 = vrot.lane.b32.xlu1 %v4201_v42, %s5586_s26  ;;  %v4200_v27 = vld [vmem:[#allocation2 + $0x1f0] sm:$0xff] }
 0x1fc   : > { %4246 = vrot.lane.b32.xlu0 %v4200_v27, %s5586_s26 }
 0x207   : > { %v4091_v39 = vpop.permute.xlu0 %4090 }
 0x208   : > { %4138 = vst.msk [vmem:[%s6663_s25 + $0x8] sm:$0xff] %vm4136_vm2, %v4091_v39 }
 0x20b   : > { %v4089_v50 = vpop.permute.xlu0 %4088  ;;  %v4095_v43 = vpop.permute.xlu1 %4094 }
 0x20c   : > { %4137 = vst.msk [vmem:[%s6663_s25] sm:$0xff] %vm4136_vm2, %v4089_v50  ;;  %4140 = vst.msk [vmem:[%s6663_s25 + $0x28] sm:$0xff] %vm4136_vm2, %v4095_v43 }
 0x20f   : > { %v4093_v52 = vpop.permute.xlu1 %4092 }
 0x210   : > { %4139 = vst.msk [vmem:[%s6663_s25 + $0x20] sm:$0xff] %vm4136_vm2, %v4093_v52  ;;  %v4097_v53 = vpop.permute.xlu0 %4096 }
 0x211   : > { %4141 = vst.msk [vmem:[%s6663_s25 + $0x40] sm:$0xff] %vm4136_vm2, %v4097_v53 }
 0x213   : > { %v4099_v54 = vpop.permute.xlu1 %4098 }
 0x214   : > { %4142 = vst.msk [vmem:[%s6663_s25 + $0x48] sm:$0xff] %vm4136_vm2, %v4099_v54  ;;  %v4101_v55 = vpop.permute.xlu0 %4100 }
 0x215   : > { %4143 = vst.msk [vmem:[%s6663_s25 + $0x60] sm:$0xff] %vm4136_vm2, %v4101_v55 }
 0x217   : > { %v4103_v56 = vpop.permute.xlu1 %4102 }
 0x218   : > { %4144 = vst.msk [vmem:[%s6663_s25 + $0x68] sm:$0xff] %vm4136_vm2, %v4103_v56  ;;  %v4105_v29 = vpop.permute.xlu0 %4104 }
 0x219   : > { %4145 = vst.msk [vmem:[%s6663_s25 + $0x80] sm:$0xff] %vm4136_vm2, %v4105_v29 }
 0x21b   : > { %v4107_v57 = vpop.permute.xlu1 %4106 }
 0x21c   : > { %4146 = vst.msk [vmem:[%s6663_s25 + $0x88] sm:$0xff] %vm4136_vm2, %v4107_v57  ;;  %v4109_v51 = vpop.permute.xlu0 %4108 }
 0x21d   : > { %4147 = vst.msk [vmem:[%s6663_s25 + $0xa0] sm:$0xff] %vm4136_vm2, %v4109_v51 }
 0x21f   : > { %v4111_v58 = vpop.permute.xlu1 %4110 }
 0x220   : > { %4148 = vst.msk [vmem:[%s6663_s25 + $0xa8] sm:$0xff] %vm4136_vm2, %v4111_v58  ;;  %v4113_v59 = vpop.permute.xlu0 %4112 }
 0x221   : > { %4149 = vst.msk [vmem:[%s6663_s25 + $0xc0] sm:$0xff] %vm4136_vm2, %v4113_v59 }
 0x223   : > { %v4115_v60 = vpop.permute.xlu1 %4114 }
 0x224   : > { %4150 = vst.msk [vmem:[%s6663_s25 + $0xc8] sm:$0xff] %vm4136_vm2, %v4115_v60  ;;  %v4117_v61 = vpop.permute.xlu0 %4116 }
 0x225   : > { %4151 = vst.msk [vmem:[%s6663_s25 + $0xe0] sm:$0xff] %vm4136_vm2, %v4117_v61 }
 0x227   : > { %v4119_v31 = vpop.permute.xlu1 %4118 }
 0x228   : > { %4152 = vst.msk [vmem:[%s6663_s25 + $0xe8] sm:$0xff] %vm4136_vm2, %v4119_v31 }
 0x251   : > { %v4221_v62 = vpop.permute.xlu1 %4220 }
 0x252   : > { %4799 = vst.msk [vmem:[%s6663_s25 + $0x18] sm:$0xff] %vm4136_vm2, %v4221_v62  ;;  %v4219_v1 = vpop.permute.xlu0 %4218 }
 0x253   : > { %4798 = vst.msk [vmem:[%s6663_s25 + $0x10] sm:$0xff] %vm4136_vm2, %v4219_v1 }
 0x255   : > { %v4225_v2 = vpop.permute.xlu1 %4224 }
 0x256   : > { %4801 = vst.msk [vmem:[%s6663_s25 + $0x38] sm:$0xff] %vm4136_vm2, %v4225_v2  ;;  %v4223_v15 = vpop.permute.xlu0 %4222 }
 0x257   : > { %4800 = vst.msk [vmem:[%s6663_s25 + $0x30] sm:$0xff] %vm4136_vm2, %v4223_v15 }
 0x259   : > { %v4229_v44 = vpop.permute.xlu1 %4228 }
 0x25a   : > { %4803 = vst.msk [vmem:[%s6663_s25 + $0x58] sm:$0xff] %vm4136_vm2, %v4229_v44  ;;  %v4227_v3 = vpop.permute.xlu0 %4226 }
 0x25b   : > { %4802 = vst.msk [vmem:[%s6663_s25 + $0x50] sm:$0xff] %vm4136_vm2, %v4227_v3 }
 0x25d   : > { %v4233_v4 = vpop.permute.xlu1 %4232 }
 0x25e   : > { %4805 = vst.msk [vmem:[%s6663_s25 + $0x78] sm:$0xff] %vm4136_vm2, %v4233_v4  ;;  %v4231_v33 = vpop.permute.xlu0 %4230 }
 0x25f   : > { %4804 = vst.msk [vmem:[%s6663_s25 + $0x70] sm:$0xff] %vm4136_vm2, %v4231_v33 }
 0x261   : > { %v4237_v7 = vpop.permute.xlu1 %4236 }
 0x262   : > { %4807 = vst.msk [vmem:[%s6663_s25 + $0x98] sm:$0xff] %vm4136_vm2, %v4237_v7  ;;  %v4235_v8 = vpop.permute.xlu0 %4234 }
 0x263   : > { %4806 = vst.msk [vmem:[%s6663_s25 + $0x90] sm:$0xff] %vm4136_vm2, %v4235_v8 }
 0x265   : > { %v4241_v17 = vpop.permute.xlu1 %4240 }
 0x266   : > { %4809 = vst.msk [vmem:[%s6663_s25 + $0xb8] sm:$0xff] %vm4136_vm2, %v4241_v17  ;;  %v4239_v9 = vpop.permute.xlu0 %4238 }
 0x267   : > { %4808 = vst.msk [vmem:[%s6663_s25 + $0xb0] sm:$0xff] %vm4136_vm2, %v4239_v9 }
 0x269   : > { %v4245_v35 = vpop.permute.xlu1 %4244 }
 0x26a   : > { %4811 = vst.msk [vmem:[%s6663_s25 + $0xd8] sm:$0xff] %vm4136_vm2, %v4245_v35  ;;  %v4243_v45 = vpop.permute.xlu0 %4242 }
 0x26b   : > { %4810 = vst.msk [vmem:[%s6663_s25 + $0xd0] sm:$0xff] %vm4136_vm2, %v4243_v45 }
 0x26d   : > { %v4249_v10 = vpop.permute.xlu1 %4248 }
 0x26e   : > { %4813 = vst.msk [vmem:[%s6663_s25 + $0xf8] sm:$0xff] %vm4136_vm2, %v4249_v10  ;;  %v4247_v11 = vpop.permute.xlu0 %4246 }
 0x26f   : > { %4812 = vst.msk [vmem:[%s6663_s25 + $0xf0] sm:$0xff] %vm4136_vm2, %v4247_v11 }
 0x270 PF: > { %s13_s16 = sadd.s32 1, %s5584_s16   ;;  %s6997_s12 = smov %s5576_s14 }
 0x271   : > { %p10_p7 = scmp.ge.s32.totalorder %s13_s16, 6   ;;  %s6998_s13 = smov %s5580_s15 }
 0x272   : > { %s6999_s14 = smov %s7002_s17  ;;  %s7000_s15 = smov %s7006_s18 }
 0x273   :  { %12 = sbr.rel (!%p10_p7) target bundleno = 3 (0x3), region = 84 }

</bundles_post_ra>
